<compile_context>
chip_gen: v7x
topology: tpu7x:2x2x1
jax: 0.10.0
libtpu: 0.0.40
codegen_flags: <defaults>
</compile_context>

<pallas_src>
from math import sqrt

import jax
import jax.numpy as jnp
from jax import lax
from jax.experimental import pallas as pl
from jax.experimental.pallas import tpu as pltpu

N_LAYERS = 8
HIDDEN = 512


def mapping_kernel(*refs):
    # refs = (x, w_0..w_7, b_0..b_7, out); w_li is raw [out, in] (bf16).
    x_ref = refs[0]
    w_refs = refs[1:1 + N_LAYERS]
    b_refs = refs[1 + N_LAYERS:1 + 2 * N_LAYERS]
    out_ref = refs[1 + 2 * N_LAYERS]

    x = x_ref[...].astype(jnp.float32)
    # Pixel-norm over the feature axis: x / sqrt(mean(x^2, dim=1) + 1e-8)  (f32).
    h = x * lax.rsqrt(jnp.mean(x * x, axis=1, keepdims=True) + 1e-8)

    for li in range(N_LAYERS):
        w = w_refs[li][...]                      # [out, in] bf16, no transpose
        c = 1.0 / sqrt(w.shape[1])               # equalized-LR constant (static)
        h_in = (h * c).astype(jnp.bfloat16)      # fold scale into activations
        # h @ W.T without materializing the transpose: contract the `in` axes.
        h = lax.dot_general(h_in, w, (((1,), (1,)), ((), ())),
                            preferred_element_type=jnp.float32)
        h = h + b_refs[li][...].astype(jnp.float32)
        if li < N_LAYERS - 1:
            h = jnp.maximum(h, 0.0)              # ReLU between layers, not after last

    out_ref[...] = h.astype(out_ref.dtype)


def mapping_network_forward(x, weights, biases, *, b_tile=None):
    """x: [B, z_dim] f32.  weights[i]: raw [out_i, in_i] (f32 or bf16).
    biases[i]: [out_i]."""
    B, z_dim = x.shape
    w_dim = weights[-1].shape[0]

    # Weights streamed as bf16 (no-op if the caller already stores bf16).
    w_bf16 = [w.astype(jnp.bfloat16) for w in weights]
    b2d = [b.astype(jnp.float32).reshape(1, -1) for b in biases]

    if b_tile is None:
        b_tile = B if B <= 256 else 256          # 256 rows fills v6e/v7x MXU
    nb = pl.cdiv(B, b_tile)

    def batch_map(i):
        return (i, 0)

    def const_map(i):
        return (0, 0)

    fn = pl.pallas_call(
        mapping_kernel,
        out_shape=jax.ShapeDtypeStruct((B, w_dim), jnp.float32),
        grid=(nb,),
        in_specs=[pl.BlockSpec((b_tile, z_dim), batch_map)]
                 + [pl.BlockSpec(w.shape, const_map) for w in w_bf16]
                 + [pl.BlockSpec(b.shape, const_map) for b in b2d],
        out_specs=pl.BlockSpec((b_tile, w_dim), batch_map),
        compiler_params=pltpu.CompilerParams(
            dimension_semantics=("parallel",),
            vmem_limit_bytes=32 << 20,           # fits v7x's 64 MiB physical VMEM
        ),
    )
    return fn(x, *w_bf16, *b2d)


def mapping_network_reference(x, weights, biases):
    """Pure-JAX reference. Matmul math in f32 with whatever dtype the weights carry."""
    h = x / jnp.sqrt(jnp.mean(x * x, axis=1, keepdims=True) + 1e-8)
    for li, (w, b) in enumerate(zip(weights, biases)):
        c = 1.0 / sqrt(w.shape[1])
        h = h @ (w.astype(jnp.float32) * c).T + b
        if li < len(weights) - 1:
            h = jnp.maximum(h, 0.0)
    return h


if __name__ == "__main__":
    B, Z_DIM, W_DIM = 8, 256, 256

    key = jax.random.PRNGKey(0)
    kx, *kws = jax.random.split(key, 1 + N_LAYERS)

    x = jax.random.normal(kx, (B, Z_DIM), dtype=jnp.float32)

    # Layer dims: z_dim -> 512 x7 -> w_dim
    dims = [Z_DIM] + [HIDDEN] * (N_LAYERS - 1) + [W_DIM]
    weights_f32 = [
        jax.random.normal(kws[i], (dims[i + 1], dims[i]), dtype=jnp.float32)
        for i in range(N_LAYERS)
    ]
    biases = [jnp.zeros((dims[i + 1],), dtype=jnp.float32) for i in range(N_LAYERS)]

    # Parameters stored as bf16 up front (the kernel streams bf16 weights from HBM).
    weights = [w.astype(jnp.bfloat16) for w in weights_f32]

    out = mapping_network_forward(x, weights, biases)
    out = jax.block_until_ready(out)
    assert out.shape == (B, W_DIM)
    assert bool(jnp.all(jnp.isfinite(out)))

    # Tight check vs a reference using the same bf16-quantized weights.
    ref_bf16 = mapping_network_reference(x, weights, biases)
    assert jnp.allclose(out, ref_bf16, atol=2e-2, rtol=2e-2), "mismatch vs bf16-weight reference"

    # Looser check vs the full-f32 reference (covers bf16 weight quantization error).
    ref_f32 = mapping_network_reference(x, weights_f32, biases)
    assert jnp.allclose(out, ref_f32, atol=5e-2, rtol=5e-2), "mismatch vs f32 reference"

    print("KERNEL_OK")
</pallas_src>

<mosaic_0001>
module attributes {stable_mosaic.version = 11 : i64} {
  func.func @mapping_kernel(%arg0: i32, %arg1: memref<8x256xf32, #tpu.memory_space<vmem>>, %arg2: memref<512x256xbf16, #tpu.memory_space<vmem>>, %arg3: memref<512x512xbf16, #tpu.memory_space<vmem>>, %arg4: memref<512x512xbf16, #tpu.memory_space<vmem>>, %arg5: memref<512x512xbf16, #tpu.memory_space<vmem>>, %arg6: memref<512x512xbf16, #tpu.memory_space<vmem>>, %arg7: memref<512x512xbf16, #tpu.memory_space<vmem>>, %arg8: memref<512x512xbf16, #tpu.memory_space<vmem>>, %arg9: memref<256x512xbf16, #tpu.memory_space<vmem>>, %arg10: memref<1x512xf32, #tpu.memory_space<vmem>>, %arg11: memref<1x512xf32, #tpu.memory_space<vmem>>, %arg12: memref<1x512xf32, #tpu.memory_space<vmem>>, %arg13: memref<1x512xf32, #tpu.memory_space<vmem>>, %arg14: memref<1x512xf32, #tpu.memory_space<vmem>>, %arg15: memref<1x512xf32, #tpu.memory_space<vmem>>, %arg16: memref<1x512xf32, #tpu.memory_space<vmem>>, %arg17: memref<1x256xf32, #tpu.memory_space<vmem>>, %arg18: memref<8x256xf32, #tpu.memory_space<vmem>>) attributes {dimension_semantics = [#tpu.dimension_semantics<parallel>], iteration_bounds = array<i64: 1>, scalar_prefetch = 0 : i64, scratch_operands = 0 : i64, tpu.core_type = #tpu.core_type<tc>, window_params = [{transform_indices = @transform_0, window_bounds = array<i64: 8, 256>}, {pipeline_mode = #tpu.pipeline_mode<synchronous>, transform_indices = @transform_1, window_bounds = array<i64: 512, 256>}, {pipeline_mode = #tpu.pipeline_mode<synchronous>, transform_indices = @transform_2, window_bounds = array<i64: 512, 512>}, {pipeline_mode = #tpu.pipeline_mode<synchronous>, transform_indices = @transform_3, window_bounds = array<i64: 512, 512>}, {pipeline_mode = #tpu.pipeline_mode<synchronous>, transform_indices = @transform_4, window_bounds = array<i64: 512, 512>}, {pipeline_mode = #tpu.pipeline_mode<synchronous>, transform_indices = @transform_5, window_bounds = array<i64: 512, 512>}, {pipeline_mode = #tpu.pipeline_mode<synchronous>, transform_indices = @transform_6, window_bounds = array<i64: 512, 512>}, {pipeline_mode = #tpu.pipeline_mode<synchronous>, transform_indices = @transform_7, window_bounds = array<i64: 512, 512>}, {pipeline_mode = #tpu.pipeline_mode<synchronous>, transform_indices = @transform_8, window_bounds = array<i64: 256, 512>}, {pipeline_mode = #tpu.pipeline_mode<synchronous>, transform_indices = @transform_9, window_bounds = array<i64: 1, 512>}, {pipeline_mode = #tpu.pipeline_mode<synchronous>, transform_indices = @transform_10, window_bounds = array<i64: 1, 512>}, {pipeline_mode = #tpu.pipeline_mode<synchronous>, transform_indices = @transform_11, window_bounds = array<i64: 1, 512>}, {pipeline_mode = #tpu.pipeline_mode<synchronous>, transform_indices = @transform_12, window_bounds = array<i64: 1, 512>}, {pipeline_mode = #tpu.pipeline_mode<synchronous>, transform_indices = @transform_13, window_bounds = array<i64: 1, 512>}, {pipeline_mode = #tpu.pipeline_mode<synchronous>, transform_indices = @transform_14, window_bounds = array<i64: 1, 512>}, {pipeline_mode = #tpu.pipeline_mode<synchronous>, transform_indices = @transform_15, window_bounds = array<i64: 1, 512>}, {pipeline_mode = #tpu.pipeline_mode<synchronous>, transform_indices = @transform_16, window_bounds = array<i64: 1, 256>}, {transform_indices = @transform_17, window_bounds = array<i64: 8, 256>}]} {
    %c0 = arith.constant 0 : index
    %c0_0 = arith.constant 0 : index
    %0 = vector.load %arg1[%c0, %c0_0] : memref<8x256xf32, #tpu.memory_space<vmem>>, vector<8x256xf32>
    %1 = arith.mulf %0, %0 : vector<8x256xf32>
    %cst = arith.constant dense<0.000000e+00> : vector<8xf32>
    %2 = vector.multi_reduction <add>, %1, %cst [1] : vector<8x256xf32> to vector<8xf32>
    %3 = vector.shape_cast %2 : vector<8xf32> to vector<8x1xf32>
    %cst_1 = arith.constant 2.560000e+02 : f32
    %4 = vector.broadcast %cst_1 : f32 to vector<8x1xf32>
    %5 = arith.divf %3, %4 : vector<8x1xf32>
    %cst_2 = arith.constant 9.99999993E-9 : f32
    %6 = vector.broadcast %cst_2 : f32 to vector<8x1xf32>
    %7 = arith.addf %5, %6 : vector<8x1xf32>
    %8 = math.rsqrt %7 : vector<8x1xf32>
    %9 = vector.broadcast %8 : vector<8x1xf32> to vector<8x256xf32>
    %10 = arith.mulf %0, %9 : vector<8x256xf32>
    %c0_3 = arith.constant 0 : index
    %c0_4 = arith.constant 0 : index
    %11 = vector.load %arg2[%c0_3, %c0_4] : memref<512x256xbf16, #tpu.memory_space<vmem>>, vector<512x256xbf16>
    %cst_5 = arith.constant 6.250000e-02 : f32
    %12 = vector.broadcast %cst_5 : f32 to vector<8x256xf32>
    %13 = arith.mulf %10, %12 : vector<8x256xf32>
    %14 = arith.truncf %13 : vector<8x256xf32> to vector<8x256xbf16>
    %cst_6 = arith.constant dense<0.000000e+00> : vector<8x512xf32>
    %15 = tpu.matmul %14, %11, %cst_6 {dimension_numbers = #tpu.dot_dimension_numbers<[1], [1], [0], [0], [0, 0, 1, 0], [], []>} : vector<8x256xbf16>, vector<512x256xbf16>, vector<8x512xf32> -> vector<8x512xf32>
    %c0_7 = arith.constant 0 : index
    %c0_8 = arith.constant 0 : index
    %16 = vector.load %arg10[%c0_7, %c0_8] : memref<1x512xf32, #tpu.memory_space<vmem>>, vector<1x512xf32>
    %17 = vector.broadcast %16 : vector<1x512xf32> to vector<8x512xf32>
    %18 = arith.addf %15, %17 : vector<8x512xf32>
    %cst_9 = arith.constant 0.000000e+00 : f32
    %19 = vector.broadcast %cst_9 : f32 to vector<8x512xf32>
    %20 = arith.maximumf %18, %19 : vector<8x512xf32>
    %c0_10 = arith.constant 0 : index
    %c0_11 = arith.constant 0 : index
    %21 = vector.load %arg3[%c0_10, %c0_11] : memref<512x512xbf16, #tpu.memory_space<vmem>>, vector<512x512xbf16>
    %cst_12 = arith.constant 0.0441941731 : f32
    %22 = vector.broadcast %cst_12 : f32 to vector<8x512xf32>
    %23 = arith.mulf %20, %22 : vector<8x512xf32>
    %24 = arith.truncf %23 : vector<8x512xf32> to vector<8x512xbf16>
    %cst_13 = arith.constant dense<0.000000e+00> : vector<8x512xf32>
    %25 = tpu.matmul %24, %21, %cst_13 {dimension_numbers = #tpu.dot_dimension_numbers<[1], [1], [0], [0], [0, 0, 1, 0], [], []>} : vector<8x512xbf16>, vector<512x512xbf16>, vector<8x512xf32> -> vector<8x512xf32>
    %c0_14 = arith.constant 0 : index
    %c0_15 = arith.constant 0 : index
    %26 = vector.load %arg11[%c0_14, %c0_15] : memref<1x512xf32, #tpu.memory_space<vmem>>, vector<1x512xf32>
    %27 = vector.broadcast %26 : vector<1x512xf32> to vector<8x512xf32>
    %28 = arith.addf %25, %27 : vector<8x512xf32>
    %cst_16 = arith.constant 0.000000e+00 : f32
    %29 = vector.broadcast %cst_16 : f32 to vector<8x512xf32>
    %30 = arith.maximumf %28, %29 : vector<8x512xf32>
    %c0_17 = arith.constant 0 : index
    %c0_18 = arith.constant 0 : index
    %31 = vector.load %arg4[%c0_17, %c0_18] : memref<512x512xbf16, #tpu.memory_space<vmem>>, vector<512x512xbf16>
    %cst_19 = arith.constant 0.0441941731 : f32
    %32 = vector.broadcast %cst_19 : f32 to vector<8x512xf32>
    %33 = arith.mulf %30, %32 : vector<8x512xf32>
    %34 = arith.truncf %33 : vector<8x512xf32> to vector<8x512xbf16>
    %cst_20 = arith.constant dense<0.000000e+00> : vector<8x512xf32>
    %35 = tpu.matmul %34, %31, %cst_20 {dimension_numbers = #tpu.dot_dimension_numbers<[1], [1], [0], [0], [0, 0, 1, 0], [], []>} : vector<8x512xbf16>, vector<512x512xbf16>, vector<8x512xf32> -> vector<8x512xf32>
    %c0_21 = arith.constant 0 : index
    %c0_22 = arith.constant 0 : index
    %36 = vector.load %arg12[%c0_21, %c0_22] : memref<1x512xf32, #tpu.memory_space<vmem>>, vector<1x512xf32>
    %37 = vector.broadcast %36 : vector<1x512xf32> to vector<8x512xf32>
    %38 = arith.addf %35, %37 : vector<8x512xf32>
    %cst_23 = arith.constant 0.000000e+00 : f32
    %39 = vector.broadcast %cst_23 : f32 to vector<8x512xf32>
    %40 = arith.maximumf %38, %39 : vector<8x512xf32>
    %c0_24 = arith.constant 0 : index
    %c0_25 = arith.constant 0 : index
    %41 = vector.load %arg5[%c0_24, %c0_25] : memref<512x512xbf16, #tpu.memory_space<vmem>>, vector<512x512xbf16>
    %cst_26 = arith.constant 0.0441941731 : f32
    %42 = vector.broadcast %cst_26 : f32 to vector<8x512xf32>
    %43 = arith.mulf %40, %42 : vector<8x512xf32>
    %44 = arith.truncf %43 : vector<8x512xf32> to vector<8x512xbf16>
    %cst_27 = arith.constant dense<0.000000e+00> : vector<8x512xf32>
    %45 = tpu.matmul %44, %41, %cst_27 {dimension_numbers = #tpu.dot_dimension_numbers<[1], [1], [0], [0], [0, 0, 1, 0], [], []>} : vector<8x512xbf16>, vector<512x512xbf16>, vector<8x512xf32> -> vector<8x512xf32>
    %c0_28 = arith.constant 0 : index
    %c0_29 = arith.constant 0 : index
    %46 = vector.load %arg13[%c0_28, %c0_29] : memref<1x512xf32, #tpu.memory_space<vmem>>, vector<1x512xf32>
    %47 = vector.broadcast %46 : vector<1x512xf32> to vector<8x512xf32>
    %48 = arith.addf %45, %47 : vector<8x512xf32>
    %cst_30 = arith.constant 0.000000e+00 : f32
    %49 = vector.broadcast %cst_30 : f32 to vector<8x512xf32>
    %50 = arith.maximumf %48, %49 : vector<8x512xf32>
    %c0_31 = arith.constant 0 : index
    %c0_32 = arith.constant 0 : index
    %51 = vector.load %arg6[%c0_31, %c0_32] : memref<512x512xbf16, #tpu.memory_space<vmem>>, vector<512x512xbf16>
    %cst_33 = arith.constant 0.0441941731 : f32
    %52 = vector.broadcast %cst_33 : f32 to vector<8x512xf32>
    %53 = arith.mulf %50, %52 : vector<8x512xf32>
    %54 = arith.truncf %53 : vector<8x512xf32> to vector<8x512xbf16>
    %cst_34 = arith.constant dense<0.000000e+00> : vector<8x512xf32>
    %55 = tpu.matmul %54, %51, %cst_34 {dimension_numbers = #tpu.dot_dimension_numbers<[1], [1], [0], [0], [0, 0, 1, 0], [], []>} : vector<8x512xbf16>, vector<512x512xbf16>, vector<8x512xf32> -> vector<8x512xf32>
    %c0_35 = arith.constant 0 : index
    %c0_36 = arith.constant 0 : index
    %56 = vector.load %arg14[%c0_35, %c0_36] : memref<1x512xf32, #tpu.memory_space<vmem>>, vector<1x512xf32>
    %57 = vector.broadcast %56 : vector<1x512xf32> to vector<8x512xf32>
    %58 = arith.addf %55, %57 : vector<8x512xf32>
    %cst_37 = arith.constant 0.000000e+00 : f32
    %59 = vector.broadcast %cst_37 : f32 to vector<8x512xf32>
    %60 = arith.maximumf %58, %59 : vector<8x512xf32>
    %c0_38 = arith.constant 0 : index
    %c0_39 = arith.constant 0 : index
    %61 = vector.load %arg7[%c0_38, %c0_39] : memref<512x512xbf16, #tpu.memory_space<vmem>>, vector<512x512xbf16>
    %cst_40 = arith.constant 0.0441941731 : f32
    %62 = vector.broadcast %cst_40 : f32 to vector<8x512xf32>
    %63 = arith.mulf %60, %62 : vector<8x512xf32>
    %64 = arith.truncf %63 : vector<8x512xf32> to vector<8x512xbf16>
    %cst_41 = arith.constant dense<0.000000e+00> : vector<8x512xf32>
    %65 = tpu.matmul %64, %61, %cst_41 {dimension_numbers = #tpu.dot_dimension_numbers<[1], [1], [0], [0], [0, 0, 1, 0], [], []>} : vector<8x512xbf16>, vector<512x512xbf16>, vector<8x512xf32> -> vector<8x512xf32>
    %c0_42 = arith.constant 0 : index
    %c0_43 = arith.constant 0 : index
    %66 = vector.load %arg15[%c0_42, %c0_43] : memref<1x512xf32, #tpu.memory_space<vmem>>, vector<1x512xf32>
    %67 = vector.broadcast %66 : vector<1x512xf32> to vector<8x512xf32>
    %68 = arith.addf %65, %67 : vector<8x512xf32>
    %cst_44 = arith.constant 0.000000e+00 : f32
    %69 = vector.broadcast %cst_44 : f32 to vector<8x512xf32>
    %70 = arith.maximumf %68, %69 : vector<8x512xf32>
    %c0_45 = arith.constant 0 : index
    %c0_46 = arith.constant 0 : index
    %71 = vector.load %arg8[%c0_45, %c0_46] : memref<512x512xbf16, #tpu.memory_space<vmem>>, vector<512x512xbf16>
    %cst_47 = arith.constant 0.0441941731 : f32
    %72 = vector.broadcast %cst_47 : f32 to vector<8x512xf32>
    %73 = arith.mulf %70, %72 : vector<8x512xf32>
    %74 = arith.truncf %73 : vector<8x512xf32> to vector<8x512xbf16>
    %cst_48 = arith.constant dense<0.000000e+00> : vector<8x512xf32>
    %75 = tpu.matmul %74, %71, %cst_48 {dimension_numbers = #tpu.dot_dimension_numbers<[1], [1], [0], [0], [0, 0, 1, 0], [], []>} : vector<8x512xbf16>, vector<512x512xbf16>, vector<8x512xf32> -> vector<8x512xf32>
    %c0_49 = arith.constant 0 : index
    %c0_50 = arith.constant 0 : index
    %76 = vector.load %arg16[%c0_49, %c0_50] : memref<1x512xf32, #tpu.memory_space<vmem>>, vector<1x512xf32>
    %77 = vector.broadcast %76 : vector<1x512xf32> to vector<8x512xf32>
    %78 = arith.addf %75, %77 : vector<8x512xf32>
    %cst_51 = arith.constant 0.000000e+00 : f32
    %79 = vector.broadcast %cst_51 : f32 to vector<8x512xf32>
    %80 = arith.maximumf %78, %79 : vector<8x512xf32>
    %c0_52 = arith.constant 0 : index
    %c0_53 = arith.constant 0 : index
    %81 = vector.load %arg9[%c0_52, %c0_53] : memref<256x512xbf16, #tpu.memory_space<vmem>>, vector<256x512xbf16>
    %cst_54 = arith.constant 0.0441941731 : f32
    %82 = vector.broadcast %cst_54 : f32 to vector<8x512xf32>
    %83 = arith.mulf %80, %82 : vector<8x512xf32>
    %84 = arith.truncf %83 : vector<8x512xf32> to vector<8x512xbf16>
    %cst_55 = arith.constant dense<0.000000e+00> : vector<8x256xf32>
    %85 = tpu.matmul %84, %81, %cst_55 {dimension_numbers = #tpu.dot_dimension_numbers<[1], [1], [0], [0], [0, 0, 1, 0], [], []>} : vector<8x512xbf16>, vector<256x512xbf16>, vector<8x256xf32> -> vector<8x256xf32>
    %c0_56 = arith.constant 0 : index
    %c0_57 = arith.constant 0 : index
    %86 = vector.load %arg17[%c0_56, %c0_57] : memref<1x256xf32, #tpu.memory_space<vmem>>, vector<1x256xf32>
    %87 = vector.broadcast %86 : vector<1x256xf32> to vector<8x256xf32>
    %88 = arith.addf %85, %87 : vector<8x256xf32>
    %c0_58 = arith.constant 0 : index
    %c0_59 = arith.constant 0 : index
    %89 = vector.load %arg18[%c0_58, %c0_59] : memref<8x256xf32, #tpu.memory_space<vmem>>, vector<8x256xf32>
    tpu.vector_store %arg18[%c0_58, %c0_59], %88 {strides = array<i32>} : memref<8x256xf32, #tpu.memory_space<vmem>>, vector<8x256xf32>,
    return
  }
  func.func @transform_0(%arg0: i32) -> (i32, i32) {
    %c0_i32 = arith.constant 0 : i32
    %c0_i32_0 = arith.constant 0 : i32
    return %arg0, %c0_i32 : i32, i32
  }
  func.func @transform_1(%arg0: i32) -> (i32, i32) {
    %c0_i32 = arith.constant 0 : i32
    %c0_i32_0 = arith.constant 0 : i32
    %c0_i32_1 = arith.constant 0 : i32
    return %c0_i32, %c0_i32_0 : i32, i32
  }
  func.func @transform_2(%arg0: i32) -> (i32, i32) {
    %c0_i32 = arith.constant 0 : i32
    %c0_i32_0 = arith.constant 0 : i32
    %c0_i32_1 = arith.constant 0 : i32
    return %c0_i32, %c0_i32_0 : i32, i32
  }
  func.func @transform_3(%arg0: i32) -> (i32, i32) {
    %c0_i32 = arith.constant 0 : i32
    %c0_i32_0 = arith.constant 0 : i32
    %c0_i32_1 = arith.constant 0 : i32
    return %c0_i32, %c0_i32_0 : i32, i32
  }
  func.func @transform_4(%arg0: i32) -> (i32, i32) {
    %c0_i32 = arith.constant 0 : i32
    %c0_i32_0 = arith.constant 0 : i32
    %c0_i32_1 = arith.constant 0 : i32
    return %c0_i32, %c0_i32_0 : i32, i32
  }
  func.func @transform_5(%arg0: i32) -> (i32, i32) {
    %c0_i32 = arith.constant 0 : i32
    %c0_i32_0 = arith.constant 0 : i32
    %c0_i32_1 = arith.constant 0 : i32
    return %c0_i32, %c0_i32_0 : i32, i32
  }
  func.func @transform_6(%arg0: i32) -> (i32, i32) {
    %c0_i32 = arith.constant 0 : i32
    %c0_i32_0 = arith.constant 0 : i32
    %c0_i32_1 = arith.constant 0 : i32
    return %c0_i32, %c0_i32_0 : i32, i32
  }
  func.func @transform_7(%arg0: i32) -> (i32, i32) {
    %c0_i32 = arith.constant 0 : i32
    %c0_i32_0 = arith.constant 0 : i32
    %c0_i32_1 = arith.constant 0 : i32
    return %c0_i32, %c0_i32_0 : i32, i32
  }
  func.func @transform_8(%arg0: i32) -> (i32, i32) {
    %c0_i32 = arith.constant 0 : i32
    %c0_i32_0 = arith.constant 0 : i32
    %c0_i32_1 = arith.constant 0 : i32
    return %c0_i32, %c0_i32_0 : i32, i32
  }
  func.func @transform_9(%arg0: i32) -> (i32, i32) {
    %c0_i32 = arith.constant 0 : i32
    %c0_i32_0 = arith.constant 0 : i32
    %c0_i32_1 = arith.constant 0 : i32
    return %c0_i32, %c0_i32_0 : i32, i32
  }
  func.func @transform_10(%arg0: i32) -> (i32, i32) {
    %c0_i32 = arith.constant 0 : i32
    %c0_i32_0 = arith.constant 0 : i32
    %c0_i32_1 = arith.constant 0 : i32
    return %c0_i32, %c0_i32_0 : i32, i32
  }
  func.func @transform_11(%arg0: i32) -> (i32, i32) {
    %c0_i32 = arith.constant 0 : i32
    %c0_i32_0 = arith.constant 0 : i32
    %c0_i32_1 = arith.constant 0 : i32
    return %c0_i32, %c0_i32_0 : i32, i32
  }
  func.func @transform_12(%arg0: i32) -> (i32, i32) {
    %c0_i32 = arith.constant 0 : i32
    %c0_i32_0 = arith.constant 0 : i32
    %c0_i32_1 = arith.constant 0 : i32
    return %c0_i32, %c0_i32_0 : i32, i32
  }
  func.func @transform_13(%arg0: i32) -> (i32, i32) {
    %c0_i32 = arith.constant 0 : i32
    %c0_i32_0 = arith.constant 0 : i32
    %c0_i32_1 = arith.constant 0 : i32
    return %c0_i32, %c0_i32_0 : i32, i32
  }
  func.func @transform_14(%arg0: i32) -> (i32, i32) {
    %c0_i32 = arith.constant 0 : i32
    %c0_i32_0 = arith.constant 0 : i32
    %c0_i32_1 = arith.constant 0 : i32
    return %c0_i32, %c0_i32_0 : i32, i32
  }
  func.func @transform_15(%arg0: i32) -> (i32, i32) {
    %c0_i32 = arith.constant 0 : i32
    %c0_i32_0 = arith.constant 0 : i32
    %c0_i32_1 = arith.constant 0 : i32
    return %c0_i32, %c0_i32_0 : i32, i32
  }
  func.func @transform_16(%arg0: i32) -> (i32, i32) {
    %c0_i32 = arith.constant 0 : i32
    %c0_i32_0 = arith.constant 0 : i32
    %c0_i32_1 = arith.constant 0 : i32
    return %c0_i32, %c0_i32_0 : i32, i32
  }
  func.func @transform_17(%arg0: i32) -> (i32, i32) {
    %c0_i32 = arith.constant 0 : i32
    %c0_i32_0 = arith.constant 0 : i32
    return %arg0, %c0_i32 : i32, i32
  }
}

</mosaic_0001>

<bundles_post_ra>
// kernel: tpu_custom_call.1
= control target key start
LH: loop header
LB: loop body
LE: loop exit
PB: predicated region body
PF: predicated region fallthrough
CT: control target
= control target key end

     0   :  { %s9942_s0 = inlined_call_operand.hbm [shape: f32[8,256], index: 0, kind: input, shape index: {}]   ;;  %s9943_s1 = inlined_call_operand.hbm [shape: bf16[512,256], index: 1, kind: input, shape index: {}]   ;;  %s9944_s2 = inlined_call_operand.hbm [shape: bf16[512,512], index: 2, kind: input, shape index: {}]   ;;  %s9945_s3 = inlined_call_operand.hbm [shape: bf16[512,512], index: 3, kind: input, shape index: {}]   ;;  %s9946_s4 = inlined_call_operand.hbm [shape: bf16[512,512], index: 4, kind: input, shape index: {}]   ;;  %s9947_s5 = inlined_call_operand.hbm [shape: bf16[512,512], index: 5, kind: input, shape index: {}]   ;;  %s9948_s6 = inlined_call_operand.hbm [shape: bf16[512,512], index: 6, kind: input, shape index: {}]   ;;  %s9949_s7 = inlined_call_operand.hbm [shape: bf16[512,512], index: 7, kind: input, shape index: {}]   ;;  %s9950_s8 = inlined_call_operand.hbm [shape: bf16[256,512], index: 8, kind: input, shape index: {}]   ;;  %s9951_s9 = inlined_call_operand.vmem [shape: f32[1,512], index: 9, kind: input, shape index: {}]   ;;  %s9952_s10 = inlined_call_operand.vmem [shape: f32[1,512], index: 10, kind: input, shape index: {}]   ;;  %s9953_s11 = inlined_call_operand.vmem [shape: f32[1,512], index: 11, kind: input, shape index: {}]   ;;  %s9954_s12 = inlined_call_operand.vmem [shape: f32[1,512], index: 12, kind: input, shape index: {}]   ;;  %s9955_s13 = inlined_call_operand.vmem [shape: f32[1,512], index: 13, kind: input, shape index: {}]   ;;  %s9956_s14 = inlined_call_operand.vmem [shape: f32[1,512], index: 14, kind: input, shape index: {}]   ;;  %s9957_s15 = inlined_call_operand.vmem [shape: f32[1,512], index: 15, kind: input, shape index: {}]   ;;  %s9958_s16 = inlined_call_operand.vmem [shape: f32[1,256], index: 16, kind: input, shape index: {}]   ;;  %s9959_s17 = inlined_call_operand.hbm [shape: f32[8,256], index: 17, kind: output, shape index: {}]  }
   0x1   :  { %9963 = sst [smem:[#allocation24_spill]] %s9942_s0 }
   0x2   :  { %9964 = sst [smem:[#allocation25_spill]] %s9943_s1 }
   0x3   :  { %9965 = sst [smem:[#allocation26_spill]] %s9958_s16 }
   0x4   :  { %9966 = sst [smem:[#allocation27_spill]] %s9959_s17 }
   0x5   :  { %22 = vsyncpa [#allocation3], 0 }
   0x6   :  { %23 = vsyncpa [#allocation6], 0 }
   0x7   :  { %24 = vsyncpa [#allocation9], 0 }
   0x8   :  { %25 = vsyncpa [#allocation12], 0 }
   0x9   :  { %26 = vsyncpa [#allocation15], 0 }
   0xa   :  { %27 = vsyncpa [#allocation4], 0  ;;  %s9555_s24 = smov [#allocation5]   ;;  %s9967_s28 = sld [smem:[#allocation25_spill]] }
   0xb   :  { %s43_s25 = sshll.u32 %s9555_s24, 4  ;;  %s44_s25 = int_to_ptr.vmem [resolvable:$true] %s43_s25 }
  0x10   :  { %s9323_s29 = scalar_lea.hbm %s9967_s28, 8192 }
  0x11   :  { %p9324_p0 = scmp.ne.s32.totalorder %s9967_s28, %s9323_s29  ;;  %p9327_p1 = scmp.lt.u32.totalorder %s9323_s29, %s9967_s28 }
  0x13   :  { %p9329_p2 = pnand %p9327_p1, %p9324_p0 }
  0x15   :  { %9332 = shalt.err (!%p9329_p2)
}
  0x16   :  { %s9333_s1 = scalar_lea.vmem %s44_s25, 8192  ;;  %p9338_p4 = scmp.lt.s32.totalorder %s44_s25, %s44_s25 }
  0x17   :  { %p9334_p3 = scmp.ne.s32.totalorder %s44_s25, %s9333_s1  ;;  %p9339_p5 = scmp.lt.s32.totalorder %s9333_s1, %s9333_s1 }
  0x19   :  { %p9340_p6 = por %p9339_p5, %p9338_p4 }
  0x1b   :  { %p9341_p7 = pnand %p9340_p6, %p9334_p3 }
  0x1d   :  { %9344 = shalt.err (!%p9341_p7)
}
  0x1e   :  { %s9556_s20 = smov 128   ;;  %s9557_s21 = smov 8  }
  0x1f   :  { %49 = dma.hbm_to_vmem [thread:$0]  %s9967_s28, 8192, %s44_s25, [#allocation6], %s9556_s20, %s9556_s20, %s9557_s21  }
  0x20   :  { %s9558_s24 = smov [#allocation8]   ;;  %s9559_s27 = smov [#allocation11]  }
  0x21   :  { %s67_s26 = sshll.u32 %s9558_s24, 4  ;;  %s91_s29 = sshll.u32 %s9559_s27, 4  ;;  %s68_s26 = int_to_ptr.vmem [resolvable:$true] %s67_s26  ;;  %s92_s29 = int_to_ptr.vmem [resolvable:$true] %s91_s29 }
  0x22   :  { %s9345_s18 = scalar_lea.hbm %s9945_s3, 16384 }
  0x23   :  { %p9346_p8 = scmp.ne.s32.totalorder %s9945_s3, %s9345_s18  ;;  %p9349_p9 = scmp.lt.u32.totalorder %s9345_s18, %s9945_s3 }
  0x25   :  { %p9351_p10 = pnand %p9349_p9, %p9346_p8 }
  0x27   :  { %9354 = shalt.err (!%p9351_p10)
}
  0x28   :  { %s9355_s25 = scalar_lea.vmem %s68_s26, 16384  ;;  %p9360_p12 = scmp.lt.s32.totalorder %s68_s26, %s68_s26 }
  0x29   :  { %p9356_p11 = scmp.ne.s32.totalorder %s68_s26, %s9355_s25  ;;  %p9361_p13 = scmp.lt.s32.totalorder %s9355_s25, %s9355_s25 }
  0x2b   :  { %p9362_p0 = por %p9361_p13, %p9360_p12 }
  0x2d   :  { %p9363_p1 = pnand %p9362_p0, %p9356_p11 }
  0x2f   :  { %9366 = shalt.err (!%p9363_p1)
}
  0x30   :  { %s9560_s28 = smov 256   ;;  %s9561_s20 = smov 16  }
  0x31   :  { %73 = dma.hbm_to_vmem [thread:$0]  %s9945_s3, 16384, %s68_s26, [#allocation9], %s9560_s28, %s9560_s28, %s9561_s20  }
  0x32   :  { %s9367_s23 = scalar_lea.hbm %s9947_s5, 16384 }
  0x33   :  { %p9368_p2 = scmp.ne.s32.totalorder %s9947_s5, %s9367_s23  ;;  %p9371_p3 = scmp.lt.u32.totalorder %s9367_s23, %s9947_s5 }
  0x35   :  { %p9373_p4 = pnand %p9371_p3, %p9368_p2 }
  0x37   :  { %9376 = shalt.err (!%p9373_p4)
}
  0x38   :  { %s9377_s18 = scalar_lea.vmem %s92_s29, 16384  ;;  %p9382_p6 = scmp.lt.s32.totalorder %s92_s29, %s92_s29 }
  0x39   :  { %p9378_p5 = scmp.ne.s32.totalorder %s92_s29, %s9377_s18  ;;  %p9383_p7 = scmp.lt.s32.totalorder %s9377_s18, %s9377_s18 }
  0x3b   :  { %p9384_p8 = por %p9383_p7, %p9382_p6 }
  0x3d   :  { %p9385_p9 = pnand %p9384_p8, %p9378_p5 }
  0x3f   :  { %9388 = shalt.err (!%p9385_p9)
}
  0x40   :  { %97 = dma.hbm_to_vmem [thread:$0]  %s9947_s5, 16384, %s92_s29, [#allocation12], %s9560_s28, %s9560_s28, %s9561_s20  }
  0x41   :  { %s9562_s19 = smov [#allocation14]   ;;  %s9563_s25 = smov [#allocation2]  }
  0x42   :  { %s115_s1 = sshll.u32 %s9562_s19, 4  ;;  %s34_s21 = sshll.u32 %s9563_s25, 4  ;;  %s116_s1 = int_to_ptr.vmem [resolvable:$true] %s115_s1  ;;  %s35_s21 = int_to_ptr.vmem [resolvable:$true] %s34_s21 }
  0x43   :  { %s9389_s17 = scalar_lea.hbm %s9949_s7, 16384 }
  0x44   :  { %p9390_p10 = scmp.ne.s32.totalorder %s9949_s7, %s9389_s17  ;;  %p9393_p11 = scmp.lt.u32.totalorder %s9389_s17, %s9949_s7 }
  0x46   :  { %p9395_p12 = pnand %p9393_p11, %p9390_p10 }
  0x48   :  { %9398 = shalt.err (!%p9395_p12)
}
  0x49   :  { %s9399_s5 = scalar_lea.vmem %s116_s1, 16384  ;;  %p9404_p0 = scmp.lt.s32.totalorder %s116_s1, %s116_s1 }
  0x4a   :  { %p9400_p13 = scmp.ne.s32.totalorder %s116_s1, %s9399_s5  ;;  %p9405_p1 = scmp.lt.s32.totalorder %s9399_s5, %s9399_s5 }
  0x4c   :  { %p9406_p2 = por %p9405_p1, %p9404_p0 }
  0x4e   :  { %p9407_p3 = pnand %p9406_p2, %p9400_p13 }
  0x50   :  { %9410 = shalt.err (!%p9407_p3)
}
  0x51   :  { %121 = dma.hbm_to_vmem [thread:$0]  %s9949_s7, 16384, %s116_s1, [#allocation15], %s9560_s28, %s9560_s28, %s9561_s20  }
  0x52   :  { %s9968_s26 = sld [smem:[#allocation24_spill]] }
  0x58   :  { %s9411_s19 = scalar_lea.hbm %s9968_s26, 256 }
  0x59   :  { %p9412_p4 = scmp.ne.s32.totalorder %s9968_s26, %s9411_s19  ;;  %p9415_p5 = scmp.lt.u32.totalorder %s9411_s19, %s9968_s26 }
  0x5b   :  { %p9417_p6 = pnand %p9415_p5, %p9412_p4 }
  0x5d   :  { %9420 = shalt.err (!%p9417_p6)
}
  0x5e   :  { %s9421_s23 = scalar_lea.vmem %s35_s21, 256  ;;  %p9426_p8 = scmp.lt.s32.totalorder %s35_s21, %s35_s21 }
  0x5f   :  { %p9422_p7 = scmp.ne.s32.totalorder %s35_s21, %s9421_s23  ;;  %p9427_p9 = scmp.lt.s32.totalorder %s9421_s23, %s9421_s23 }
  0x61   :  { %p9428_p10 = por %p9427_p9, %p9426_p8 }
  0x63   :  { %p9429_p11 = pnand %p9428_p10, %p9422_p7 }
  0x65   :  { %9432 = shalt.err (!%p9429_p11)
}
  0x66   :  { %37 = dma.hbm_to_vmem [thread:$0]  %s9968_s26, 256, %s35_s21, [#allocation3]  }
  0x67   :  { %s9564_s24 = smov [#allocation7]   ;;  %s9565_s0 = smov [#allocation10]  }
  0x68   :  { %s55_s27 = sshll.u32 %s9564_s24, 4  ;;  %s79_s5 = sshll.u32 %s9565_s0, 4  ;;  %s56_s27 = int_to_ptr.vmem [resolvable:$true] %s55_s27  ;;  %s80_s5 = int_to_ptr.vmem [resolvable:$true] %s79_s5 }
  0x69   :  { %s9433_s18 = scalar_lea.hbm %s9944_s2, 16384 }
  0x6a   :  { %p9434_p12 = scmp.ne.s32.totalorder %s9944_s2, %s9433_s18  ;;  %p9437_p13 = scmp.lt.u32.totalorder %s9433_s18, %s9944_s2 }
  0x6c   :  { %p9439_p0 = pnand %p9437_p13, %p9434_p12 }
  0x6e   :  { %9442 = shalt.err (!%p9439_p0)
}
  0x6f   :  { %s9443_s21 = scalar_lea.vmem %s56_s27, 16384  ;;  %p9448_p2 = scmp.lt.s32.totalorder %s56_s27, %s56_s27 }
  0x70   :  { %p9444_p1 = scmp.ne.s32.totalorder %s56_s27, %s9443_s21  ;;  %p9449_p3 = scmp.lt.s32.totalorder %s9443_s21, %s9443_s21 }
  0x72   :  { %p9450_p4 = por %p9449_p3, %p9448_p2 }
  0x74   :  { %p9451_p5 = pnand %p9450_p4, %p9444_p1 }
  0x76   :  { %9454 = shalt.err (!%p9451_p5)
}
  0x77   :  { %61 = dma.hbm_to_vmem [thread:$0]  %s9944_s2, 16384, %s56_s27, [#allocation6], %s9560_s28, %s9560_s28, %s9561_s20  }
  0x78   :  { %s9455_s7 = scalar_lea.hbm %s9946_s4, 16384 }
  0x79   :  { %p9456_p6 = scmp.ne.s32.totalorder %s9946_s4, %s9455_s7  ;;  %p9459_p7 = scmp.lt.u32.totalorder %s9455_s7, %s9946_s4 }
  0x7b   :  { %p9461_p8 = pnand %p9459_p7, %p9456_p6 }
  0x7d   :  { %9464 = shalt.err (!%p9461_p8)
}
  0x7e   :  { %s9465_s30 = scalar_lea.vmem %s80_s5, 16384  ;;  %p9470_p10 = scmp.lt.s32.totalorder %s80_s5, %s80_s5 }
  0x7f   :  { %p9466_p9 = scmp.ne.s32.totalorder %s80_s5, %s9465_s30  ;;  %p9471_p11 = scmp.lt.s32.totalorder %s9465_s30, %s9465_s30 }
  0x81   :  { %p9472_p12 = por %p9471_p11, %p9470_p10 }
  0x83   :  { %p9473_p13 = pnand %p9472_p12, %p9466_p9 }
  0x85   :  { %9476 = shalt.err (!%p9473_p13)
}
  0x86   :  { %85 = dma.hbm_to_vmem [thread:$0]  %s9946_s4, 16384, %s80_s5, [#allocation9], %s9560_s28, %s9560_s28, %s9561_s20  }
  0x87   :  { %s9566_s18 = smov [#allocation13]   ;;  %s9567_s19 = smov [#allocation16]  }
  0x88   :  { %s103_s3 = sshll.u32 %s9566_s18, 4  ;;  %s127_s25 = sshll.u32 %s9567_s19, 4  ;;  %s104_s3 = int_to_ptr.vmem [resolvable:$true] %s103_s3  ;;  %s128_s25 = int_to_ptr.vmem [resolvable:$true] %s127_s25 }
  0x89   :  { %s9477_s26 = scalar_lea.hbm %s9948_s6, 16384 }
  0x8a   :  { %p9478_p0 = scmp.ne.s32.totalorder %s9948_s6, %s9477_s26  ;;  %p9481_p1 = scmp.lt.u32.totalorder %s9477_s26, %s9948_s6 }
  0x8c   :  { %p9483_p2 = pnand %p9481_p1, %p9478_p0 }
  0x8e   :  { %9486 = shalt.err (!%p9483_p2)
}
  0x8f   :  { %s9487_s4 = scalar_lea.vmem %s104_s3, 16384  ;;  %p9492_p4 = scmp.lt.s32.totalorder %s104_s3, %s104_s3 }
  0x90   :  { %p9488_p3 = scmp.ne.s32.totalorder %s104_s3, %s9487_s4  ;;  %p9493_p5 = scmp.lt.s32.totalorder %s9487_s4, %s9487_s4 }
  0x92   :  { %p9494_p6 = por %p9493_p5, %p9492_p4 }
  0x94   :  { %p9495_p7 = pnand %p9494_p6, %p9488_p3 }
  0x96   :  { %9498 = shalt.err (!%p9495_p7)
}
  0x97   :  { %109 = dma.hbm_to_vmem [thread:$0]  %s9948_s6, 16384, %s104_s3, [#allocation12], %s9560_s28, %s9560_s28, %s9561_s20  }
  0x98   :  { %s9499_s29 = scalar_lea.hbm %s9950_s8, 8192 }
  0x99   :  { %p9500_p8 = scmp.ne.s32.totalorder %s9950_s8, %s9499_s29  ;;  %p9503_p9 = scmp.lt.u32.totalorder %s9499_s29, %s9950_s8 }
  0x9b   :  { %p9505_p10 = pnand %p9503_p9, %p9500_p8 }
  0x9d   :  { %9508 = shalt.err (!%p9505_p10)
}
  0x9e   :  { %s9509_s19 = scalar_lea.vmem %s128_s25, 8192  ;;  %p9514_p12 = scmp.lt.s32.totalorder %s128_s25, %s128_s25 }
  0x9f   :  { %p9510_p11 = scmp.ne.s32.totalorder %s128_s25, %s9509_s19  ;;  %p9515_p13 = scmp.lt.s32.totalorder %s9509_s19, %s9509_s19 }
  0xa1   :  { %p9516_p0 = por %p9515_p13, %p9514_p12 }
  0xa3   :  { %p9517_p1 = pnand %p9516_p0, %p9510_p11 }
  0xa5   :  { %9520 = shalt.err (!%p9517_p1)
}
  0xa6   :  { %133 = dma.hbm_to_vmem [thread:$0]  %s9950_s8, 8192, %s128_s25, [#allocation15], %s9560_s28, %s9560_s28, %s9561_s20  }
  0xa7   :  { %9543 = dma.done.wait [#allocation3], 256  }
  0xa8   :  { %9544 = vsyncadd [#allocation3], 4294967040 }
  0xa9   :  { %9545 = dma.done.wait [#allocation6], 24576  }
  0xaa   :  { %9546 = vsyncadd [#allocation6], 4294942720 }
  0xab   :  { %9547 = dma.done.wait [#allocation9], 32768  }
  0xac   :  { %9548 = vsyncadd [#allocation9], 4294934528 }
  0xad   :  { %9549 = dma.done.wait [#allocation12], 32768  }
  0xae   :  { %9550 = vsyncadd [#allocation12], 4294934528 }
  0xaf   :  { %9551 = dma.done.wait [#allocation15], 24576  }
  0xb0   :  { %9552 = vsyncadd [#allocation15], 4294942720  ;;  %v9788_v0 = vld [vmem:[#allocation2] sm:$0xff]  ;;  %v9790_v1 = vld [vmem:[#allocation2 + $0x8] sm:$0xff]  ;;  %s9969_s23 = sld [smem:[#allocation26_spill]]  ;;  %s9568_s7 = smov [#allocation17]  }
  0xb1   :  { %v179_v2 = vmul.f32 %v9788_v0, %v9788_v0  ;;  %v180_v3 = vmul.f32 %v9790_v1, %v9790_v1  ;;  %v7977_v4 = vld [vmem:[#allocation5 + $0x4] ss:$8 sps:$4 sm:$0xff]   ;;  %v7979_v5 = vld [vmem:[#allocation5] ss:$8 sps:$4 sm:$0xff]   ;;  %v7980_v6 = vld [vmem:[#allocation5 + $0x14] ss:$8 sps:$4 sm:$0xff]  }
  0xb2   :  { %600 = vmatprep.subr.bf16.mxu1 %v7977_v4  ;;  %v7982_v8 = vld [vmem:[#allocation5 + $0x10] ss:$8 sps:$4 sm:$0xff]   ;;  %v7983_v9 = vld [vmem:[#allocation5 + $0x24] ss:$8 sps:$4 sm:$0xff]   ;;  %v7985_v10 = vld [vmem:[#allocation5 + $0x20] ss:$8 sps:$4 sm:$0xff]  }
  0xb3   :  { %v181_v7 = vadd.f32 %v180_v3, %v179_v2  ;;  %601 = vmatpush1.bf16.xpose.msra.mxu1 %v7979_v5  ;;  %v7986_v11 = vld [vmem:[#allocation5 + $0x34] ss:$8 sps:$4 sm:$0xff]   ;;  %v7988_v12 = vld [vmem:[#allocation5 + $0x30] ss:$8 sps:$4 sm:$0xff]   ;;  %v7989_v13 = vld [vmem:[#allocation5 + $0x44] ss:$8 sps:$4 sm:$0xff]  }
  0xb4   :  { %602 = vmatprep.subr.bf16.mxu1 %v7980_v6  ;;  %v7991_v14 = vld [vmem:[#allocation5 + $0x40] ss:$8 sps:$4 sm:$0xff]   ;;  %v7992_v15 = vld [vmem:[#allocation5 + $0x54] ss:$8 sps:$4 sm:$0xff]   ;;  %v7994_v16 = vld [vmem:[#allocation5 + $0x50] ss:$8 sps:$4 sm:$0xff]  }
  0xb5   :  { %182 = vadd.xlane.f32.xlu0 %v181_v7  ;;  %v7995_v17 = vld [vmem:[#allocation5 + $0x64] ss:$8 sps:$4 sm:$0xff]   ;;  %v7997_v18 = vld [vmem:[#allocation5 + $0x60] ss:$8 sps:$4 sm:$0xff]   ;;  %v7998_v19 = vld [vmem:[#allocation5 + $0x74] ss:$8 sps:$4 sm:$0xff]  }
  0xb6   :  { %v8000_v20 = vld [vmem:[#allocation5 + $0x70] ss:$8 sps:$4 sm:$0xff]   ;;  %v8001_v21 = vld [vmem:[#allocation5 + $0x84] ss:$8 sps:$4 sm:$0xff]   ;;  %v8003_v22 = vld [vmem:[#allocation5 + $0x80] ss:$8 sps:$4 sm:$0xff]  }
  0xb7   :  { %v8004_v23 = vld [vmem:[#allocation5 + $0x94] ss:$8 sps:$4 sm:$0xff]   ;;  %v8006_v24 = vld [vmem:[#allocation5 + $0x90] ss:$8 sps:$4 sm:$0xff]   ;;  %v8007_v25 = vld [vmem:[#allocation5 + $0xa4] ss:$8 sps:$4 sm:$0xff]  }
  0xb8   :  { %v8009_v26 = vld [vmem:[#allocation5 + $0xa0] ss:$8 sps:$4 sm:$0xff]   ;;  %v8010_v27 = vld [vmem:[#allocation5 + $0xb4] ss:$8 sps:$4 sm:$0xff]   ;;  %v8012_v28 = vld [vmem:[#allocation5 + $0xb0] ss:$8 sps:$4 sm:$0xff]  }
  0xb9   :  { %v8013_v29 = vld [vmem:[#allocation5 + $0xc4] ss:$8 sps:$4 sm:$0xff]   ;;  %v8015_v30 = vld [vmem:[#allocation5 + $0xc0] ss:$8 sps:$4 sm:$0xff]   ;;  %v8016_v31 = vld [vmem:[#allocation5 + $0xd4] ss:$8 sps:$4 sm:$0xff]  }
  0xba   :  { %v8018_v32 = vld [vmem:[#allocation5 + $0xd0] ss:$8 sps:$4 sm:$0xff]   ;;  %v8019_v33 = vld [vmem:[#allocation5 + $0xe4] ss:$8 sps:$4 sm:$0xff]   ;;  %v8021_v34 = vld [vmem:[#allocation5 + $0xe0] ss:$8 sps:$4 sm:$0xff]  }
  0xbb   :  { %603 = vmatpush1.bf16.xpose.msra.mxu1 %v7982_v8  ;;  %v8022_v35 = vld [vmem:[#allocation5 + $0xf4] ss:$8 sps:$4 sm:$0xff]   ;;  %v8024_v36 = vld [vmem:[#allocation5 + $0xf0] ss:$8 sps:$4 sm:$0xff]   ;;  %v8027_v37 = vld [vmem:[#allocation5 + $0x104] ss:$8 sps:$4 sm:$0xff]  }
  0xbc   :  { %604 = vmatprep.subr.bf16.mxu1 %v7983_v9  ;;  %v8061_v38 = vld [vmem:[#allocation7 + $0x4] ss:$16 sps:$4 sm:$0xff]   ;;  %v8063_v39 = vld [vmem:[#allocation7] ss:$16 sps:$4 sm:$0xff]   ;;  %s6976_s4 = sshll.u32 %s9568_s7, 4  ;;  %s6977_s4 = int_to_ptr.vmem [resolvable:$true] %s6976_s4 }
  0xbd   :  { %1484 = vmatprep.subr.bf16.mxu0 %v8061_v38  ;;  %v8067_v40 = vld [vmem:[#allocation7 + $0x24] ss:$16 sps:$4 sm:$0xff]   ;;  %v8069_v41 = vld [vmem:[#allocation7 + $0x20] ss:$16 sps:$4 sm:$0xff]   ;;  %s9521_s5 = scalar_lea.vmem %s6977_s4, 256  ;;  %p9526_p3 = scmp.lt.s32.totalorder %s6977_s4, %s6977_s4 }
  0xbe   :  { %1485 = vmatpush1.bf16.xpose.msra.mxu0 %v8063_v39  ;;  %v8073_v43 = vld [vmem:[#allocation7 + $0x44] ss:$16 sps:$4 sm:$0xff]   ;;  %v8075_v44 = vld [vmem:[#allocation7 + $0x40] ss:$16 sps:$4 sm:$0xff]   ;;  %p9522_p2 = scmp.ne.s32.totalorder %s6977_s4, %s9521_s5  ;;  %p9527_p4 = scmp.lt.s32.totalorder %s9521_s5, %s9521_s5 }
  0xbf   :  { %1486 = vmatprep.subr.bf16.mxu0 %v8067_v40  ;;  %v8079_v47 = vld [vmem:[#allocation7 + $0x64] ss:$16 sps:$4 sm:$0xff]   ;;  %v8081_v48 = vld [vmem:[#allocation7 + $0x60] ss:$16 sps:$4 sm:$0xff]   ;;  %v8159_v40 = vld [vmem:[#allocation7 + $0xc] ss:$16 sps:$4 sm:$0xff]  }
  0xc0   :  { %v8085_v52 = vld [vmem:[#allocation7 + $0x84] ss:$16 sps:$4 sm:$0xff]   ;;  %v8087_v53 = vld [vmem:[#allocation7 + $0x80] ss:$16 sps:$4 sm:$0xff]   ;;  %p9528_p5 = por %p9527_p4, %p9526_p3 }
  0xc1   :  { %v8025_v55 = vld [vmem:[#allocation5 + $0x100] ss:$8 sps:$4 sm:$0xff]   ;;  %v8030_v59 = vld [vmem:[#allocation5 + $0x114] ss:$8 sps:$4 sm:$0xff]   ;;  %v8028_v62 = vld [vmem:[#allocation5 + $0x110] ss:$8 sps:$4 sm:$0xff]  }
  0xc2   :  { %v8091_v60 = vld [vmem:[#allocation7 + $0xa4] ss:$16 sps:$4 sm:$0xff]   ;;  %v8093_v61 = vld [vmem:[#allocation7 + $0xa0] ss:$16 sps:$4 sm:$0xff]   ;;  %p9529_p6 = pnand %p9528_p5, %p9522_p2 }
  0xc3   :  { %605 = vmatpush1.bf16.xpose.msra.mxu1 %v7985_v10  ;;  %v8033_v63 = vld [vmem:[#allocation5 + $0x124] ss:$8 sps:$4 sm:$0xff]   ;;  %v8031_v2 = vld [vmem:[#allocation5 + $0x120] ss:$8 sps:$4 sm:$0xff]   ;;  %v8036_v3 = vld [vmem:[#allocation5 + $0x134] ss:$8 sps:$4 sm:$0xff]  }
  0xc4   :  { %606 = vmatprep.subr.bf16.mxu1 %v7986_v11  ;;  %v8103_v4 = vld [vmem:[#allocation7 + $0xe4] ss:$16 sps:$4 sm:$0xff]   ;;  %v8105_v5 = vld [vmem:[#allocation7 + $0xe0] ss:$16 sps:$4 sm:$0xff]  }
  0xc5   :  { %v8034_v6 = vld [vmem:[#allocation5 + $0x130] ss:$8 sps:$4 sm:$0xff]   ;;  %v8039_v7 = vld [vmem:[#allocation5 + $0x144] ss:$8 sps:$4 sm:$0xff]   ;;  %v8037_v10 = vld [vmem:[#allocation5 + $0x140] ss:$8 sps:$4 sm:$0xff]  }
  0xc6   :  { %1487 = vmatpush1.bf16.xpose.msra.mxu0 %v8069_v41  ;;  %v8109_v8 = vld [vmem:[#allocation7 + $0x104] ss:$16 sps:$4 sm:$0xff]   ;;  %v8111_v9 = vld [vmem:[#allocation7 + $0x100] ss:$16 sps:$4 sm:$0xff]  }
  0xc7   :  { %1488 = vmatprep.subr.bf16.mxu0 %v8073_v43  ;;  %v8042_v11 = vld [vmem:[#allocation5 + $0x154] ss:$8 sps:$4 sm:$0xff]   ;;  %v8153_v38 = vld [vmem:[#allocation7 + $0x1e0] ss:$16 sps:$4 sm:$0xff]   ;;  %v8066_v39 = vld [vmem:[#allocation5 + $0x1c4] ss:$8 sps:$4 sm:$0xff]  }
  0xc8   :  { %v8064_v41 = vld [vmem:[#allocation5 + $0x1c0] ss:$8 sps:$4 sm:$0xff]   ;;  %v8070_v43 = vld [vmem:[#allocation5 + $0x1d0] ss:$8 sps:$4 sm:$0xff]  }
  0xcb   :  { %607 = vmatpush1.bf16.xpose.msra.mxu1 %v7988_v12  ;;  %v8115_v12 = vld [vmem:[#allocation7 + $0x124] ss:$16 sps:$4 sm:$0xff]  }
  0xcc   :  { %608 = vmatprep.subr.bf16.mxu1 %v7989_v13  ;;  %v8117_v13 = vld [vmem:[#allocation7 + $0x120] ss:$16 sps:$4 sm:$0xff]  }
  0xce   :  { %1489 = vmatpush1.bf16.xpose.msra.mxu0 %v8075_v44  ;;  %v8078_v44 = vld [vmem:[#allocation5 + $0x1e4] ss:$8 sps:$4 sm:$0xff]  }
  0xcf   :  { %1490 = vmatprep.subr.bf16.mxu0 %v8079_v47  ;;  %v8082_v47 = vld [vmem:[#allocation5 + $0x1f0] ss:$8 sps:$4 sm:$0xff]  }
  0xd3   :  { %609 = vmatpush1.bf16.xpose.msra.mxu1 %v7991_v14  ;;  %v8040_v14 = vld [vmem:[#allocation5 + $0x150] ss:$8 sps:$4 sm:$0xff]  }
  0xd4   :  { %610 = vmatprep.subr.bf16.mxu1 %v7992_v15  ;;  %v8045_v15 = vld [vmem:[#allocation5 + $0x164] ss:$8 sps:$4 sm:$0xff]  }
  0xd6   :  { %1491 = vmatpush1.bf16.xpose.msra.mxu0 %v8081_v48  ;;  %v8090_v48 = vld [vmem:[#allocation7 + $0x204] ss:$16 sps:$4 sm:$0xff]  }
  0xd7   :  { %1492 = vmatprep.subr.bf16.mxu0 %v8085_v52  ;;  %v8102_v52 = vld [vmem:[#allocation7 + $0x244] ss:$16 sps:$4 sm:$0xff]  }
  0xdb   :  { %611 = vmatpush1.bf16.xpose.msra.mxu1 %v7994_v16  ;;  %v8121_v16 = vld [vmem:[#allocation7 + $0x144] ss:$16 sps:$4 sm:$0xff]  }
  0xdc   :  { %612 = vmatprep.subr.bf16.mxu1 %v7995_v17  ;;  %v8123_v17 = vld [vmem:[#allocation7 + $0x140] ss:$16 sps:$4 sm:$0xff]  }
  0xde   :  { %1493 = vmatpush1.bf16.xpose.msra.mxu0 %v8087_v53  ;;  %v8100_v53 = vld [vmem:[#allocation7 + $0x240] ss:$16 sps:$4 sm:$0xff]  }
  0xdf   :  { %1494 = vmatprep.subr.bf16.mxu0 %v8091_v60  ;;  %v8118_v60 = vld [vmem:[#allocation7 + $0x2a0] ss:$16 sps:$4 sm:$0xff]  }
  0xe3   :  { %613 = vmatpush1.bf16.xpose.msra.mxu1 %v7997_v18  ;;  %v8043_v18 = vld [vmem:[#allocation5 + $0x160] ss:$8 sps:$4 sm:$0xff]  }
  0xe4   :  { %614 = vmatprep.subr.bf16.mxu1 %v7998_v19  ;;  %v8048_v19 = vld [vmem:[#allocation5 + $0x174] ss:$8 sps:$4 sm:$0xff]  }
  0xe6   :  { %1495 = vmatpush1.bf16.xpose.msra.mxu0 %v8093_v61  ;;  %v8124_v61 = vld [vmem:[#allocation7 + $0x2c0] ss:$16 sps:$4 sm:$0xff]  }
  0xeb   :  { %615 = vmatpush1.bf16.xpose.msra.mxu1 %v8000_v20  ;;  %v8127_v20 = vld [vmem:[#allocation7 + $0x164] ss:$16 sps:$4 sm:$0xff]  }
  0xec   :  { %616 = vmatprep.subr.bf16.mxu1 %v8001_v21  ;;  %v8129_v21 = vld [vmem:[#allocation7 + $0x160] ss:$16 sps:$4 sm:$0xff]  }
  0xf3   :  { %617 = vmatpush1.bf16.xpose.msra.mxu1 %v8003_v22  ;;  %v8046_v22 = vld [vmem:[#allocation5 + $0x170] ss:$8 sps:$4 sm:$0xff]  }
  0xf4   :  { %618 = vmatprep.subr.bf16.mxu1 %v8004_v23  ;;  %v8051_v23 = vld [vmem:[#allocation5 + $0x184] ss:$8 sps:$4 sm:$0xff]  }
  0xfb   :  { %619 = vmatpush1.bf16.xpose.msra.mxu1 %v8006_v24  ;;  %v8133_v24 = vld [vmem:[#allocation7 + $0x184] ss:$16 sps:$4 sm:$0xff]  }
  0xfc   :  { %620 = vmatprep.subr.bf16.mxu1 %v8007_v25  ;;  %v8135_v25 = vld [vmem:[#allocation7 + $0x180] ss:$16 sps:$4 sm:$0xff]  }
 0x103   :  { %621 = vmatpush1.bf16.xpose.msra.mxu1 %v8009_v26  ;;  %v8049_v26 = vld [vmem:[#allocation5 + $0x180] ss:$8 sps:$4 sm:$0xff]  }
 0x104   :  { %622 = vmatprep.subr.bf16.mxu1 %v8010_v27  ;;  %v8054_v27 = vld [vmem:[#allocation5 + $0x194] ss:$8 sps:$4 sm:$0xff]  }
 0x10b   :  { %623 = vmatpush1.bf16.xpose.msra.mxu1 %v8012_v28  ;;  %v8139_v28 = vld [vmem:[#allocation7 + $0x1a4] ss:$16 sps:$4 sm:$0xff]  }
 0x10c   :  { %624 = vmatprep.subr.bf16.mxu1 %v8013_v29  ;;  %v8141_v29 = vld [vmem:[#allocation7 + $0x1a0] ss:$16 sps:$4 sm:$0xff]  }
 0x113   :  { %625 = vmatpush1.bf16.xpose.msra.mxu1 %v8015_v30  ;;  %v8052_v30 = vld [vmem:[#allocation5 + $0x190] ss:$8 sps:$4 sm:$0xff]  }
 0x114   :  { %626 = vmatprep.subr.bf16.mxu1 %v8016_v31  ;;  %v8057_v31 = vld [vmem:[#allocation5 + $0x1a4] ss:$8 sps:$4 sm:$0xff]  }
 0x11b   :  { %627 = vmatpush1.bf16.xpose.msra.mxu1 %v8018_v32  ;;  %v8145_v32 = vld [vmem:[#allocation7 + $0x1c4] ss:$16 sps:$4 sm:$0xff]  }
 0x11c   :  { %628 = vmatprep.subr.bf16.mxu1 %v8019_v33  ;;  %v8147_v33 = vld [vmem:[#allocation7 + $0x1c0] ss:$16 sps:$4 sm:$0xff]  }
 0x123   :  { %629 = vmatpush1.bf16.xpose.msra.mxu1 %v8021_v34  ;;  %v8055_v34 = vld [vmem:[#allocation5 + $0x1a0] ss:$8 sps:$4 sm:$0xff]  }
 0x124   :  { %630 = vmatprep.subr.bf16.mxu1 %v8022_v35  ;;  %v8060_v35 = vld [vmem:[#allocation5 + $0x1b4] ss:$8 sps:$4 sm:$0xff]  }
 0x12b   :  { %631 = vmatpush1.bf16.xpose.msra.mxu1 %v8024_v36  ;;  %v8058_v36 = vld [vmem:[#allocation5 + $0x1b0] ss:$8 sps:$4 sm:$0xff]  }
 0x12c   :  { %641 = vmatprep.subr.bf16.mxu1 %v8027_v37  ;;  %v8151_v37 = vld [vmem:[#allocation7 + $0x1e4] ss:$16 sps:$4 sm:$0xff]  }
 0x142   :  { %v183_v42 = vpop.xlane.xlu0 %182 }
 0x143   :  { %v185_v45 = vmul.f32 0.00390625, %v183_v42  ;;  %v8072_v42 = vld [vmem:[#allocation5 + $0x1d4] ss:$8 sps:$4 sm:$0xff]  }
 0x145   :  { %v186_v46 = vadd.f32 1e-08, %v185_v45  ;;  %v8076_v45 = vld [vmem:[#allocation5 + $0x1e0] ss:$8 sps:$4 sm:$0xff]  }
 0x147   :  { %9321 = vrsqrt.f32 %v186_v46  ;;  %v8084_v46 = vld [vmem:[#allocation5 + $0x1f4] ss:$8 sps:$4 sm:$0xff]  }
 0x151   :  { %v9322_v49 = vpop.eup %9321 }
 0x152   :  { %v189_v50 = vmul.f32 %v9322_v49, %v9790_v1  ;;  %v188_v51 = vmul.f32 %v9322_v49, %v9788_v0  ;;  %v8097_v0 = vld [vmem:[#allocation7 + $0xc4] ss:$16 sps:$4 sm:$0xff]   ;;  %v8099_v1 = vld [vmem:[#allocation7 + $0xc0] ss:$16 sps:$4 sm:$0xff]  }
 0x153   :  { %1496 = vmatprep.subr.bf16.mxu0 %v8097_v0  ;;  %v8088_v49 = vld [vmem:[#allocation7 + $0x200] ss:$16 sps:$4 sm:$0xff]   ;;  %v8138_v0 = vld [vmem:[#allocation7 + $0x304] ss:$16 sps:$4 sm:$0xff]  }
 0x154   :  { %v255_v54 = vmul.f32 0.0625, %v189_v50  ;;  %v254_v56 = vmul.f32 0.0625, %v188_v51  ;;  %1497 = vmatpush1.bf16.xpose.msra.mxu0 %v8099_v1  ;;  %v8096_v50 = vld [vmem:[#allocation7 + $0x224] ss:$16 sps:$4 sm:$0xff]   ;;  %v8094_v51 = vld [vmem:[#allocation7 + $0x220] ss:$16 sps:$4 sm:$0xff]  }
 0x155   :  { %1498 = vmatprep.subr.bf16.mxu0 %v8103_v4  ;;  %v8136_v1 = vld [vmem:[#allocation7 + $0x300] ss:$16 sps:$4 sm:$0xff]  }
 0x156   :  { %v257_v57 = vpack.c.bf16 %v255_v54, %v255_v54  ;;  %v9798_v58 = vpack.c.bf16 %v254_v56, %v254_v56  ;;  %v8108_v54 = vld [vmem:[#allocation7 + $0x264] ss:$16 sps:$4 sm:$0xff]   ;;  %v8142_v4 = vld [vmem:[#allocation7 + $0x320] ss:$16 sps:$4 sm:$0xff]  }
 0x157   :  { %v8114_v56 = vld [vmem:[#allocation7 + $0x284] ss:$16 sps:$4 sm:$0xff]  }
 0x158   :  { %632 = vmatprep.mubr.bf16.mxu1 %v257_v57 }
 0x159   :  { %633 = vmatmul.mubr.bf16.vlgmr.msra.gmra.mrb[0].mxu1 %v9798_v58 }
 0x15a   :  { %642 = vmatpush1.bf16.xpose.msra.mxu1 %v8025_v55  ;;  %673 = vmatprep.mubr.bf16.mxu1 %v257_v57  ;;  %v8106_v55 = vld [vmem:[#allocation7 + $0x260] ss:$16 sps:$4 sm:$0xff]  }
 0x15b   :  { %643 = vmatprep.subr.bf16.mxu1 %v8030_v59  ;;  %v8112_v57 = vld [vmem:[#allocation7 + $0x280] ss:$16 sps:$4 sm:$0xff]   ;;  %v8120_v59 = vld [vmem:[#allocation7 + $0x2a4] ss:$16 sps:$4 sm:$0xff]  }
 0x15c   :  { %1499 = vmatpush1.bf16.xpose.msra.mxu0 %v8105_v5  ;;  %v8150_v5 = vld [vmem:[#allocation7 + $0x344] ss:$16 sps:$4 sm:$0xff]  }
 0x15d   :  { %1500 = vmatprep.subr.bf16.mxu0 %v8109_v8  ;;  %v8148_v8 = vld [vmem:[#allocation7 + $0x340] ss:$16 sps:$4 sm:$0xff]  }
 0x162   :  { %644 = vmatpush1.bf16.xpose.msra.mxu1 %v8028_v62  ;;  %v8132_v62 = vld [vmem:[#allocation7 + $0x2e4] ss:$16 sps:$4 sm:$0xff]  }
 0x163   :  { %645 = vmatprep.subr.bf16.mxu1 %v8033_v63  ;;  %v8130_v63 = vld [vmem:[#allocation7 + $0x2e0] ss:$16 sps:$4 sm:$0xff]  }
 0x164   :  { %1501 = vmatpush1.bf16.xpose.msra.mxu0 %v8111_v9  ;;  %v9810_v9 = vld [vmem:[%s9951_s9] sm:$0xf] }
 0x165   :  { %1502 = vmatprep.subr.bf16.mxu0 %v8115_v12 }
 0x16a   :  { %646 = vmatpush1.bf16.xpose.msra.mxu1 %v8031_v2  ;;  %v8144_v2 = vld [vmem:[#allocation7 + $0x324] ss:$16 sps:$4 sm:$0xff]  }
 0x16b   :  { %647 = vmatprep.subr.bf16.mxu1 %v8036_v3  ;;  %v260_v3 = vlaneseq }
 0x16c   :  { %1503 = vmatpush1.bf16.xpose.msra.mxu0 %v8117_v13 }
 0x16d   :  { %1504 = vmatprep.subr.bf16.mxu0 %v8121_v16 }
 0x172   :  { %648 = vmatpush1.bf16.xpose.msra.mxu1 %v8034_v6  ;;  %v9802_v6 = vshrl.u32 %v260_v3, 7  ;;  %v8222_v3 = vld [vmem:[#allocation7 + $0x2cc] ss:$16 sps:$4 sm:$0xff]  }
 0x173   :  { %649 = vmatprep.subr.bf16.mxu1 %v8039_v7 }
 0x174   :  { %1505 = vmatpush1.bf16.xpose.msra.mxu0 %v8123_v17  ;;  %v9805_v7 = vsub.s32 0, %v9802_v6 }
 0x175   :  { %1506 = vmatprep.subr.bf16.mxu0 %v8127_v20 }
 0x176   :  { %v263_v12 = vrot.slane %v9810_v9, %v9805_v7 }
 0x17a   :  { %650 = vmatpush1.bf16.xpose.msra.mxu1 %v8037_v10  ;;  %v9813_v10 = vsub.s32 1, %v9802_v6 }
 0x17b   :  { %651 = vmatprep.subr.bf16.mxu1 %v8042_v11  ;;  %v8156_v11 = vld [vmem:[#allocation7 + $0x364] ss:$16 sps:$4 sm:$0xff]  }
 0x17c   :  { %1507 = vmatpush1.bf16.xpose.msra.mxu0 %v8129_v21  ;;  %v267_v13 = vrot.slane %v9810_v9, %v9813_v10 }
 0x17d   :  { %1508 = vmatprep.subr.bf16.mxu0 %v8133_v24 }
 0x182   :  { %652 = vmatpush1.bf16.xpose.msra.mxu1 %v8040_v14 }
 0x183   :  { %653 = vmatprep.subr.bf16.mxu1 %v8045_v15 }
 0x184   :  { %1509 = vmatpush1.bf16.xpose.msra.mxu0 %v8135_v25 }
 0x185   :  { %1510 = vmatprep.subr.bf16.mxu0 %v8139_v28 }
 0x18a   :  { %654 = vmatpush1.bf16.xpose.msra.mxu1 %v8043_v18 }
 0x18b   :  { %655 = vmatprep.subr.bf16.mxu1 %v8048_v19  ;;  %v8154_v19 = vld [vmem:[#allocation7 + $0x360] ss:$16 sps:$4 sm:$0xff]  }
 0x18c   :  { %1511 = vmatpush1.bf16.xpose.msra.mxu0 %v8141_v29  ;;  %v8165_v29 = vld [vmem:[#allocation7 + $0x2c] ss:$16 sps:$4 sm:$0xff]  }
 0x18d   :  { %1512 = vmatprep.subr.bf16.mxu0 %v8145_v32  ;;  %v8163_v32 = vld [vmem:[#allocation7 + $0x28] ss:$16 sps:$4 sm:$0xff]  }
 0x192   :  { %656 = vmatpush1.bf16.xpose.msra.mxu1 %v8046_v22  ;;  %v8162_v22 = vld [vmem:[#allocation7 + $0x384] ss:$16 sps:$4 sm:$0xff]  }
 0x193   :  { %657 = vmatprep.subr.bf16.mxu1 %v8051_v23 }
 0x194   :  { %1513 = vmatpush1.bf16.xpose.msra.mxu0 %v8147_v33  ;;  %v8171_v33 = vld [vmem:[#allocation7 + $0x4c] ss:$16 sps:$4 sm:$0xff]  }
 0x195   :  { %1514 = vmatprep.subr.bf16.mxu0 %v8151_v37  ;;  %v8177_v37 = vld [vmem:[#allocation7 + $0x6c] ss:$16 sps:$4 sm:$0xff]  }
 0x19a   :  { %658 = vmatpush1.bf16.xpose.msra.mxu1 %v8049_v26 }
 0x19b   :  { %659 = vmatprep.subr.bf16.mxu1 %v8054_v27  ;;  %v8157_v27 = vld [vmem:[#allocation7 + $0x8] ss:$16 sps:$4 sm:$0xff]  }
 0x19c   :  { %1515 = vmatpush1.bf16.xpose.msra.mxu0 %v8153_v38  ;;  %v8172_v38 = vld [vmem:[#allocation7 + $0x3c0] ss:$16 sps:$4 sm:$0xff]  }
 0x19d   :  { %1525 = vmatprep.subr.bf16.mxu0 %v8159_v40  ;;  %v8175_v40 = vld [vmem:[#allocation7 + $0x68] ss:$16 sps:$4 sm:$0xff]  }
 0x1a2   :  { %660 = vmatpush1.bf16.xpose.msra.mxu1 %v8052_v30  ;;  %v8160_v30 = vld [vmem:[#allocation7 + $0x380] ss:$16 sps:$4 sm:$0xff]  }
 0x1a3   :  { %661 = vmatprep.subr.bf16.mxu1 %v8057_v31  ;;  %v8168_v31 = vld [vmem:[#allocation7 + $0x3a4] ss:$16 sps:$4 sm:$0xff]  }
 0x1aa   :  { %662 = vmatpush1.bf16.xpose.msra.mxu1 %v8055_v34  ;;  %v8166_v34 = vld [vmem:[#allocation7 + $0x3a0] ss:$16 sps:$4 sm:$0xff]  }
 0x1ab   :  { %663 = vmatprep.subr.bf16.mxu1 %v8060_v35  ;;  %v8174_v35 = vld [vmem:[#allocation7 + $0x3c4] ss:$16 sps:$4 sm:$0xff]  }
 0x1b2   :  { %664 = vmatpush1.bf16.xpose.msra.mxu1 %v8058_v36  ;;  %v8169_v36 = vld [vmem:[#allocation7 + $0x48] ss:$16 sps:$4 sm:$0xff]  }
 0x1b3   :  { %665 = vmatprep.subr.bf16.mxu1 %v8066_v39  ;;  %v8180_v39 = vld [vmem:[#allocation7 + $0x3e4] ss:$16 sps:$4 sm:$0xff]  }
 0x1ba   :  { %666 = vmatpush1.bf16.xpose.msra.mxu1 %v8064_v41  ;;  %v8183_v41 = vld [vmem:[#allocation7 + $0x8c] ss:$16 sps:$4 sm:$0xff]  }
 0x1bb   :  { %667 = vmatprep.subr.bf16.mxu1 %v8072_v42  ;;  %v8178_v42 = vld [vmem:[#allocation7 + $0x3e0] ss:$16 sps:$4 sm:$0xff]  }
 0x1c2   :  { %668 = vmatpush1.bf16.xpose.msra.mxu1 %v8070_v43  ;;  %v8186_v43 = vld [vmem:[#allocation7 + $0x20c] ss:$16 sps:$4 sm:$0xff]  }
 0x1c3   :  { %669 = vmatprep.subr.bf16.mxu1 %v8078_v44  ;;  %v8181_v44 = vld [vmem:[#allocation7 + $0x88] ss:$16 sps:$4 sm:$0xff]  }
 0x1ca   :  { %670 = vmatpush1.bf16.xpose.msra.mxu1 %v8076_v45  ;;  %v8189_v45 = vld [vmem:[#allocation7 + $0xac] ss:$16 sps:$4 sm:$0xff]  }
 0x1cb   :  { %671 = vmatprep.subr.bf16.mxu1 %v8084_v46  ;;  %v8184_v46 = vld [vmem:[#allocation7 + $0x208] ss:$16 sps:$4 sm:$0xff]  }
 0x1d2   :  { %672 = vmatpush1.bf16.xpose.msra.mxu1 %v8082_v47  ;;  %v8192_v47 = vld [vmem:[#allocation7 + $0x22c] ss:$16 sps:$4 sm:$0xff]  }
 0x1d3   :  { %1566 = vmatprep.subr.bf16.mxu1 %v8090_v48  ;;  %v8187_v48 = vld [vmem:[#allocation7 + $0xa8] ss:$16 sps:$4 sm:$0xff]  }
 0x1d9   :  { %674 = vmatmul.mubr.bf16.vlgmr.msra.gmra.mrb[4].mxu1 %v9798_v58  ;;  %v8126_v58 = vld [vmem:[#allocation7 + $0x2c4] ss:$16 sps:$4 sm:$0xff]  }
 0x1da   :  { %1567 = vmatpush1.bf16.xpose.msra.mxu1 %v8088_v49  ;;  %v8195_v49 = vld [vmem:[#allocation7 + $0xcc] ss:$16 sps:$4 sm:$0xff]  }
 0x1db   :  { %1568 = vmatprep.subr.bf16.mxu1 %v8096_v50  ;;  %v8190_v50 = vld [vmem:[#allocation7 + $0x228] ss:$16 sps:$4 sm:$0xff]  }
 0x1e2   :  { %1569 = vmatpush1.bf16.xpose.msra.mxu1 %v8094_v51  ;;  %v8198_v51 = vld [vmem:[#allocation7 + $0x24c] ss:$16 sps:$4 sm:$0xff]  }
 0x1e3   :  { %1570 = vmatprep.subr.bf16.mxu1 %v8102_v52  ;;  %v8193_v52 = vld [vmem:[#allocation7 + $0xc8] ss:$16 sps:$4 sm:$0xff]  }
 0x1ea   :  { %1571 = vmatpush1.bf16.xpose.msra.mxu1 %v8100_v53  ;;  %v8201_v53 = vld [vmem:[#allocation7 + $0xec] ss:$16 sps:$4 sm:$0xff]  }
 0x1eb   :  { %1572 = vmatprep.subr.bf16.mxu1 %v8108_v54  ;;  %v8196_v54 = vld [vmem:[#allocation7 + $0x248] ss:$16 sps:$4 sm:$0xff]  }
 0x1f2   :  { %1573 = vmatpush1.bf16.xpose.msra.mxu1 %v8106_v55  ;;  %v8204_v55 = vld [vmem:[#allocation7 + $0x26c] ss:$16 sps:$4 sm:$0xff]  }
 0x1f3   :  { %1574 = vmatprep.subr.bf16.mxu1 %v8114_v56  ;;  %v8199_v56 = vld [vmem:[#allocation7 + $0xe8] ss:$16 sps:$4 sm:$0xff]  }
 0x1fa   :  { %1575 = vmatpush1.bf16.xpose.msra.mxu1 %v8112_v57  ;;  %v8207_v57 = vld [vmem:[#allocation7 + $0x10c] ss:$16 sps:$4 sm:$0xff]  }
 0x1fb   :  { %1576 = vmatprep.subr.bf16.mxu1 %v8120_v59  ;;  %v8202_v59 = vld [vmem:[#allocation7 + $0x268] ss:$16 sps:$4 sm:$0xff]  }
 0x202   :  { %1577 = vmatpush1.bf16.xpose.msra.mxu1 %v8118_v60  ;;  %v8210_v60 = vld [vmem:[#allocation7 + $0x28c] ss:$16 sps:$4 sm:$0xff]  }
 0x203   :  { %1578 = vmatprep.subr.bf16.mxu1 %v8126_v58  ;;  %v8205_v58 = vld [vmem:[#allocation7 + $0x108] ss:$16 sps:$4 sm:$0xff]  }
 0x20a   :  { %1579 = vmatpush1.bf16.xpose.msra.mxu1 %v8124_v61  ;;  %v8213_v61 = vld [vmem:[#allocation7 + $0x12c] ss:$16 sps:$4 sm:$0xff]  }
 0x20b   :  { %1580 = vmatprep.subr.bf16.mxu1 %v8132_v62  ;;  %v8208_v62 = vld [vmem:[#allocation7 + $0x288] ss:$16 sps:$4 sm:$0xff]  }
 0x212   :  { %1581 = vmatpush1.bf16.xpose.msra.mxu1 %v8130_v63  ;;  %v8216_v63 = vld [vmem:[#allocation7 + $0x2ac] ss:$16 sps:$4 sm:$0xff]  }
 0x213   :  { %1582 = vmatprep.subr.bf16.mxu1 %v8138_v0  ;;  %v8211_v0 = vld [vmem:[#allocation7 + $0x128] ss:$16 sps:$4 sm:$0xff]  }
 0x21a   :  { %1583 = vmatpush1.bf16.xpose.msra.mxu1 %v8136_v1  ;;  %v8219_v1 = vld [vmem:[#allocation7 + $0x14c] ss:$16 sps:$4 sm:$0xff]  }
 0x21b   :  { %1584 = vmatprep.subr.bf16.mxu1 %v8144_v2  ;;  %v8214_v2 = vld [vmem:[#allocation7 + $0x2a8] ss:$16 sps:$4 sm:$0xff]  }
 0x222   :  { %1585 = vmatpush1.bf16.xpose.msra.mxu1 %v8142_v4  ;;  %v8217_v4 = vld [vmem:[#allocation7 + $0x148] ss:$16 sps:$4 sm:$0xff]  }
 0x223   :  { %1586 = vmatprep.subr.bf16.mxu1 %v8150_v5  ;;  %v8225_v5 = vld [vmem:[#allocation7 + $0x16c] ss:$16 sps:$4 sm:$0xff]  }
 0x22a   :  { %1587 = vmatpush1.bf16.xpose.msra.mxu1 %v8148_v8  ;;  %v8220_v8 = vld [vmem:[#allocation7 + $0x2c8] ss:$16 sps:$4 sm:$0xff]  }
 0x22b   :  { %1588 = vmatprep.subr.bf16.mxu1 %v8156_v11  ;;  %v8228_v11 = vld [vmem:[#allocation7 + $0x2ec] ss:$16 sps:$4 sm:$0xff]  }
 0x22c   :  { %v634_v14 = vpop.f32.mrb[0].mxu1 }
 0x22d   :  { %v635_v15 = vadd.f32 %v634_v14, %v263_v12  ;;  %v636_v16 = vpop.f32.mrb[1].mxu1  ;;  %v8223_v12 = vld [vmem:[#allocation7 + $0x168] ss:$16 sps:$4 sm:$0xff]  }
 0x22e   :  { %v637_v17 = vadd.f32 %v636_v16, %v267_v13  ;;  %v638_v18 = vpop.f32.mrb[2].mxu1  ;;  %v8231_v13 = vld [vmem:[#allocation7 + $0x18c] ss:$16 sps:$4 sm:$0xff]   ;;  %v8226_v14 = vld [vmem:[#allocation7 + $0x2e8] ss:$16 sps:$4 sm:$0xff]  }
 0x22f   :  { %v682_v20 = vmax.f32 %v635_v15, 0.0  ;;  %v639_v21 = vpop.f32.mrb[3].mxu1  ;;  %v8234_v15 = vld [vmem:[#allocation7 + $0x30c] ss:$16 sps:$4 sm:$0xff]   ;;  %v8229_v16 = vld [vmem:[#allocation7 + $0x188] ss:$16 sps:$4 sm:$0xff]  }
 0x230   :  { %v683_v23 = vmax.f32 %v637_v17, 0.0  ;;  %v8237_v17 = vld [vmem:[#allocation7 + $0x1ac] ss:$16 sps:$4 sm:$0xff]   ;;  %v8232_v18 = vld [vmem:[#allocation7 + $0x308] ss:$16 sps:$4 sm:$0xff]  }
 0x231   :  { %v814_v24 = vmul.f32 0.044194173, %v682_v20  ;;  %v8235_v20 = vld [vmem:[#allocation7 + $0x1a8] ss:$16 sps:$4 sm:$0xff]   ;;  %v8243_v21 = vld [vmem:[#allocation7 + $0x1cc] ss:$16 sps:$4 sm:$0xff]  }
 0x232   :  { %v815_v25 = vmul.f32 0.044194173, %v683_v23  ;;  %1589 = vmatpush1.bf16.xpose.msra.mxu1 %v8154_v19  ;;  %v8240_v19 = vld [vmem:[#allocation7 + $0x32c] ss:$16 sps:$4 sm:$0xff]  }
 0x233   :  { %1590 = vmatprep.subr.bf16.mxu1 %v8162_v22  ;;  %v818_v28 = vpack.c.bf16 %v814_v24, %v814_v24  ;;  %v8238_v22 = vld [vmem:[#allocation7 + $0x328] ss:$16 sps:$4 sm:$0xff]   ;;  %v8246_v23 = vld [vmem:[#allocation7 + $0x34c] ss:$16 sps:$4 sm:$0xff]  }
 0x234   :  { %v819_v26 = vpack.c.bf16 %v815_v25, %v815_v25  ;;  %v8241_v24 = vld [vmem:[#allocation7 + $0x1c8] ss:$16 sps:$4 sm:$0xff]   ;;  %v9820_v25 = vsub.s32 2, %v9802_v6 }
 0x236   :  { %1516 = vmatprep.mubr.bf16.mxu0 %v819_v26  ;;  %1598 = vmatprep.mubr.bf16.mxu1 %v819_v26  ;;  %v8249_v26 = vld [vmem:[#allocation7 + $0x1ec] ss:$16 sps:$4 sm:$0xff]  }
 0x237   :  { %1517 = vmatmul.mubr.bf16.vlgmr.msra.gmra.mrb[0].mxu0 %v818_v28 }
 0x238   :  { %1526 = vmatpush1.bf16.xpose.msra.mxu0 %v8157_v27  ;;  %v8244_v27 = vld [vmem:[#allocation7 + $0x348] ss:$16 sps:$4 sm:$0xff]  }
 0x239   :  { %1527 = vmatprep.subr.bf16.mxu0 %v8165_v29  ;;  %v8252_v29 = vld [vmem:[#allocation7 + $0x36c] ss:$16 sps:$4 sm:$0xff]  }
 0x23a   :  { %1591 = vmatpush1.bf16.xpose.msra.mxu1 %v8160_v30  ;;  %v271_v30 = vrot.slane %v9810_v9, %v9820_v25 }
 0x23b   :  { %1592 = vmatprep.subr.bf16.mxu1 %v8168_v31 }
 0x240   :  { %1528 = vmatpush1.bf16.xpose.msra.mxu0 %v8163_v32 }
 0x241   :  { %1529 = vmatprep.subr.bf16.mxu0 %v8171_v33  ;;  %v8247_v33 = vld [vmem:[#allocation7 + $0x1e8] ss:$16 sps:$4 sm:$0xff]  }
 0x242   :  { %1593 = vmatpush1.bf16.xpose.msra.mxu1 %v8166_v34 }
 0x243   :  { %1594 = vmatprep.subr.bf16.mxu1 %v8174_v35 }
 0x248   :  { %1530 = vmatpush1.bf16.xpose.msra.mxu0 %v8169_v36  ;;  %v8267_v36 = vld [vmem:[#allocation8 + $0x4] ss:$16 sps:$4 sm:$0xff]  }
 0x249   :  { %1531 = vmatprep.subr.bf16.mxu0 %v8177_v37 }
 0x24a   :  { %1595 = vmatpush1.bf16.xpose.msra.mxu1 %v8172_v38 }
 0x24b   :  { %1596 = vmatprep.subr.bf16.mxu1 %v8180_v39 }
 0x250   :  { %1532 = vmatpush1.bf16.xpose.msra.mxu0 %v8175_v40 }
 0x251   :  { %1533 = vmatprep.subr.bf16.mxu0 %v8183_v41  ;;  %v8255_v41 = vld [vmem:[#allocation7 + $0x38c] ss:$16 sps:$4 sm:$0xff]  }
 0x252   :  { %1597 = vmatpush1.bf16.xpose.msra.mxu1 %v8178_v42 }
 0x253   :  { %1607 = vmatprep.subr.bf16.mxu1 %v8186_v43 }
 0x258   :  { %1534 = vmatpush1.bf16.xpose.msra.mxu0 %v8181_v44 }
 0x259   :  { %1599 = vmatmul.mubr.bf16.vlgmr.msra.gmra.mrb[8].mxu1 %v818_v28  ;;  %1535 = vmatprep.subr.bf16.mxu0 %v8189_v45  ;;  %v9823_v28 = vsub.s32 3, %v9802_v6  ;;  %v8250_v6 = vld [vmem:[#allocation7 + $0x368] ss:$16 sps:$4 sm:$0xff]   ;;  %v8265_v45 = vld [vmem:[#allocation8] ss:$16 sps:$4 sm:$0xff]  }
 0x25a   :  { %1608 = vmatpush1.bf16.xpose.msra.mxu1 %v8184_v46 }
 0x25b   :  { %1609 = vmatprep.subr.bf16.mxu1 %v8192_v47  ;;  %v275_v31 = vrot.slane %v9810_v9, %v9823_v28  ;;  %v8273_v47 = vld [vmem:[#allocation8 + $0x24] ss:$16 sps:$4 sm:$0xff]  }
 0x260   :  { %1536 = vmatpush1.bf16.xpose.msra.mxu0 %v8187_v48  ;;  %v8253_v48 = vld [vmem:[#allocation7 + $0x388] ss:$16 sps:$4 sm:$0xff]  }
 0x261   :  { %1537 = vmatprep.subr.bf16.mxu0 %v8195_v49  ;;  %v8258_v49 = vld [vmem:[#allocation7 + $0x3ac] ss:$16 sps:$4 sm:$0xff]  }
 0x262   :  { %1610 = vmatpush1.bf16.xpose.msra.mxu1 %v8190_v50  ;;  %v8271_v50 = vld [vmem:[#allocation8 + $0x20] ss:$16 sps:$4 sm:$0xff]  }
 0x263   :  { %1611 = vmatprep.subr.bf16.mxu1 %v8198_v51  ;;  %v8279_v51 = vld [vmem:[#allocation8 + $0x44] ss:$16 sps:$4 sm:$0xff]  }
 0x268   :  { %1538 = vmatpush1.bf16.xpose.msra.mxu0 %v8193_v52  ;;  %v8256_v52 = vld [vmem:[#allocation7 + $0x3a8] ss:$16 sps:$4 sm:$0xff]  }
 0x269   :  { %1539 = vmatprep.subr.bf16.mxu0 %v8201_v53  ;;  %v8261_v53 = vld [vmem:[#allocation7 + $0x3cc] ss:$16 sps:$4 sm:$0xff]  }
 0x26a   :  { %1612 = vmatpush1.bf16.xpose.msra.mxu1 %v8196_v54  ;;  %v8277_v54 = vld [vmem:[#allocation8 + $0x40] ss:$16 sps:$4 sm:$0xff]  }
 0x26b   :  { %1613 = vmatprep.subr.bf16.mxu1 %v8204_v55  ;;  %v8285_v55 = vld [vmem:[#allocation8 + $0x64] ss:$16 sps:$4 sm:$0xff]  }
 0x270   :  { %1540 = vmatpush1.bf16.xpose.msra.mxu0 %v8199_v56  ;;  %v8259_v56 = vld [vmem:[#allocation7 + $0x3c8] ss:$16 sps:$4 sm:$0xff]  }
 0x271   :  { %1541 = vmatprep.subr.bf16.mxu0 %v8207_v57  ;;  %v8264_v57 = vld [vmem:[#allocation7 + $0x3ec] ss:$16 sps:$4 sm:$0xff]  }
 0x272   :  { %1614 = vmatpush1.bf16.xpose.msra.mxu1 %v8202_v59  ;;  %v8283_v59 = vld [vmem:[#allocation8 + $0x60] ss:$16 sps:$4 sm:$0xff]  }
 0x273   :  { %1615 = vmatprep.subr.bf16.mxu1 %v8210_v60  ;;  %v8291_v60 = vld [vmem:[#allocation8 + $0x84] ss:$16 sps:$4 sm:$0xff]  }
 0x278   :  { %1542 = vmatpush1.bf16.xpose.msra.mxu0 %v8205_v58  ;;  %v8262_v58 = vld [vmem:[#allocation7 + $0x3e8] ss:$16 sps:$4 sm:$0xff]  }
 0x279   :  { %1543 = vmatprep.subr.bf16.mxu0 %v8213_v61  ;;  %v8270_v61 = vld [vmem:[#allocation8 + $0x204] ss:$16 sps:$4 sm:$0xff]  }
 0x27a   :  { %1616 = vmatpush1.bf16.xpose.msra.mxu1 %v8208_v62  ;;  %v8289_v62 = vld [vmem:[#allocation8 + $0x80] ss:$16 sps:$4 sm:$0xff]  }
 0x27b   :  { %1617 = vmatprep.subr.bf16.mxu1 %v8216_v63  ;;  %v8297_v63 = vld [vmem:[#allocation8 + $0xa4] ss:$16 sps:$4 sm:$0xff]  }
 0x280   :  { %1544 = vmatpush1.bf16.xpose.msra.mxu0 %v8211_v0  ;;  %v8268_v0 = vld [vmem:[#allocation8 + $0x200] ss:$16 sps:$4 sm:$0xff]  }
 0x281   :  { %1545 = vmatprep.subr.bf16.mxu0 %v8219_v1  ;;  %v8276_v1 = vld [vmem:[#allocation8 + $0x224] ss:$16 sps:$4 sm:$0xff]  }
 0x282   :  { %1618 = vmatpush1.bf16.xpose.msra.mxu1 %v8214_v2  ;;  %v8295_v2 = vld [vmem:[#allocation8 + $0xa0] ss:$16 sps:$4 sm:$0xff]  }
 0x283   :  { %1619 = vmatprep.subr.bf16.mxu1 %v8222_v3  ;;  %v8303_v3 = vld [vmem:[#allocation8 + $0xc4] ss:$16 sps:$4 sm:$0xff]  }
 0x288   :  { %1546 = vmatpush1.bf16.xpose.msra.mxu0 %v8217_v4  ;;  %v8274_v4 = vld [vmem:[#allocation8 + $0x220] ss:$16 sps:$4 sm:$0xff]  }
 0x289   :  { %1547 = vmatprep.subr.bf16.mxu0 %v8225_v5  ;;  %v8282_v5 = vld [vmem:[#allocation8 + $0x244] ss:$16 sps:$4 sm:$0xff]  }
 0x28a   :  { %1620 = vmatpush1.bf16.xpose.msra.mxu1 %v8220_v8  ;;  %v8301_v8 = vld [vmem:[#allocation8 + $0xc0] ss:$16 sps:$4 sm:$0xff]  }
 0x28b   :  { %1621 = vmatprep.subr.bf16.mxu1 %v8228_v11  ;;  %v8309_v11 = vld [vmem:[#allocation8 + $0xe4] ss:$16 sps:$4 sm:$0xff]  }
 0x290   :  { %1548 = vmatpush1.bf16.xpose.msra.mxu0 %v8223_v12  ;;  %v8280_v12 = vld [vmem:[#allocation8 + $0x240] ss:$16 sps:$4 sm:$0xff]  }
 0x291   :  { %1549 = vmatprep.subr.bf16.mxu0 %v8231_v13  ;;  %v8288_v13 = vld [vmem:[#allocation8 + $0x264] ss:$16 sps:$4 sm:$0xff]  }
 0x292   :  { %1622 = vmatpush1.bf16.xpose.msra.mxu1 %v8226_v14  ;;  %v8307_v14 = vld [vmem:[#allocation8 + $0xe0] ss:$16 sps:$4 sm:$0xff]  }
 0x293   :  { %1623 = vmatprep.subr.bf16.mxu1 %v8234_v15  ;;  %v8315_v15 = vld [vmem:[#allocation8 + $0x104] ss:$16 sps:$4 sm:$0xff]  }
 0x298   :  { %1550 = vmatpush1.bf16.xpose.msra.mxu0 %v8229_v16  ;;  %v8286_v16 = vld [vmem:[#allocation8 + $0x260] ss:$16 sps:$4 sm:$0xff]  }
 0x299   :  { %1551 = vmatprep.subr.bf16.mxu0 %v8237_v17  ;;  %v8294_v17 = vld [vmem:[#allocation8 + $0x284] ss:$16 sps:$4 sm:$0xff]  }
 0x29a   :  { %1624 = vmatpush1.bf16.xpose.msra.mxu1 %v8232_v18  ;;  %v8313_v18 = vld [vmem:[#allocation8 + $0x100] ss:$16 sps:$4 sm:$0xff]  }
 0x29b   :  { %1625 = vmatprep.subr.bf16.mxu1 %v8240_v19  ;;  %v8321_v19 = vld [vmem:[#allocation8 + $0x124] ss:$16 sps:$4 sm:$0xff]  }
 0x2a0   :  { %1552 = vmatpush1.bf16.xpose.msra.mxu0 %v8235_v20  ;;  %v8292_v20 = vld [vmem:[#allocation8 + $0x280] ss:$16 sps:$4 sm:$0xff]  }
 0x2a1   :  { %1553 = vmatprep.subr.bf16.mxu0 %v8243_v21  ;;  %v8300_v21 = vld [vmem:[#allocation8 + $0x2a4] ss:$16 sps:$4 sm:$0xff]  }
 0x2a2   :  { %1626 = vmatpush1.bf16.xpose.msra.mxu1 %v8238_v22  ;;  %v8319_v22 = vld [vmem:[#allocation8 + $0x120] ss:$16 sps:$4 sm:$0xff]  }
 0x2a3   :  { %1627 = vmatprep.subr.bf16.mxu1 %v8246_v23  ;;  %v8327_v23 = vld [vmem:[#allocation8 + $0x144] ss:$16 sps:$4 sm:$0xff]  }
 0x2a8   :  { %1554 = vmatpush1.bf16.xpose.msra.mxu0 %v8241_v24  ;;  %v8298_v24 = vld [vmem:[#allocation8 + $0x2a0] ss:$16 sps:$4 sm:$0xff]  }
 0x2a9   :  { %1555 = vmatprep.subr.bf16.mxu0 %v8249_v26  ;;  %v8306_v26 = vld [vmem:[#allocation8 + $0x2c4] ss:$16 sps:$4 sm:$0xff]  }
 0x2aa   :  { %1628 = vmatpush1.bf16.xpose.msra.mxu1 %v8244_v27  ;;  %v8325_v27 = vld [vmem:[#allocation8 + $0x140] ss:$16 sps:$4 sm:$0xff]  }
 0x2ab   :  { %1629 = vmatprep.subr.bf16.mxu1 %v8252_v29  ;;  %v8333_v29 = vld [vmem:[#allocation8 + $0x164] ss:$16 sps:$4 sm:$0xff]  }
 0x2ac   :  { %v675_v32 = vpop.f32.mrb[4].mxu1 }
 0x2ad   :  { %v676_v34 = vadd.f32 %v675_v32, %v271_v30  ;;  %v677_v35 = vpop.f32.mrb[5].mxu1  ;;  %v8304_v30 = vld [vmem:[#allocation8 + $0x2c0] ss:$16 sps:$4 sm:$0xff]  }
 0x2ae   :  { %v678_v37 = vadd.f32 %v677_v35, %v275_v31  ;;  %v679_v38 = vpop.f32.mrb[6].mxu1  ;;  %v8312_v31 = vld [vmem:[#allocation8 + $0x2e4] ss:$16 sps:$4 sm:$0xff]   ;;  %v8331_v32 = vld [vmem:[#allocation8 + $0x160] ss:$16 sps:$4 sm:$0xff]  }
 0x2af   :  { %v684_v39 = vmax.f32 %v676_v34, 0.0  ;;  %v680_v40 = vpop.f32.mrb[7].mxu1  ;;  %v8310_v34 = vld [vmem:[#allocation8 + $0x2e0] ss:$16 sps:$4 sm:$0xff]   ;;  %v8318_v35 = vld [vmem:[#allocation8 + $0x304] ss:$16 sps:$4 sm:$0xff]  }
 0x2b0   :  { %v685_v42 = vmax.f32 %v678_v37, 0.0  ;;  %1556 = vmatpush1.bf16.xpose.msra.mxu0 %v8247_v33  ;;  %v8339_v33 = vld [vmem:[#allocation8 + $0x184] ss:$16 sps:$4 sm:$0xff]   ;;  %v8316_v38 = vld [vmem:[#allocation8 + $0x300] ss:$16 sps:$4 sm:$0xff]  }
 0x2b1   :  { %v816_v43 = vmul.f32 0.044194173, %v684_v39  ;;  %2450 = vmatprep.subr.bf16.mxu0 %v8267_v36  ;;  %v8337_v36 = vld [vmem:[#allocation8 + $0x180] ss:$16 sps:$4 sm:$0xff]   ;;  %v8345_v37 = vld [vmem:[#allocation8 + $0x1a4] ss:$16 sps:$4 sm:$0xff]  }
 0x2b2   :  { %v817_v44 = vmul.f32 0.044194173, %v685_v42  ;;  %1630 = vmatpush1.bf16.xpose.msra.mxu1 %v8250_v6  ;;  %v8324_v6 = vld [vmem:[#allocation8 + $0x324] ss:$16 sps:$4 sm:$0xff]   ;;  %v8343_v39 = vld [vmem:[#allocation8 + $0x1a0] ss:$16 sps:$4 sm:$0xff]  }
 0x2b3   :  { %1631 = vmatprep.subr.bf16.mxu1 %v8255_v41  ;;  %v820_v46 = vpack.c.bf16 %v816_v43, %v816_v43  ;;  %v8351_v40 = vld [vmem:[#allocation8 + $0x1c4] ss:$16 sps:$4 sm:$0xff]   ;;  %v8322_v41 = vld [vmem:[#allocation8 + $0x320] ss:$16 sps:$4 sm:$0xff]  }
 0x2b4   :  { %v821_v9 = vpack.c.bf16 %v817_v44, %v817_v44  ;;  %v8330_v42 = vld [vmem:[#allocation8 + $0x344] ss:$16 sps:$4 sm:$0xff]   ;;  %v8349_v43 = vld [vmem:[#allocation8 + $0x1c0] ss:$16 sps:$4 sm:$0xff]  }
 0x2b5   :  { %v8357_v44 = vld [vmem:[#allocation8 + $0x1e4] ss:$16 sps:$4 sm:$0xff]  }
 0x2b6   :  { %1557 = vmatprep.mubr.bf16.mxu0 %v821_v9  ;;  %1639 = vmatprep.mubr.bf16.mxu1 %v821_v9  ;;  %v8328_v9 = vld [vmem:[#allocation8 + $0x340] ss:$16 sps:$4 sm:$0xff]  }
 0x2b7   :  { %1558 = vmatmul.mubr.bf16.vlgmr.msra.gmra.mrb[0].mxu0 %v820_v46 }
 0x2b8   :  { %2451 = vmatpush1.bf16.xpose.msra.mxu0 %v8265_v45  ;;  %v8336_v45 = vld [vmem:[#allocation8 + $0x364] ss:$16 sps:$4 sm:$0xff]  }
 0x2b9   :  { %2452 = vmatprep.subr.bf16.mxu0 %v8273_v47  ;;  %v8363_v47 = vld [vmem:[#allocation8 + $0xc] ss:$16 sps:$4 sm:$0xff]  }
 0x2ba   :  { %1632 = vmatpush1.bf16.xpose.msra.mxu1 %v8253_v48  ;;  %v8334_v48 = vld [vmem:[#allocation8 + $0x360] ss:$16 sps:$4 sm:$0xff]  }
 0x2bb   :  { %1633 = vmatprep.subr.bf16.mxu1 %v8258_v49  ;;  %v8342_v49 = vld [vmem:[#allocation8 + $0x384] ss:$16 sps:$4 sm:$0xff]  }
 0x2c0   :  { %2453 = vmatpush1.bf16.xpose.msra.mxu0 %v8271_v50  ;;  %v8340_v50 = vld [vmem:[#allocation8 + $0x380] ss:$16 sps:$4 sm:$0xff]  }
 0x2c1   :  { %2454 = vmatprep.subr.bf16.mxu0 %v8279_v51  ;;  %v8348_v51 = vld [vmem:[#allocation8 + $0x3a4] ss:$16 sps:$4 sm:$0xff]  }
 0x2c2   :  { %1634 = vmatpush1.bf16.xpose.msra.mxu1 %v8256_v52  ;;  %v8346_v52 = vld [vmem:[#allocation8 + $0x3a0] ss:$16 sps:$4 sm:$0xff]  }
 0x2c3   :  { %1635 = vmatprep.subr.bf16.mxu1 %v8261_v53  ;;  %v8354_v53 = vld [vmem:[#allocation8 + $0x3c4] ss:$16 sps:$4 sm:$0xff]  }
 0x2c8   :  { %2455 = vmatpush1.bf16.xpose.msra.mxu0 %v8277_v54  ;;  %v8352_v54 = vld [vmem:[#allocation8 + $0x3c0] ss:$16 sps:$4 sm:$0xff]  }
 0x2c9   :  { %2456 = vmatprep.subr.bf16.mxu0 %v8285_v55  ;;  %v8360_v55 = vld [vmem:[#allocation8 + $0x3e4] ss:$16 sps:$4 sm:$0xff]  }
 0x2ca   :  { %1636 = vmatpush1.bf16.xpose.msra.mxu1 %v8259_v56  ;;  %v8358_v56 = vld [vmem:[#allocation8 + $0x3e0] ss:$16 sps:$4 sm:$0xff]  }
 0x2cb   :  { %1637 = vmatprep.subr.bf16.mxu1 %v8264_v57  ;;  %v8366_v57 = vld [vmem:[#allocation8 + $0x20c] ss:$16 sps:$4 sm:$0xff]  }
 0x2d0   :  { %2457 = vmatpush1.bf16.xpose.msra.mxu0 %v8283_v59  ;;  %v9832_v59 = vld [vmem:[%s9952_s10] sm:$0xf] }
 0x2d1   :  { %2458 = vmatprep.subr.bf16.mxu0 %v8291_v60  ;;  %v827_v60 = vrot.slane %v9832_v59, %v9805_v7 }
 0x2d2   :  { %1638 = vmatpush1.bf16.xpose.msra.mxu1 %v8262_v58  ;;  %v831_v58 = vrot.slane %v9832_v59, %v9813_v10 }
 0x2d3   :  { %2532 = vmatprep.subr.bf16.mxu1 %v8270_v61 }
 0x2d8   :  { %2459 = vmatpush1.bf16.xpose.msra.mxu0 %v8289_v62 }
 0x2d9   :  { %1640 = vmatmul.mubr.bf16.vlgmr.msra.gmra.mrb[8].mxu1 %v820_v46  ;;  %2460 = vmatprep.subr.bf16.mxu0 %v8297_v63  ;;  %v8355_v46 = vld [vmem:[#allocation8 + $0x1e0] ss:$16 sps:$4 sm:$0xff]  }
 0x2da   :  { %2533 = vmatpush1.bf16.xpose.msra.mxu1 %v8268_v0 }
 0x2db   :  { %2534 = vmatprep.subr.bf16.mxu1 %v8276_v1 }
 0x2e0   :  { %2461 = vmatpush1.bf16.xpose.msra.mxu0 %v8295_v2 }
 0x2e1   :  { %2462 = vmatprep.subr.bf16.mxu0 %v8303_v3 }
 0x2e2   :  { %2535 = vmatpush1.bf16.xpose.msra.mxu1 %v8274_v4 }
 0x2e3   :  { %2536 = vmatprep.subr.bf16.mxu1 %v8282_v5 }
 0x2e8   :  { %2463 = vmatpush1.bf16.xpose.msra.mxu0 %v8301_v8 }
 0x2e9   :  { %2464 = vmatprep.subr.bf16.mxu0 %v8309_v11 }
 0x2ea   :  { %2537 = vmatpush1.bf16.xpose.msra.mxu1 %v8280_v12  ;;  %v8361_v12 = vld [vmem:[#allocation8 + $0x8] ss:$16 sps:$4 sm:$0xff]  }
 0x2eb   :  { %2538 = vmatprep.subr.bf16.mxu1 %v8288_v13  ;;  %v8364_v13 = vld [vmem:[#allocation8 + $0x208] ss:$16 sps:$4 sm:$0xff]  }
 0x2f0   :  { %2465 = vmatpush1.bf16.xpose.msra.mxu0 %v8307_v14 }
 0x2f1   :  { %2466 = vmatprep.subr.bf16.mxu0 %v8315_v15  ;;  %v8369_v15 = vld [vmem:[#allocation8 + $0x2c] ss:$16 sps:$4 sm:$0xff]  }
 0x2f2   :  { %2539 = vmatpush1.bf16.xpose.msra.mxu1 %v8286_v16  ;;  %v8372_v16 = vld [vmem:[#allocation8 + $0x22c] ss:$16 sps:$4 sm:$0xff]  }
 0x2f3   :  { %2540 = vmatprep.subr.bf16.mxu1 %v8294_v17  ;;  %v8367_v17 = vld [vmem:[#allocation8 + $0x28] ss:$16 sps:$4 sm:$0xff]  }
 0x2f8   :  { %2467 = vmatpush1.bf16.xpose.msra.mxu0 %v8313_v18  ;;  %v8370_v18 = vld [vmem:[#allocation8 + $0x228] ss:$16 sps:$4 sm:$0xff]  }
 0x2f9   :  { %2468 = vmatprep.subr.bf16.mxu0 %v8321_v19  ;;  %v8375_v19 = vld [vmem:[#allocation8 + $0x4c] ss:$16 sps:$4 sm:$0xff]  }
 0x2fa   :  { %2541 = vmatpush1.bf16.xpose.msra.mxu1 %v8292_v20  ;;  %v8378_v20 = vld [vmem:[#allocation8 + $0x24c] ss:$16 sps:$4 sm:$0xff]  }
 0x2fb   :  { %2542 = vmatprep.subr.bf16.mxu1 %v8300_v21  ;;  %v8373_v21 = vld [vmem:[#allocation8 + $0x48] ss:$16 sps:$4 sm:$0xff]  }
 0x300   :  { %2469 = vmatpush1.bf16.xpose.msra.mxu0 %v8319_v22  ;;  %v8376_v22 = vld [vmem:[#allocation8 + $0x248] ss:$16 sps:$4 sm:$0xff]  }
 0x301   :  { %2470 = vmatprep.subr.bf16.mxu0 %v8327_v23  ;;  %v8381_v23 = vld [vmem:[#allocation8 + $0x6c] ss:$16 sps:$4 sm:$0xff]  }
 0x302   :  { %2543 = vmatpush1.bf16.xpose.msra.mxu1 %v8298_v24  ;;  %v8384_v24 = vld [vmem:[#allocation8 + $0x26c] ss:$16 sps:$4 sm:$0xff]  }
 0x303   :  { %2544 = vmatprep.subr.bf16.mxu1 %v8306_v26  ;;  %v8379_v26 = vld [vmem:[#allocation8 + $0x68] ss:$16 sps:$4 sm:$0xff]  }
 0x308   :  { %2471 = vmatpush1.bf16.xpose.msra.mxu0 %v8325_v27  ;;  %v8382_v27 = vld [vmem:[#allocation8 + $0x268] ss:$16 sps:$4 sm:$0xff]  }
 0x309   :  { %2472 = vmatprep.subr.bf16.mxu0 %v8333_v29  ;;  %v839_v29 = vrot.slane %v9832_v59, %v9823_v28 }
 0x30a   :  { %2545 = vmatpush1.bf16.xpose.msra.mxu1 %v8304_v30  ;;  %v8387_v30 = vld [vmem:[#allocation8 + $0x8c] ss:$16 sps:$4 sm:$0xff]  }
 0x30b   :  { %2546 = vmatprep.subr.bf16.mxu1 %v8312_v31  ;;  %v8390_v31 = vld [vmem:[#allocation8 + $0x28c] ss:$16 sps:$4 sm:$0xff]  }
 0x310   :  { %2473 = vmatpush1.bf16.xpose.msra.mxu0 %v8331_v32 }
 0x311   :  { %2474 = vmatprep.subr.bf16.mxu0 %v8339_v33 }
 0x312   :  { %2547 = vmatpush1.bf16.xpose.msra.mxu1 %v8310_v34 }
 0x313   :  { %2548 = vmatprep.subr.bf16.mxu1 %v8318_v35 }
 0x318   :  { %2475 = vmatpush1.bf16.xpose.msra.mxu0 %v8337_v36 }
 0x319   :  { %2476 = vmatprep.subr.bf16.mxu0 %v8345_v37 }
 0x31a   :  { %2549 = vmatpush1.bf16.xpose.msra.mxu1 %v8316_v38 }
 0x31b   :  { %2550 = vmatprep.subr.bf16.mxu1 %v8324_v6  ;;  %v8385_v6 = vld [vmem:[#allocation8 + $0x88] ss:$16 sps:$4 sm:$0xff]  }
 0x320   :  { %2477 = vmatpush1.bf16.xpose.msra.mxu0 %v8343_v39  ;;  %v8388_v39 = vld [vmem:[#allocation8 + $0x288] ss:$16 sps:$4 sm:$0xff]  }
 0x321   :  { %2478 = vmatprep.subr.bf16.mxu0 %v8351_v40 }
 0x322   :  { %2551 = vmatpush1.bf16.xpose.msra.mxu1 %v8322_v41  ;;  %v8393_v41 = vld [vmem:[#allocation8 + $0xac] ss:$16 sps:$4 sm:$0xff]  }
 0x323   :  { %2552 = vmatprep.subr.bf16.mxu1 %v8330_v42  ;;  %v8396_v42 = vld [vmem:[#allocation8 + $0x2ac] ss:$16 sps:$4 sm:$0xff]  }
 0x328   :  { %2479 = vmatpush1.bf16.xpose.msra.mxu0 %v8349_v43  ;;  %v8391_v43 = vld [vmem:[#allocation8 + $0xa8] ss:$16 sps:$4 sm:$0xff]  }
 0x329   :  { %2480 = vmatprep.subr.bf16.mxu0 %v8357_v44  ;;  %v8394_v44 = vld [vmem:[#allocation8 + $0x2a8] ss:$16 sps:$4 sm:$0xff]  }
 0x32a   :  { %2553 = vmatpush1.bf16.xpose.msra.mxu1 %v8328_v9  ;;  %v8399_v9 = vld [vmem:[#allocation8 + $0xcc] ss:$16 sps:$4 sm:$0xff]  }
 0x32b   :  { %2554 = vmatprep.subr.bf16.mxu1 %v8336_v45  ;;  %v8402_v45 = vld [vmem:[#allocation8 + $0x2cc] ss:$16 sps:$4 sm:$0xff]  }
 0x330   :  { %2481 = vmatpush1.bf16.xpose.msra.mxu0 %v8355_v46  ;;  %v8397_v46 = vld [vmem:[#allocation8 + $0xc8] ss:$16 sps:$4 sm:$0xff]  }
 0x331   :  { %2491 = vmatprep.subr.bf16.mxu0 %v8363_v47  ;;  %v8400_v47 = vld [vmem:[#allocation8 + $0x2c8] ss:$16 sps:$4 sm:$0xff]  }
 0x332   :  { %2555 = vmatpush1.bf16.xpose.msra.mxu1 %v8334_v48  ;;  %v8405_v48 = vld [vmem:[#allocation8 + $0xec] ss:$16 sps:$4 sm:$0xff]  }
 0x333   :  { %2556 = vmatprep.subr.bf16.mxu1 %v8342_v49  ;;  %v8408_v49 = vld [vmem:[#allocation8 + $0x2ec] ss:$16 sps:$4 sm:$0xff]  }
 0x33a   :  { %2557 = vmatpush1.bf16.xpose.msra.mxu1 %v8340_v50  ;;  %v8403_v50 = vld [vmem:[#allocation8 + $0xe8] ss:$16 sps:$4 sm:$0xff]  }
 0x33b   :  { %2558 = vmatprep.subr.bf16.mxu1 %v8348_v51  ;;  %v8406_v51 = vld [vmem:[#allocation8 + $0x2e8] ss:$16 sps:$4 sm:$0xff]  }
 0x342   :  { %2559 = vmatpush1.bf16.xpose.msra.mxu1 %v8346_v52  ;;  %v8411_v52 = vld [vmem:[#allocation8 + $0x10c] ss:$16 sps:$4 sm:$0xff]  }
 0x343   :  { %2560 = vmatprep.subr.bf16.mxu1 %v8354_v53  ;;  %v8414_v53 = vld [vmem:[#allocation8 + $0x30c] ss:$16 sps:$4 sm:$0xff]  }
 0x34a   :  { %2561 = vmatpush1.bf16.xpose.msra.mxu1 %v8352_v54  ;;  %v8409_v54 = vld [vmem:[#allocation8 + $0x108] ss:$16 sps:$4 sm:$0xff]  }
 0x34b   :  { %2562 = vmatprep.subr.bf16.mxu1 %v8360_v55  ;;  %v8412_v55 = vld [vmem:[#allocation8 + $0x308] ss:$16 sps:$4 sm:$0xff]  }
 0x352   :  { %2563 = vmatpush1.bf16.xpose.msra.mxu1 %v8358_v56  ;;  %v8417_v56 = vld [vmem:[#allocation8 + $0x12c] ss:$16 sps:$4 sm:$0xff]  }
 0x353   :  { %2573 = vmatprep.subr.bf16.mxu1 %v8366_v57  ;;  %v8420_v57 = vld [vmem:[#allocation8 + $0x32c] ss:$16 sps:$4 sm:$0xff]  }
 0x38a   :  { %v1559_v61 = vpop.f32.mrb[0].mxu0 }
 0x38b   :  { %v7885_v62 = vadd.f32 %v1559_v61, %v827_v60  ;;  %v1561_v63 = vpop.f32.mrb[1].mxu0  ;;  %v8415_v60 = vld [vmem:[#allocation8 + $0x128] ss:$16 sps:$4 sm:$0xff]   ;;  %v8423_v61 = vld [vmem:[#allocation8 + $0x14c] ss:$16 sps:$4 sm:$0xff]  }
 0x38c   :  { %v7886_v0 = vadd.f32 %v1561_v63, %v831_v58  ;;  %v1563_v1 = vpop.f32.mrb[2].mxu0  ;;  %v8418_v58 = vld [vmem:[#allocation8 + $0x328] ss:$16 sps:$4 sm:$0xff]  }
 0x38d   :  { %v1648_v2 = vmax.f32 %v7885_v62, 0.0  ;;  %v1564_v3 = vpop.f32.mrb[3].mxu0  ;;  %v8426_v62 = vld [vmem:[#allocation8 + $0x34c] ss:$16 sps:$4 sm:$0xff]   ;;  %v8421_v63 = vld [vmem:[#allocation8 + $0x148] ss:$16 sps:$4 sm:$0xff]  }
 0x38e   :  { %v1649_v4 = vmax.f32 %v7886_v0, 0.0  ;;  %v8424_v0 = vld [vmem:[#allocation8 + $0x348] ss:$16 sps:$4 sm:$0xff]   ;;  %v8429_v1 = vld [vmem:[#allocation8 + $0x16c] ss:$16 sps:$4 sm:$0xff]  }
 0x38f   :  { %v1780_v5 = vmul.f32 0.044194173, %v1648_v2  ;;  %v8432_v2 = vld [vmem:[#allocation8 + $0x36c] ss:$16 sps:$4 sm:$0xff]   ;;  %v8427_v3 = vld [vmem:[#allocation8 + $0x168] ss:$16 sps:$4 sm:$0xff]  }
 0x390   :  { %v1781_v8 = vmul.f32 0.044194173, %v1649_v4  ;;  %v8430_v4 = vld [vmem:[#allocation8 + $0x368] ss:$16 sps:$4 sm:$0xff]  }
 0x391   :  { %v1784_v14 = vpack.c.bf16 %v1780_v5, %v1780_v5  ;;  %v8435_v5 = vld [vmem:[#allocation8 + $0x18c] ss:$16 sps:$4 sm:$0xff]  }
 0x392   :  { %v1785_v11 = vpack.c.bf16 %v1781_v8, %v1781_v8  ;;  %v8438_v8 = vld [vmem:[#allocation8 + $0x38c] ss:$16 sps:$4 sm:$0xff]  }
 0x394   :  { %2482 = vmatprep.mubr.bf16.mxu0 %v1785_v11  ;;  %2564 = vmatprep.mubr.bf16.mxu1 %v1785_v11  ;;  %v8433_v11 = vld [vmem:[#allocation8 + $0x188] ss:$16 sps:$4 sm:$0xff]  }
 0x395   :  { %2483 = vmatmul.mubr.bf16.vlgmr.msra.gmra.mrb[4].mxu0 %v1784_v14  ;;  %2565 = vmatmul.mubr.bf16.vlgmr.msra.gmra.mrb[12].mxu1 %v1784_v14  ;;  %v8444_v14 = vld [vmem:[#allocation8 + $0x3ac] ss:$16 sps:$4 sm:$0xff]  }
 0x396   :  { %2492 = vmatpush1.bf16.xpose.msra.mxu0 %v8361_v12  ;;  %2574 = vmatpush1.bf16.xpose.msra.mxu1 %v8364_v13  ;;  %v8436_v12 = vld [vmem:[#allocation8 + $0x388] ss:$16 sps:$4 sm:$0xff]   ;;  %v8441_v13 = vld [vmem:[#allocation8 + $0x1ac] ss:$16 sps:$4 sm:$0xff]  }
 0x397   :  { %2493 = vmatprep.subr.bf16.mxu0 %v8369_v15  ;;  %2575 = vmatprep.subr.bf16.mxu1 %v8372_v16  ;;  %v8439_v15 = vld [vmem:[#allocation8 + $0x1a8] ss:$16 sps:$4 sm:$0xff]  }
 0x398   :  { %v8442_v16 = vld [vmem:[#allocation8 + $0x3a8] ss:$16 sps:$4 sm:$0xff]  }
 0x39e   :  { %2494 = vmatpush1.bf16.xpose.msra.mxu0 %v8367_v17  ;;  %2576 = vmatpush1.bf16.xpose.msra.mxu1 %v8370_v18  ;;  %v8447_v17 = vld [vmem:[#allocation8 + $0x1cc] ss:$16 sps:$4 sm:$0xff]  }
 0x39f   :  { %2495 = vmatprep.subr.bf16.mxu0 %v8375_v19  ;;  %2577 = vmatprep.subr.bf16.mxu1 %v8378_v20  ;;  %v8450_v18 = vld [vmem:[#allocation8 + $0x3cc] ss:$16 sps:$4 sm:$0xff]   ;;  %v8445_v19 = vld [vmem:[#allocation8 + $0x1c8] ss:$16 sps:$4 sm:$0xff]  }
 0x3a0   :  { %v8448_v20 = vld [vmem:[#allocation8 + $0x3c8] ss:$16 sps:$4 sm:$0xff]  }
 0x3a6   :  { %2496 = vmatpush1.bf16.xpose.msra.mxu0 %v8373_v21  ;;  %2578 = vmatpush1.bf16.xpose.msra.mxu1 %v8376_v22  ;;  %v835_v21 = vrot.slane %v9832_v59, %v9820_v25  ;;  %v8453_v22 = vld [vmem:[#allocation8 + $0x1ec] ss:$16 sps:$4 sm:$0xff]   ;;  %v8460_v59 = vld [vmem:[#allocation10 + $0x200] ss:$16 sps:$4 sm:$0xff]  }
 0x3a7   :  { %2497 = vmatprep.subr.bf16.mxu0 %v8381_v23  ;;  %2579 = vmatprep.subr.bf16.mxu1 %v8384_v24  ;;  %v8456_v23 = vld [vmem:[#allocation8 + $0x3ec] ss:$16 sps:$4 sm:$0xff]  }
 0x3ac   :  { %v9840_v32 = vpop.f32.mrb[8].mxu1 }
 0x3ad   :  { %v1643_v33 = vpop.f32.mrb[9].mxu1  ;;  %v7887_v24 = vadd.f32 %v9840_v32, %v835_v21  ;;  %v8463_v32 = vld [vmem:[#allocation10 + $0x20] ss:$16 sps:$4 sm:$0xff]  }
 0x3ae   :  { %v7888_v34 = vadd.f32 %v1643_v33, %v839_v29  ;;  %2498 = vmatpush1.bf16.xpose.msra.mxu0 %v8379_v26  ;;  %2580 = vmatpush1.bf16.xpose.msra.mxu1 %v8382_v27  ;;  %v1645_v35 = vpop.f32.mrb[10].mxu1  ;;  %v8451_v26 = vld [vmem:[#allocation8 + $0x1e8] ss:$16 sps:$4 sm:$0xff]   ;;  %v8532_v21 = vld [vmem:[#allocation10 + $0x380] ss:$16 sps:$4 sm:$0xff]  }
 0x3af   :  { %v1646_v36 = vpop.f32.mrb[11].mxu1  ;;  %2499 = vmatprep.subr.bf16.mxu0 %v8387_v30  ;;  %2581 = vmatprep.subr.bf16.mxu1 %v8390_v31  ;;  %v8454_v27 = vld [vmem:[#allocation8 + $0x3e8] ss:$16 sps:$4 sm:$0xff]   ;;  %v1650_v29 = vmax.f32 %v7887_v24, 0.0  ;;  %v8459_v30 = vld [vmem:[#allocation10 + $0x4] ss:$16 sps:$4 sm:$0xff]  }
 0x3b0   :  { %v1651_v37 = vmax.f32 %v7888_v34, 0.0  ;;  %v8462_v31 = vld [vmem:[#allocation10 + $0x204] ss:$16 sps:$4 sm:$0xff]   ;;  %v8457_v34 = vld [vmem:[#allocation10] ss:$16 sps:$4 sm:$0xff]  }
 0x3b1   :  { %v1782_v33 = vmul.f32 0.044194173, %v1650_v29  ;;  %v8465_v36 = vld [vmem:[#allocation10 + $0x24] ss:$16 sps:$4 sm:$0xff]   ;;  %v8535_v24 = vld [vmem:[#allocation10 + $0x1a0] ss:$16 sps:$4 sm:$0xff]  }
 0x3b2   :  { %v1783_v38 = vmul.f32 0.044194173, %v1651_v37  ;;  %v8468_v37 = vld [vmem:[#allocation10 + $0x224] ss:$16 sps:$4 sm:$0xff]  }
 0x3b3   :  { %v1786_v35 = vpack.c.bf16 %v1782_v33, %v1782_v33  ;;  %v8546_v29 = vld [vmem:[#allocation10 + $0x3c4] ss:$16 sps:$4 sm:$0xff]  }
 0x3b4   :  { %v1787_v40 = vpack.c.bf16 %v1783_v38, %v1783_v38  ;;  %v8466_v38 = vld [vmem:[#allocation10 + $0x220] ss:$16 sps:$4 sm:$0xff]   ;;  %v8549_v33 = vld [vmem:[#allocation10 + $0x1e4] ss:$16 sps:$4 sm:$0xff]  }
 0x3b6   :  { %2500 = vmatpush1.bf16.xpose.msra.mxu0 %v8385_v6  ;;  %2582 = vmatpush1.bf16.xpose.msra.mxu1 %v8388_v39  ;;  %v8471_v6 = vld [vmem:[#allocation10 + $0x44] ss:$16 sps:$4 sm:$0xff]  }
 0x3b7   :  { %2523 = vmatprep.mubr.bf16.mxu0 %v1787_v40  ;;  %2605 = vmatprep.mubr.bf16.mxu1 %v1787_v40  ;;  %v8474_v39 = vld [vmem:[#allocation10 + $0x244] ss:$16 sps:$4 sm:$0xff]   ;;  %v8469_v40 = vld [vmem:[#allocation10 + $0x40] ss:$16 sps:$4 sm:$0xff]  }
 0x3b8   :  { %2501 = vmatprep.subr.bf16.mxu0 %v8393_v41  ;;  %2583 = vmatprep.subr.bf16.mxu1 %v8396_v42  ;;  %v8472_v41 = vld [vmem:[#allocation10 + $0x240] ss:$16 sps:$4 sm:$0xff]   ;;  %v8477_v42 = vld [vmem:[#allocation10 + $0x64] ss:$16 sps:$4 sm:$0xff]  }
 0x3be   :  { %2502 = vmatpush1.bf16.xpose.msra.mxu0 %v8391_v43  ;;  %2584 = vmatpush1.bf16.xpose.msra.mxu1 %v8394_v44  ;;  %v8480_v43 = vld [vmem:[#allocation10 + $0x264] ss:$16 sps:$4 sm:$0xff]   ;;  %v8475_v44 = vld [vmem:[#allocation10 + $0x60] ss:$16 sps:$4 sm:$0xff]  }
 0x3bf   :  { %2503 = vmatprep.subr.bf16.mxu0 %v8399_v9  ;;  %2585 = vmatprep.subr.bf16.mxu1 %v8402_v45  ;;  %v8478_v9 = vld [vmem:[#allocation10 + $0x260] ss:$16 sps:$4 sm:$0xff]   ;;  %v8483_v45 = vld [vmem:[#allocation10 + $0x84] ss:$16 sps:$4 sm:$0xff]  }
 0x3c6   :  { %2504 = vmatpush1.bf16.xpose.msra.mxu0 %v8397_v46  ;;  %2586 = vmatpush1.bf16.xpose.msra.mxu1 %v8400_v47  ;;  %v8486_v46 = vld [vmem:[#allocation10 + $0x284] ss:$16 sps:$4 sm:$0xff]   ;;  %v8481_v47 = vld [vmem:[#allocation10 + $0x80] ss:$16 sps:$4 sm:$0xff]  }
 0x3c7   :  { %2505 = vmatprep.subr.bf16.mxu0 %v8405_v48  ;;  %2587 = vmatprep.subr.bf16.mxu1 %v8408_v49  ;;  %v8484_v48 = vld [vmem:[#allocation10 + $0x280] ss:$16 sps:$4 sm:$0xff]   ;;  %v8489_v49 = vld [vmem:[#allocation10 + $0xa4] ss:$16 sps:$4 sm:$0xff]  }
 0x3ce   :  { %2506 = vmatpush1.bf16.xpose.msra.mxu0 %v8403_v50  ;;  %2588 = vmatpush1.bf16.xpose.msra.mxu1 %v8406_v51  ;;  %v8492_v50 = vld [vmem:[#allocation10 + $0x2a4] ss:$16 sps:$4 sm:$0xff]   ;;  %v8487_v51 = vld [vmem:[#allocation10 + $0xa0] ss:$16 sps:$4 sm:$0xff]  }
 0x3cf   :  { %2507 = vmatprep.subr.bf16.mxu0 %v8411_v52  ;;  %2589 = vmatprep.subr.bf16.mxu1 %v8414_v53  ;;  %v8490_v52 = vld [vmem:[#allocation10 + $0x2a0] ss:$16 sps:$4 sm:$0xff]   ;;  %v8495_v53 = vld [vmem:[#allocation10 + $0xc4] ss:$16 sps:$4 sm:$0xff]  }
 0x3d6   :  { %2508 = vmatpush1.bf16.xpose.msra.mxu0 %v8409_v54  ;;  %2590 = vmatpush1.bf16.xpose.msra.mxu1 %v8412_v55  ;;  %v8498_v54 = vld [vmem:[#allocation10 + $0x2c4] ss:$16 sps:$4 sm:$0xff]   ;;  %v8493_v55 = vld [vmem:[#allocation10 + $0xc0] ss:$16 sps:$4 sm:$0xff]  }
 0x3d7   :  { %2509 = vmatprep.subr.bf16.mxu0 %v8417_v56  ;;  %2591 = vmatprep.subr.bf16.mxu1 %v8420_v57  ;;  %v8496_v56 = vld [vmem:[#allocation10 + $0x2c0] ss:$16 sps:$4 sm:$0xff]   ;;  %v8501_v57 = vld [vmem:[#allocation10 + $0xe4] ss:$16 sps:$4 sm:$0xff]  }
 0x3de   :  { %2510 = vmatpush1.bf16.xpose.msra.mxu0 %v8415_v60  ;;  %2592 = vmatpush1.bf16.xpose.msra.mxu1 %v8418_v58  ;;  %v8504_v60 = vld [vmem:[#allocation10 + $0x2e4] ss:$16 sps:$4 sm:$0xff]   ;;  %v8499_v58 = vld [vmem:[#allocation10 + $0xe0] ss:$16 sps:$4 sm:$0xff]  }
 0x3df   :  { %2511 = vmatprep.subr.bf16.mxu0 %v8423_v61  ;;  %2593 = vmatprep.subr.bf16.mxu1 %v8426_v62  ;;  %v8502_v61 = vld [vmem:[#allocation10 + $0x2e0] ss:$16 sps:$4 sm:$0xff]   ;;  %v8507_v62 = vld [vmem:[#allocation10 + $0x104] ss:$16 sps:$4 sm:$0xff]  }
 0x3e6   :  { %2512 = vmatpush1.bf16.xpose.msra.mxu0 %v8421_v63  ;;  %2594 = vmatpush1.bf16.xpose.msra.mxu1 %v8424_v0  ;;  %v8510_v63 = vld [vmem:[#allocation10 + $0x304] ss:$16 sps:$4 sm:$0xff]   ;;  %v8505_v0 = vld [vmem:[#allocation10 + $0x100] ss:$16 sps:$4 sm:$0xff]  }
 0x3e7   :  { %2513 = vmatprep.subr.bf16.mxu0 %v8429_v1  ;;  %2595 = vmatprep.subr.bf16.mxu1 %v8432_v2  ;;  %v8508_v1 = vld [vmem:[#allocation10 + $0x300] ss:$16 sps:$4 sm:$0xff]   ;;  %v8513_v2 = vld [vmem:[#allocation10 + $0x124] ss:$16 sps:$4 sm:$0xff]  }
 0x3ee   :  { %2514 = vmatpush1.bf16.xpose.msra.mxu0 %v8427_v3  ;;  %2596 = vmatpush1.bf16.xpose.msra.mxu1 %v8430_v4  ;;  %v8516_v3 = vld [vmem:[#allocation10 + $0x324] ss:$16 sps:$4 sm:$0xff]   ;;  %v8511_v4 = vld [vmem:[#allocation10 + $0x120] ss:$16 sps:$4 sm:$0xff]  }
 0x3ef   :  { %2515 = vmatprep.subr.bf16.mxu0 %v8435_v5  ;;  %2597 = vmatprep.subr.bf16.mxu1 %v8438_v8  ;;  %v8514_v5 = vld [vmem:[#allocation10 + $0x320] ss:$16 sps:$4 sm:$0xff]   ;;  %v8519_v8 = vld [vmem:[#allocation10 + $0x144] ss:$16 sps:$4 sm:$0xff]  }
 0x3f6   :  { %2516 = vmatpush1.bf16.xpose.msra.mxu0 %v8433_v11  ;;  %2598 = vmatpush1.bf16.xpose.msra.mxu1 %v8436_v12  ;;  %v8522_v11 = vld [vmem:[#allocation10 + $0x344] ss:$16 sps:$4 sm:$0xff]   ;;  %v8517_v12 = vld [vmem:[#allocation10 + $0x140] ss:$16 sps:$4 sm:$0xff]  }
 0x3f7   :  { %2517 = vmatprep.subr.bf16.mxu0 %v8441_v13  ;;  %2599 = vmatprep.subr.bf16.mxu1 %v8444_v14  ;;  %v8520_v13 = vld [vmem:[#allocation10 + $0x340] ss:$16 sps:$4 sm:$0xff]   ;;  %v8525_v14 = vld [vmem:[#allocation10 + $0x164] ss:$16 sps:$4 sm:$0xff]  }
 0x3fe   :  { %2518 = vmatpush1.bf16.xpose.msra.mxu0 %v8439_v15  ;;  %2600 = vmatpush1.bf16.xpose.msra.mxu1 %v8442_v16  ;;  %v8528_v15 = vld [vmem:[#allocation10 + $0x364] ss:$16 sps:$4 sm:$0xff]   ;;  %v8523_v16 = vld [vmem:[#allocation10 + $0x160] ss:$16 sps:$4 sm:$0xff]  }
 0x3ff   :  { %2519 = vmatprep.subr.bf16.mxu0 %v8447_v17  ;;  %2601 = vmatprep.subr.bf16.mxu1 %v8450_v18  ;;  %v8526_v17 = vld [vmem:[#allocation10 + $0x360] ss:$16 sps:$4 sm:$0xff]   ;;  %v8531_v18 = vld [vmem:[#allocation10 + $0x184] ss:$16 sps:$4 sm:$0xff]  }
 0x406   :  { %2520 = vmatpush1.bf16.xpose.msra.mxu0 %v8445_v19  ;;  %2602 = vmatpush1.bf16.xpose.msra.mxu1 %v8448_v20  ;;  %v8534_v19 = vld [vmem:[#allocation10 + $0x384] ss:$16 sps:$4 sm:$0xff]   ;;  %v8529_v20 = vld [vmem:[#allocation10 + $0x180] ss:$16 sps:$4 sm:$0xff]  }
 0x407   :  { %2521 = vmatprep.subr.bf16.mxu0 %v8453_v22  ;;  %2603 = vmatprep.subr.bf16.mxu1 %v8456_v23  ;;  %v8537_v22 = vld [vmem:[#allocation10 + $0x1a4] ss:$16 sps:$4 sm:$0xff]  }
 0x408   :  { %v8540_v23 = vld [vmem:[#allocation10 + $0x3a4] ss:$16 sps:$4 sm:$0xff]  }
 0x40e   :  { %2522 = vmatpush1.bf16.xpose.msra.mxu0 %v8451_v26  ;;  %2604 = vmatpush1.bf16.xpose.msra.mxu1 %v8454_v27  ;;  %v8538_v26 = vld [vmem:[#allocation10 + $0x3a0] ss:$16 sps:$4 sm:$0xff]   ;;  %v8543_v27 = vld [vmem:[#allocation10 + $0x1c4] ss:$16 sps:$4 sm:$0xff]  }
 0x40f   :  { %3416 = vmatprep.subr.bf16.mxu0 %v8459_v30  ;;  %3498 = vmatprep.subr.bf16.mxu1 %v8462_v31  ;;  %v8541_v30 = vld [vmem:[#allocation10 + $0x1c0] ss:$16 sps:$4 sm:$0xff]  }
 0x410   :  { %v8544_v31 = vld [vmem:[#allocation10 + $0x3c0] ss:$16 sps:$4 sm:$0xff]  }
 0x415   :  { %2524 = vmatmul.mubr.bf16.vlgmr.msra.gmra.mrb[4].mxu0 %v1786_v35  ;;  %2606 = vmatmul.mubr.bf16.vlgmr.msra.gmra.mrb[12].mxu1 %v1786_v35  ;;  %v8550_v35 = vld [vmem:[#allocation10 + $0x3e0] ss:$16 sps:$4 sm:$0xff]  }
 0x416   :  { %3417 = vmatpush1.bf16.xpose.msra.mxu0 %v8457_v34  ;;  %3499 = vmatpush1.bf16.xpose.msra.mxu1 %v8460_v59  ;;  %v8552_v34 = vld [vmem:[#allocation10 + $0x3e4] ss:$16 sps:$4 sm:$0xff]   ;;  %v8547_v59 = vld [vmem:[#allocation10 + $0x1e0] ss:$16 sps:$4 sm:$0xff]  }
 0x417   :  { %3418 = vmatprep.subr.bf16.mxu0 %v8465_v36  ;;  %3500 = vmatprep.subr.bf16.mxu1 %v8468_v37  ;;  %v8555_v36 = vld [vmem:[#allocation10 + $0xc] ss:$16 sps:$4 sm:$0xff]  }
 0x418   :  { %v8558_v37 = vld [vmem:[#allocation10 + $0x20c] ss:$16 sps:$4 sm:$0xff]  }
 0x41e   :  { %3419 = vmatpush1.bf16.xpose.msra.mxu0 %v8463_v32  ;;  %3501 = vmatpush1.bf16.xpose.msra.mxu1 %v8466_v38  ;;  %v9848_v32 = vld [vmem:[%s9953_s11] sm:$0xf] }
 0x41f   :  { %3420 = vmatprep.subr.bf16.mxu0 %v8471_v6  ;;  %3502 = vmatprep.subr.bf16.mxu1 %v8474_v39  ;;  %v1793_v38 = vrot.slane %v9848_v32, %v9805_v7  ;;  %v1797_v6 = vrot.slane %v9848_v32, %v9813_v10  ;;  %v1805_v39 = vrot.slane %v9848_v32, %v9823_v28 }
 0x426   :  { %3421 = vmatpush1.bf16.xpose.msra.mxu0 %v8469_v40  ;;  %3503 = vmatpush1.bf16.xpose.msra.mxu1 %v8472_v41 }
 0x427   :  { %3422 = vmatprep.subr.bf16.mxu0 %v8477_v42  ;;  %3504 = vmatprep.subr.bf16.mxu1 %v8480_v43 }
 0x42e   :  { %3423 = vmatpush1.bf16.xpose.msra.mxu0 %v8475_v44  ;;  %3505 = vmatpush1.bf16.xpose.msra.mxu1 %v8478_v9 }
 0x42f   :  { %3424 = vmatprep.subr.bf16.mxu0 %v8483_v45  ;;  %3506 = vmatprep.subr.bf16.mxu1 %v8486_v46 }
 0x436   :  { %3425 = vmatpush1.bf16.xpose.msra.mxu0 %v8481_v47  ;;  %3507 = vmatpush1.bf16.xpose.msra.mxu1 %v8484_v48 }
 0x437   :  { %3426 = vmatprep.subr.bf16.mxu0 %v8489_v49  ;;  %3508 = vmatprep.subr.bf16.mxu1 %v8492_v50 }
 0x43e   :  { %3427 = vmatpush1.bf16.xpose.msra.mxu0 %v8487_v51  ;;  %3509 = vmatpush1.bf16.xpose.msra.mxu1 %v8490_v52 }
 0x43f   :  { %3428 = vmatprep.subr.bf16.mxu0 %v8495_v53  ;;  %3510 = vmatprep.subr.bf16.mxu1 %v8498_v54 }
 0x446   :  { %3429 = vmatpush1.bf16.xpose.msra.mxu0 %v8493_v55  ;;  %3511 = vmatpush1.bf16.xpose.msra.mxu1 %v8496_v56 }
 0x447   :  { %3430 = vmatprep.subr.bf16.mxu0 %v8501_v57  ;;  %3512 = vmatprep.subr.bf16.mxu1 %v8504_v60  ;;  %v8553_v57 = vld [vmem:[#allocation10 + $0x8] ss:$16 sps:$4 sm:$0xff]  }
 0x448   :  { %v8556_v60 = vld [vmem:[#allocation10 + $0x208] ss:$16 sps:$4 sm:$0xff]  }
 0x44e   :  { %3431 = vmatpush1.bf16.xpose.msra.mxu0 %v8499_v58  ;;  %3513 = vmatpush1.bf16.xpose.msra.mxu1 %v8502_v61  ;;  %v8561_v61 = vld [vmem:[#allocation10 + $0x2c] ss:$16 sps:$4 sm:$0xff]  }
 0x44f   :  { %3432 = vmatprep.subr.bf16.mxu0 %v8507_v62  ;;  %3514 = vmatprep.subr.bf16.mxu1 %v8510_v63  ;;  %v8564_v62 = vld [vmem:[#allocation10 + $0x22c] ss:$16 sps:$4 sm:$0xff]  }
 0x456   :  { %3433 = vmatpush1.bf16.xpose.msra.mxu0 %v8505_v0  ;;  %3515 = vmatpush1.bf16.xpose.msra.mxu1 %v8508_v1  ;;  %v8559_v0 = vld [vmem:[#allocation10 + $0x28] ss:$16 sps:$4 sm:$0xff]  }
 0x457   :  { %3434 = vmatprep.subr.bf16.mxu0 %v8513_v2  ;;  %3516 = vmatprep.subr.bf16.mxu1 %v8516_v3  ;;  %v8562_v1 = vld [vmem:[#allocation10 + $0x228] ss:$16 sps:$4 sm:$0xff]   ;;  %v8567_v2 = vld [vmem:[#allocation10 + $0x4c] ss:$16 sps:$4 sm:$0xff]  }
 0x458   :  { %v8570_v3 = vld [vmem:[#allocation10 + $0x24c] ss:$16 sps:$4 sm:$0xff]  }
 0x45e   :  { %3435 = vmatpush1.bf16.xpose.msra.mxu0 %v8511_v4  ;;  %3517 = vmatpush1.bf16.xpose.msra.mxu1 %v8514_v5  ;;  %v8565_v4 = vld [vmem:[#allocation10 + $0x48] ss:$16 sps:$4 sm:$0xff]  }
 0x45f   :  { %3436 = vmatprep.subr.bf16.mxu0 %v8519_v8  ;;  %3518 = vmatprep.subr.bf16.mxu1 %v8522_v11  ;;  %v8568_v5 = vld [vmem:[#allocation10 + $0x248] ss:$16 sps:$4 sm:$0xff]   ;;  %v8573_v8 = vld [vmem:[#allocation10 + $0x6c] ss:$16 sps:$4 sm:$0xff]  }
 0x460   :  { %v8576_v11 = vld [vmem:[#allocation10 + $0x26c] ss:$16 sps:$4 sm:$0xff]  }
 0x466   :  { %3437 = vmatpush1.bf16.xpose.msra.mxu0 %v8517_v12  ;;  %3519 = vmatpush1.bf16.xpose.msra.mxu1 %v8520_v13  ;;  %v8571_v12 = vld [vmem:[#allocation10 + $0x68] ss:$16 sps:$4 sm:$0xff]  }
 0x467   :  { %3438 = vmatprep.subr.bf16.mxu0 %v8525_v14  ;;  %3520 = vmatprep.subr.bf16.mxu1 %v8528_v15  ;;  %v8574_v13 = vld [vmem:[#allocation10 + $0x268] ss:$16 sps:$4 sm:$0xff]   ;;  %v8579_v14 = vld [vmem:[#allocation10 + $0x8c] ss:$16 sps:$4 sm:$0xff]  }
 0x468   :  { %v8582_v15 = vld [vmem:[#allocation10 + $0x28c] ss:$16 sps:$4 sm:$0xff]  }
 0x46e   :  { %3439 = vmatpush1.bf16.xpose.msra.mxu0 %v8523_v16  ;;  %3521 = vmatpush1.bf16.xpose.msra.mxu1 %v8526_v17  ;;  %v8577_v16 = vld [vmem:[#allocation10 + $0x88] ss:$16 sps:$4 sm:$0xff]  }
 0x46f   :  { %3440 = vmatprep.subr.bf16.mxu0 %v8531_v18  ;;  %3522 = vmatprep.subr.bf16.mxu1 %v8534_v19  ;;  %v8580_v17 = vld [vmem:[#allocation10 + $0x288] ss:$16 sps:$4 sm:$0xff]   ;;  %v8585_v18 = vld [vmem:[#allocation10 + $0xac] ss:$16 sps:$4 sm:$0xff]  }
 0x470   :  { %v8588_v19 = vld [vmem:[#allocation10 + $0x2ac] ss:$16 sps:$4 sm:$0xff]  }
 0x476   :  { %3441 = vmatpush1.bf16.xpose.msra.mxu0 %v8529_v20  ;;  %3523 = vmatpush1.bf16.xpose.msra.mxu1 %v8532_v21  ;;  %v8583_v20 = vld [vmem:[#allocation10 + $0xa8] ss:$16 sps:$4 sm:$0xff]  }
 0x477   :  { %3442 = vmatprep.subr.bf16.mxu0 %v8537_v22  ;;  %3524 = vmatprep.subr.bf16.mxu1 %v8540_v23  ;;  %v8586_v21 = vld [vmem:[#allocation10 + $0x2a8] ss:$16 sps:$4 sm:$0xff]   ;;  %v8591_v22 = vld [vmem:[#allocation10 + $0xcc] ss:$16 sps:$4 sm:$0xff]  }
 0x478   :  { %v8594_v23 = vld [vmem:[#allocation10 + $0x2cc] ss:$16 sps:$4 sm:$0xff]  }
 0x47e   :  { %3443 = vmatpush1.bf16.xpose.msra.mxu0 %v8535_v24  ;;  %3525 = vmatpush1.bf16.xpose.msra.mxu1 %v8538_v26  ;;  %v8589_v24 = vld [vmem:[#allocation10 + $0xc8] ss:$16 sps:$4 sm:$0xff]  }
 0x47f   :  { %3444 = vmatprep.subr.bf16.mxu0 %v8543_v27  ;;  %3526 = vmatprep.subr.bf16.mxu1 %v8546_v29  ;;  %v8592_v26 = vld [vmem:[#allocation10 + $0x2c8] ss:$16 sps:$4 sm:$0xff]   ;;  %v8597_v27 = vld [vmem:[#allocation10 + $0xec] ss:$16 sps:$4 sm:$0xff]  }
 0x480   :  { %v8600_v29 = vld [vmem:[#allocation10 + $0x2ec] ss:$16 sps:$4 sm:$0xff]  }
 0x486   :  { %3445 = vmatpush1.bf16.xpose.msra.mxu0 %v8541_v30  ;;  %3527 = vmatpush1.bf16.xpose.msra.mxu1 %v8544_v31  ;;  %v8595_v30 = vld [vmem:[#allocation10 + $0xe8] ss:$16 sps:$4 sm:$0xff]  }
 0x487   :  { %3446 = vmatprep.subr.bf16.mxu0 %v8549_v33  ;;  %3528 = vmatprep.subr.bf16.mxu1 %v8552_v34  ;;  %v8598_v31 = vld [vmem:[#allocation10 + $0x2e8] ss:$16 sps:$4 sm:$0xff]   ;;  %v8603_v33 = vld [vmem:[#allocation10 + $0x10c] ss:$16 sps:$4 sm:$0xff]  }
 0x488   :  { %v8606_v34 = vld [vmem:[#allocation10 + $0x30c] ss:$16 sps:$4 sm:$0xff]  }
 0x48e   :  { %3447 = vmatpush1.bf16.xpose.msra.mxu0 %v8547_v59  ;;  %3529 = vmatpush1.bf16.xpose.msra.mxu1 %v8550_v35  ;;  %v8601_v59 = vld [vmem:[#allocation10 + $0x108] ss:$16 sps:$4 sm:$0xff]  }
 0x48f   :  { %3457 = vmatprep.subr.bf16.mxu0 %v8555_v36  ;;  %3539 = vmatprep.subr.bf16.mxu1 %v8558_v37  ;;  %v8604_v35 = vld [vmem:[#allocation10 + $0x308] ss:$16 sps:$4 sm:$0xff]   ;;  %v8609_v36 = vld [vmem:[#allocation10 + $0x12c] ss:$16 sps:$4 sm:$0xff]  }
 0x490   :  { %v8612_v37 = vld [vmem:[#allocation10 + $0x32c] ss:$16 sps:$4 sm:$0xff]  }
 0x4e8   :  { %v2525_v40 = vpop.f32.mrb[4].mxu0  ;;  %v9856_v41 = vpop.f32.mrb[12].mxu1 }
 0x4e9   :  { %v7889_v42 = vadd.f32 %v2525_v40, %v1793_v38  ;;  %v2527_v43 = vpop.f32.mrb[5].mxu0  ;;  %v2609_v44 = vpop.f32.mrb[13].mxu1  ;;  %v8607_v38 = vld [vmem:[#allocation10 + $0x128] ss:$16 sps:$4 sm:$0xff]   ;;  %v8618_v40 = vld [vmem:[#allocation10 + $0x34c] ss:$16 sps:$4 sm:$0xff]  }
 0x4ea   :  { %v7890_v9 = vadd.f32 %v2527_v43, %v1797_v6  ;;  %v7892_v45 = vadd.f32 %v2609_v44, %v1805_v39  ;;  %v2529_v46 = vpop.f32.mrb[6].mxu0  ;;  %v2611_v47 = vpop.f32.mrb[14].mxu1  ;;  %v8610_v6 = vld [vmem:[#allocation10 + $0x328] ss:$16 sps:$4 sm:$0xff]   ;;  %v8615_v39 = vld [vmem:[#allocation10 + $0x14c] ss:$16 sps:$4 sm:$0xff]  }
 0x4eb   :  { %v2614_v48 = vmax.f32 %v7889_v42, 0.0  ;;  %v2530_v49 = vpop.f32.mrb[7].mxu0  ;;  %v2612_v50 = vpop.f32.mrb[15].mxu1  ;;  %v8613_v42 = vld [vmem:[#allocation10 + $0x148] ss:$16 sps:$4 sm:$0xff]  }
 0x4ec   :  { %v2615_v51 = vmax.f32 %v7890_v9, 0.0  ;;  %v2617_v52 = vmax.f32 %v7892_v45, 0.0  ;;  %v8616_v43 = vld [vmem:[#allocation10 + $0x348] ss:$16 sps:$4 sm:$0xff]   ;;  %v8621_v44 = vld [vmem:[#allocation10 + $0x16c] ss:$16 sps:$4 sm:$0xff]  }
 0x4ed   :  { %v2746_v53 = vmul.f32 0.044194173, %v2614_v48  ;;  %v8624_v9 = vld [vmem:[#allocation10 + $0x36c] ss:$16 sps:$4 sm:$0xff]   ;;  %v8619_v45 = vld [vmem:[#allocation10 + $0x168] ss:$16 sps:$4 sm:$0xff]  }
 0x4ee   :  { %v2747_v54 = vmul.f32 0.044194173, %v2615_v51  ;;  %v2749_v55 = vmul.f32 0.044194173, %v2617_v52  ;;  %v8622_v46 = vld [vmem:[#allocation10 + $0x368] ss:$16 sps:$4 sm:$0xff]  }
 0x4ef   :  { %v2750_v58 = vpack.c.bf16 %v2746_v53, %v2746_v53  ;;  %v8627_v47 = vld [vmem:[#allocation10 + $0x18c] ss:$16 sps:$4 sm:$0xff]   ;;  %v8625_v49 = vld [vmem:[#allocation10 + $0x188] ss:$16 sps:$4 sm:$0xff]  }
 0x4f0   :  { %v2751_v56 = vpack.c.bf16 %v2747_v54, %v2747_v54  ;;  %v2753_v63 = vpack.c.bf16 %v2749_v55, %v2749_v55  ;;  %v8630_v48 = vld [vmem:[#allocation10 + $0x38c] ss:$16 sps:$4 sm:$0xff]   ;;  %v8628_v50 = vld [vmem:[#allocation10 + $0x388] ss:$16 sps:$4 sm:$0xff]  }
 0x4f1   :  { %v8633_v51 = vld [vmem:[#allocation10 + $0x1ac] ss:$16 sps:$4 sm:$0xff]   ;;  %v8631_v53 = vld [vmem:[#allocation10 + $0x1a8] ss:$16 sps:$4 sm:$0xff]  }
 0x4f2   :  { %3448 = vmatprep.mubr.bf16.mxu0 %v2751_v56  ;;  %3530 = vmatprep.mubr.bf16.mxu1 %v2751_v56  ;;  %v8636_v52 = vld [vmem:[#allocation10 + $0x3ac] ss:$16 sps:$4 sm:$0xff]   ;;  %v8634_v54 = vld [vmem:[#allocation10 + $0x3a8] ss:$16 sps:$4 sm:$0xff]  }
 0x4f3   :  { %3449 = vmatmul.mubr.bf16.vlgmr.msra.gmra.mrb[8].mxu0 %v2750_v58  ;;  %3531 = vmatmul.mubr.bf16.vlgmr.msra.gmra.mrb[16].mxu1 %v2750_v58  ;;  %v8639_v55 = vld [vmem:[#allocation10 + $0x1cc] ss:$16 sps:$4 sm:$0xff]   ;;  %v1801_v58 = vrot.slane %v9848_v32, %v9820_v25  ;;  %v8652_v32 = vld [vmem:[#allocation11 + $0x200] ss:$16 sps:$4 sm:$0xff]  }
 0x4f4   :  { %3458 = vmatpush1.bf16.xpose.msra.mxu0 %v8553_v57  ;;  %3540 = vmatpush1.bf16.xpose.msra.mxu1 %v8556_v60  ;;  %v8642_v56 = vld [vmem:[#allocation10 + $0x3cc] ss:$16 sps:$4 sm:$0xff]   ;;  %v8637_v57 = vld [vmem:[#allocation10 + $0x1c8] ss:$16 sps:$4 sm:$0xff]  }
 0x4f5   :  { %3489 = vmatprep.mubr.bf16.mxu0 %v2753_v63  ;;  %3571 = vmatprep.mubr.bf16.mxu1 %v2753_v63  ;;  %v8640_v60 = vld [vmem:[#allocation10 + $0x3c8] ss:$16 sps:$4 sm:$0xff]   ;;  %v7891_v63 = vadd.f32 %v9856_v41, %v1801_v58  ;;  %v8655_v41 = vld [vmem:[#allocation11 + $0x20] ss:$16 sps:$4 sm:$0xff]  }
 0x4f6   :  { %3459 = vmatprep.subr.bf16.mxu0 %v8561_v61  ;;  %3541 = vmatprep.subr.bf16.mxu1 %v8564_v62  ;;  %v8645_v61 = vld [vmem:[#allocation10 + $0x1ec] ss:$16 sps:$4 sm:$0xff]   ;;  %v8724_v58 = vld [vmem:[#allocation11 + $0x380] ss:$16 sps:$4 sm:$0xff]  }
 0x4f7   :  { %v8648_v62 = vld [vmem:[#allocation10 + $0x3ec] ss:$16 sps:$4 sm:$0xff]  }
 0x4fc   :  { %3460 = vmatpush1.bf16.xpose.msra.mxu0 %v8559_v0  ;;  %3542 = vmatpush1.bf16.xpose.msra.mxu1 %v8562_v1  ;;  %v8643_v0 = vld [vmem:[#allocation10 + $0x1e8] ss:$16 sps:$4 sm:$0xff]  }
 0x4fd   :  { %3461 = vmatprep.subr.bf16.mxu0 %v8567_v2  ;;  %3543 = vmatprep.subr.bf16.mxu1 %v8570_v3  ;;  %v8646_v1 = vld [vmem:[#allocation10 + $0x3e8] ss:$16 sps:$4 sm:$0xff]   ;;  %v2616_v2 = vmax.f32 %v7891_v63, 0.0  ;;  %v8651_v3 = vld [vmem:[#allocation11 + $0x4] ss:$16 sps:$4 sm:$0xff]  }
 0x4fe   :  { %v8727_v63 = vld [vmem:[#allocation11 + $0x1a0] ss:$16 sps:$4 sm:$0xff]  }
 0x504   :  { %3462 = vmatpush1.bf16.xpose.msra.mxu0 %v8565_v4  ;;  %3544 = vmatpush1.bf16.xpose.msra.mxu1 %v8568_v5  ;;  %v8654_v4 = vld [vmem:[#allocation11 + $0x204] ss:$16 sps:$4 sm:$0xff]   ;;  %v2748_v5 = vmul.f32 0.044194173, %v2616_v2 }
 0x505   :  { %3463 = vmatprep.subr.bf16.mxu0 %v8573_v8  ;;  %3545 = vmatprep.subr.bf16.mxu1 %v8576_v11  ;;  %v8649_v8 = vld [vmem:[#allocation11] ss:$16 sps:$4 sm:$0xff]   ;;  %v8738_v2 = vld [vmem:[#allocation11 + $0x3c4] ss:$16 sps:$4 sm:$0xff]  }
 0x506   :  { %v2752_v11 = vpack.c.bf16 %v2748_v5, %v2748_v5  ;;  %v8741_v5 = vld [vmem:[#allocation11 + $0x1e4] ss:$16 sps:$4 sm:$0xff]  }
 0x50c   :  { %3464 = vmatpush1.bf16.xpose.msra.mxu0 %v8571_v12  ;;  %3546 = vmatpush1.bf16.xpose.msra.mxu1 %v8574_v13  ;;  %v8657_v12 = vld [vmem:[#allocation11 + $0x24] ss:$16 sps:$4 sm:$0xff]  }
 0x50d   :  { %3465 = vmatprep.subr.bf16.mxu0 %v8579_v14  ;;  %3547 = vmatprep.subr.bf16.mxu1 %v8582_v15  ;;  %v8660_v13 = vld [vmem:[#allocation11 + $0x224] ss:$16 sps:$4 sm:$0xff]   ;;  %v8658_v14 = vld [vmem:[#allocation11 + $0x220] ss:$16 sps:$4 sm:$0xff]  }
 0x50e   :  { %v8663_v15 = vld [vmem:[#allocation11 + $0x44] ss:$16 sps:$4 sm:$0xff]  }
 0x514   :  { %3466 = vmatpush1.bf16.xpose.msra.mxu0 %v8577_v16  ;;  %3548 = vmatpush1.bf16.xpose.msra.mxu1 %v8580_v17  ;;  %v8666_v16 = vld [vmem:[#allocation11 + $0x244] ss:$16 sps:$4 sm:$0xff]   ;;  %v8661_v17 = vld [vmem:[#allocation11 + $0x40] ss:$16 sps:$4 sm:$0xff]  }
 0x515   :  { %3467 = vmatprep.subr.bf16.mxu0 %v8585_v18  ;;  %3549 = vmatprep.subr.bf16.mxu1 %v8588_v19  ;;  %v8664_v18 = vld [vmem:[#allocation11 + $0x240] ss:$16 sps:$4 sm:$0xff]   ;;  %v8669_v19 = vld [vmem:[#allocation11 + $0x64] ss:$16 sps:$4 sm:$0xff]  }
 0x51c   :  { %3468 = vmatpush1.bf16.xpose.msra.mxu0 %v8583_v20  ;;  %3550 = vmatpush1.bf16.xpose.msra.mxu1 %v8586_v21  ;;  %v8672_v20 = vld [vmem:[#allocation11 + $0x264] ss:$16 sps:$4 sm:$0xff]   ;;  %v8667_v21 = vld [vmem:[#allocation11 + $0x60] ss:$16 sps:$4 sm:$0xff]  }
 0x51d   :  { %3469 = vmatprep.subr.bf16.mxu0 %v8591_v22  ;;  %3551 = vmatprep.subr.bf16.mxu1 %v8594_v23  ;;  %v8670_v22 = vld [vmem:[#allocation11 + $0x260] ss:$16 sps:$4 sm:$0xff]   ;;  %v8675_v23 = vld [vmem:[#allocation11 + $0x84] ss:$16 sps:$4 sm:$0xff]  }
 0x524   :  { %3470 = vmatpush1.bf16.xpose.msra.mxu0 %v8589_v24  ;;  %3552 = vmatpush1.bf16.xpose.msra.mxu1 %v8592_v26  ;;  %v8678_v24 = vld [vmem:[#allocation11 + $0x284] ss:$16 sps:$4 sm:$0xff]   ;;  %v8673_v26 = vld [vmem:[#allocation11 + $0x80] ss:$16 sps:$4 sm:$0xff]  }
 0x525   :  { %3471 = vmatprep.subr.bf16.mxu0 %v8597_v27  ;;  %3553 = vmatprep.subr.bf16.mxu1 %v8600_v29  ;;  %v8676_v27 = vld [vmem:[#allocation11 + $0x280] ss:$16 sps:$4 sm:$0xff]   ;;  %v8681_v29 = vld [vmem:[#allocation11 + $0xa4] ss:$16 sps:$4 sm:$0xff]  }
 0x52c   :  { %3472 = vmatpush1.bf16.xpose.msra.mxu0 %v8595_v30  ;;  %3554 = vmatpush1.bf16.xpose.msra.mxu1 %v8598_v31  ;;  %v8684_v30 = vld [vmem:[#allocation11 + $0x2a4] ss:$16 sps:$4 sm:$0xff]   ;;  %v8679_v31 = vld [vmem:[#allocation11 + $0xa0] ss:$16 sps:$4 sm:$0xff]  }
 0x52d   :  { %3473 = vmatprep.subr.bf16.mxu0 %v8603_v33  ;;  %3555 = vmatprep.subr.bf16.mxu1 %v8606_v34  ;;  %v8682_v33 = vld [vmem:[#allocation11 + $0x2a0] ss:$16 sps:$4 sm:$0xff]   ;;  %v8687_v34 = vld [vmem:[#allocation11 + $0xc4] ss:$16 sps:$4 sm:$0xff]  }
 0x534   :  { %3474 = vmatpush1.bf16.xpose.msra.mxu0 %v8601_v59  ;;  %3556 = vmatpush1.bf16.xpose.msra.mxu1 %v8604_v35  ;;  %v8690_v59 = vld [vmem:[#allocation11 + $0x2c4] ss:$16 sps:$4 sm:$0xff]   ;;  %v8685_v35 = vld [vmem:[#allocation11 + $0xc0] ss:$16 sps:$4 sm:$0xff]  }
 0x535   :  { %3475 = vmatprep.subr.bf16.mxu0 %v8609_v36  ;;  %3557 = vmatprep.subr.bf16.mxu1 %v8612_v37  ;;  %v8688_v36 = vld [vmem:[#allocation11 + $0x2c0] ss:$16 sps:$4 sm:$0xff]   ;;  %v8693_v37 = vld [vmem:[#allocation11 + $0xe4] ss:$16 sps:$4 sm:$0xff]  }
 0x53c   :  { %3476 = vmatpush1.bf16.xpose.msra.mxu0 %v8607_v38  ;;  %3558 = vmatpush1.bf16.xpose.msra.mxu1 %v8610_v6  ;;  %v8696_v38 = vld [vmem:[#allocation11 + $0x2e4] ss:$16 sps:$4 sm:$0xff]   ;;  %v8691_v6 = vld [vmem:[#allocation11 + $0xe0] ss:$16 sps:$4 sm:$0xff]  }
 0x53d   :  { %3477 = vmatprep.subr.bf16.mxu0 %v8615_v39  ;;  %3559 = vmatprep.subr.bf16.mxu1 %v8618_v40  ;;  %v8694_v39 = vld [vmem:[#allocation11 + $0x2e0] ss:$16 sps:$4 sm:$0xff]   ;;  %v8699_v40 = vld [vmem:[#allocation11 + $0x104] ss:$16 sps:$4 sm:$0xff]  }
 0x544   :  { %3478 = vmatpush1.bf16.xpose.msra.mxu0 %v8613_v42  ;;  %3560 = vmatpush1.bf16.xpose.msra.mxu1 %v8616_v43  ;;  %v8702_v42 = vld [vmem:[#allocation11 + $0x304] ss:$16 sps:$4 sm:$0xff]   ;;  %v8697_v43 = vld [vmem:[#allocation11 + $0x100] ss:$16 sps:$4 sm:$0xff]  }
 0x545   :  { %3479 = vmatprep.subr.bf16.mxu0 %v8621_v44  ;;  %3561 = vmatprep.subr.bf16.mxu1 %v8624_v9  ;;  %v8700_v44 = vld [vmem:[#allocation11 + $0x300] ss:$16 sps:$4 sm:$0xff]   ;;  %v8705_v9 = vld [vmem:[#allocation11 + $0x124] ss:$16 sps:$4 sm:$0xff]  }
 0x54c   :  { %3480 = vmatpush1.bf16.xpose.msra.mxu0 %v8619_v45  ;;  %3562 = vmatpush1.bf16.xpose.msra.mxu1 %v8622_v46  ;;  %v8708_v45 = vld [vmem:[#allocation11 + $0x324] ss:$16 sps:$4 sm:$0xff]   ;;  %v8703_v46 = vld [vmem:[#allocation11 + $0x120] ss:$16 sps:$4 sm:$0xff]  }
 0x54d   :  { %3481 = vmatprep.subr.bf16.mxu0 %v8627_v47  ;;  %3563 = vmatprep.subr.bf16.mxu1 %v8630_v48  ;;  %v8706_v47 = vld [vmem:[#allocation11 + $0x320] ss:$16 sps:$4 sm:$0xff]   ;;  %v8711_v48 = vld [vmem:[#allocation11 + $0x144] ss:$16 sps:$4 sm:$0xff]  }
 0x554   :  { %3482 = vmatpush1.bf16.xpose.msra.mxu0 %v8625_v49  ;;  %3564 = vmatpush1.bf16.xpose.msra.mxu1 %v8628_v50  ;;  %v8714_v49 = vld [vmem:[#allocation11 + $0x344] ss:$16 sps:$4 sm:$0xff]   ;;  %v8709_v50 = vld [vmem:[#allocation11 + $0x140] ss:$16 sps:$4 sm:$0xff]  }
 0x555   :  { %3483 = vmatprep.subr.bf16.mxu0 %v8633_v51  ;;  %3565 = vmatprep.subr.bf16.mxu1 %v8636_v52  ;;  %v8712_v51 = vld [vmem:[#allocation11 + $0x340] ss:$16 sps:$4 sm:$0xff]   ;;  %v8717_v52 = vld [vmem:[#allocation11 + $0x164] ss:$16 sps:$4 sm:$0xff]  }
 0x55c   :  { %3484 = vmatpush1.bf16.xpose.msra.mxu0 %v8631_v53  ;;  %3566 = vmatpush1.bf16.xpose.msra.mxu1 %v8634_v54  ;;  %v8720_v53 = vld [vmem:[#allocation11 + $0x364] ss:$16 sps:$4 sm:$0xff]   ;;  %v8715_v54 = vld [vmem:[#allocation11 + $0x160] ss:$16 sps:$4 sm:$0xff]  }
 0x55d   :  { %3485 = vmatprep.subr.bf16.mxu0 %v8639_v55  ;;  %3567 = vmatprep.subr.bf16.mxu1 %v8642_v56  ;;  %v8718_v55 = vld [vmem:[#allocation11 + $0x360] ss:$16 sps:$4 sm:$0xff]   ;;  %v8723_v56 = vld [vmem:[#allocation11 + $0x184] ss:$16 sps:$4 sm:$0xff]  }
 0x564   :  { %3486 = vmatpush1.bf16.xpose.msra.mxu0 %v8637_v57  ;;  %3568 = vmatpush1.bf16.xpose.msra.mxu1 %v8640_v60  ;;  %v8726_v57 = vld [vmem:[#allocation11 + $0x384] ss:$16 sps:$4 sm:$0xff]   ;;  %v8721_v60 = vld [vmem:[#allocation11 + $0x180] ss:$16 sps:$4 sm:$0xff]  }
 0x565   :  { %3487 = vmatprep.subr.bf16.mxu0 %v8645_v61  ;;  %3569 = vmatprep.subr.bf16.mxu1 %v8648_v62  ;;  %v8729_v61 = vld [vmem:[#allocation11 + $0x1a4] ss:$16 sps:$4 sm:$0xff]  }
 0x566   :  { %v8732_v62 = vld [vmem:[#allocation11 + $0x3a4] ss:$16 sps:$4 sm:$0xff]  }
 0x56c   :  { %3488 = vmatpush1.bf16.xpose.msra.mxu0 %v8643_v0  ;;  %3570 = vmatpush1.bf16.xpose.msra.mxu1 %v8646_v1  ;;  %v8730_v0 = vld [vmem:[#allocation11 + $0x3a0] ss:$16 sps:$4 sm:$0xff]   ;;  %v8735_v1 = vld [vmem:[#allocation11 + $0x1c4] ss:$16 sps:$4 sm:$0xff]  }
 0x56d   :  { %4382 = vmatprep.subr.bf16.mxu0 %v8651_v3  ;;  %4464 = vmatprep.subr.bf16.mxu1 %v8654_v4  ;;  %v8733_v3 = vld [vmem:[#allocation11 + $0x1c0] ss:$16 sps:$4 sm:$0xff]  }
 0x56e   :  { %v8736_v4 = vld [vmem:[#allocation11 + $0x3c0] ss:$16 sps:$4 sm:$0xff]  }
 0x573   :  { %3490 = vmatmul.mubr.bf16.vlgmr.msra.gmra.mrb[8].mxu0 %v2752_v11  ;;  %3572 = vmatmul.mubr.bf16.vlgmr.msra.gmra.mrb[16].mxu1 %v2752_v11  ;;  %v8742_v11 = vld [vmem:[#allocation11 + $0x3e0] ss:$16 sps:$4 sm:$0xff]  }
 0x574   :  { %4383 = vmatpush1.bf16.xpose.msra.mxu0 %v8649_v8  ;;  %4465 = vmatpush1.bf16.xpose.msra.mxu1 %v8652_v32  ;;  %v8744_v8 = vld [vmem:[#allocation11 + $0x3e4] ss:$16 sps:$4 sm:$0xff]   ;;  %v8739_v32 = vld [vmem:[#allocation11 + $0x1e0] ss:$16 sps:$4 sm:$0xff]  }
 0x575   :  { %4384 = vmatprep.subr.bf16.mxu0 %v8657_v12  ;;  %4466 = vmatprep.subr.bf16.mxu1 %v8660_v13  ;;  %v8747_v12 = vld [vmem:[#allocation11 + $0xc] ss:$16 sps:$4 sm:$0xff]  }
 0x576   :  { %v8750_v13 = vld [vmem:[#allocation11 + $0x20c] ss:$16 sps:$4 sm:$0xff]  }
 0x57c   :  { %4385 = vmatpush1.bf16.xpose.msra.mxu0 %v8655_v41  ;;  %4467 = vmatpush1.bf16.xpose.msra.mxu1 %v8658_v14  ;;  %v9864_v41 = vld [vmem:[%s9954_s12] sm:$0xf] }
 0x57d   :  { %4386 = vmatprep.subr.bf16.mxu0 %v8663_v15  ;;  %4468 = vmatprep.subr.bf16.mxu1 %v8666_v16  ;;  %v2759_v14 = vrot.slane %v9864_v41, %v9805_v7  ;;  %v2763_v15 = vrot.slane %v9864_v41, %v9813_v10  ;;  %v2771_v16 = vrot.slane %v9864_v41, %v9823_v28 }
 0x584   :  { %4387 = vmatpush1.bf16.xpose.msra.mxu0 %v8661_v17  ;;  %4469 = vmatpush1.bf16.xpose.msra.mxu1 %v8664_v18 }
 0x585   :  { %4388 = vmatprep.subr.bf16.mxu0 %v8669_v19  ;;  %4470 = vmatprep.subr.bf16.mxu1 %v8672_v20 }
 0x58c   :  { %4389 = vmatpush1.bf16.xpose.msra.mxu0 %v8667_v21  ;;  %4471 = vmatpush1.bf16.xpose.msra.mxu1 %v8670_v22 }
 0x58d   :  { %4390 = vmatprep.subr.bf16.mxu0 %v8675_v23  ;;  %4472 = vmatprep.subr.bf16.mxu1 %v8678_v24 }
 0x594   :  { %4391 = vmatpush1.bf16.xpose.msra.mxu0 %v8673_v26  ;;  %4473 = vmatpush1.bf16.xpose.msra.mxu1 %v8676_v27 }
 0x595   :  { %4392 = vmatprep.subr.bf16.mxu0 %v8681_v29  ;;  %4474 = vmatprep.subr.bf16.mxu1 %v8684_v30 }
 0x59c   :  { %4393 = vmatpush1.bf16.xpose.msra.mxu0 %v8679_v31  ;;  %4475 = vmatpush1.bf16.xpose.msra.mxu1 %v8682_v33 }
 0x59d   :  { %4394 = vmatprep.subr.bf16.mxu0 %v8687_v34  ;;  %4476 = vmatprep.subr.bf16.mxu1 %v8690_v59 }
 0x5a4   :  { %4395 = vmatpush1.bf16.xpose.msra.mxu0 %v8685_v35  ;;  %4477 = vmatpush1.bf16.xpose.msra.mxu1 %v8688_v36 }
 0x5a5   :  { %4396 = vmatprep.subr.bf16.mxu0 %v8693_v37  ;;  %4478 = vmatprep.subr.bf16.mxu1 %v8696_v38  ;;  %v8745_v37 = vld [vmem:[#allocation11 + $0x8] ss:$16 sps:$4 sm:$0xff]  }
 0x5a6   :  { %v8748_v38 = vld [vmem:[#allocation11 + $0x208] ss:$16 sps:$4 sm:$0xff]  }
 0x5ac   :  { %4397 = vmatpush1.bf16.xpose.msra.mxu0 %v8691_v6  ;;  %4479 = vmatpush1.bf16.xpose.msra.mxu1 %v8694_v39  ;;  %v8753_v39 = vld [vmem:[#allocation11 + $0x2c] ss:$16 sps:$4 sm:$0xff]  }
 0x5ad   :  { %4398 = vmatprep.subr.bf16.mxu0 %v8699_v40  ;;  %4480 = vmatprep.subr.bf16.mxu1 %v8702_v42  ;;  %v8756_v40 = vld [vmem:[#allocation11 + $0x22c] ss:$16 sps:$4 sm:$0xff]  }
 0x5b4   :  { %4399 = vmatpush1.bf16.xpose.msra.mxu0 %v8697_v43  ;;  %4481 = vmatpush1.bf16.xpose.msra.mxu1 %v8700_v44  ;;  %v8751_v43 = vld [vmem:[#allocation11 + $0x28] ss:$16 sps:$4 sm:$0xff]  }
 0x5b5   :  { %4400 = vmatprep.subr.bf16.mxu0 %v8705_v9  ;;  %4482 = vmatprep.subr.bf16.mxu1 %v8708_v45  ;;  %v8754_v44 = vld [vmem:[#allocation11 + $0x228] ss:$16 sps:$4 sm:$0xff]   ;;  %v8759_v9 = vld [vmem:[#allocation11 + $0x4c] ss:$16 sps:$4 sm:$0xff]  }
 0x5b6   :  { %v8762_v45 = vld [vmem:[#allocation11 + $0x24c] ss:$16 sps:$4 sm:$0xff]  }
 0x5bc   :  { %4401 = vmatpush1.bf16.xpose.msra.mxu0 %v8703_v46  ;;  %4483 = vmatpush1.bf16.xpose.msra.mxu1 %v8706_v47  ;;  %v8757_v46 = vld [vmem:[#allocation11 + $0x48] ss:$16 sps:$4 sm:$0xff]  }
 0x5bd   :  { %4402 = vmatprep.subr.bf16.mxu0 %v8711_v48  ;;  %4484 = vmatprep.subr.bf16.mxu1 %v8714_v49  ;;  %v8760_v47 = vld [vmem:[#allocation11 + $0x248] ss:$16 sps:$4 sm:$0xff]   ;;  %v8765_v48 = vld [vmem:[#allocation11 + $0x6c] ss:$16 sps:$4 sm:$0xff]  }
 0x5be   :  { %v8768_v49 = vld [vmem:[#allocation11 + $0x26c] ss:$16 sps:$4 sm:$0xff]  }
 0x5c4   :  { %4403 = vmatpush1.bf16.xpose.msra.mxu0 %v8709_v50  ;;  %4485 = vmatpush1.bf16.xpose.msra.mxu1 %v8712_v51  ;;  %v8763_v50 = vld [vmem:[#allocation11 + $0x68] ss:$16 sps:$4 sm:$0xff]  }
 0x5c5   :  { %4404 = vmatprep.subr.bf16.mxu0 %v8717_v52  ;;  %4486 = vmatprep.subr.bf16.mxu1 %v8720_v53  ;;  %v8766_v51 = vld [vmem:[#allocation11 + $0x268] ss:$16 sps:$4 sm:$0xff]   ;;  %v8771_v52 = vld [vmem:[#allocation11 + $0x8c] ss:$16 sps:$4 sm:$0xff]  }
 0x5c6   :  { %v8774_v53 = vld [vmem:[#allocation11 + $0x28c] ss:$16 sps:$4 sm:$0xff]  }
 0x5cc   :  { %4405 = vmatpush1.bf16.xpose.msra.mxu0 %v8715_v54  ;;  %4487 = vmatpush1.bf16.xpose.msra.mxu1 %v8718_v55  ;;  %v8769_v54 = vld [vmem:[#allocation11 + $0x88] ss:$16 sps:$4 sm:$0xff]  }
 0x5cd   :  { %4406 = vmatprep.subr.bf16.mxu0 %v8723_v56  ;;  %4488 = vmatprep.subr.bf16.mxu1 %v8726_v57  ;;  %v8772_v55 = vld [vmem:[#allocation11 + $0x288] ss:$16 sps:$4 sm:$0xff]   ;;  %v8777_v56 = vld [vmem:[#allocation11 + $0xac] ss:$16 sps:$4 sm:$0xff]  }
 0x5ce   :  { %v8780_v57 = vld [vmem:[#allocation11 + $0x2ac] ss:$16 sps:$4 sm:$0xff]  }
 0x5d4   :  { %4407 = vmatpush1.bf16.xpose.msra.mxu0 %v8721_v60  ;;  %4489 = vmatpush1.bf16.xpose.msra.mxu1 %v8724_v58  ;;  %v8775_v60 = vld [vmem:[#allocation11 + $0xa8] ss:$16 sps:$4 sm:$0xff]  }
 0x5d5   :  { %4408 = vmatprep.subr.bf16.mxu0 %v8729_v61  ;;  %4490 = vmatprep.subr.bf16.mxu1 %v8732_v62  ;;  %v8778_v58 = vld [vmem:[#allocation11 + $0x2a8] ss:$16 sps:$4 sm:$0xff]   ;;  %v8783_v61 = vld [vmem:[#allocation11 + $0xcc] ss:$16 sps:$4 sm:$0xff]  }
 0x5d6   :  { %v8786_v62 = vld [vmem:[#allocation11 + $0x2cc] ss:$16 sps:$4 sm:$0xff]  }
 0x5dc   :  { %4409 = vmatpush1.bf16.xpose.msra.mxu0 %v8727_v63  ;;  %4491 = vmatpush1.bf16.xpose.msra.mxu1 %v8730_v0  ;;  %v8781_v63 = vld [vmem:[#allocation11 + $0xc8] ss:$16 sps:$4 sm:$0xff]  }
 0x5dd   :  { %4410 = vmatprep.subr.bf16.mxu0 %v8735_v1  ;;  %4492 = vmatprep.subr.bf16.mxu1 %v8738_v2  ;;  %v8784_v0 = vld [vmem:[#allocation11 + $0x2c8] ss:$16 sps:$4 sm:$0xff]   ;;  %v8789_v1 = vld [vmem:[#allocation11 + $0xec] ss:$16 sps:$4 sm:$0xff]  }
 0x5de   :  { %v8792_v2 = vld [vmem:[#allocation11 + $0x2ec] ss:$16 sps:$4 sm:$0xff]  }
 0x5e4   :  { %4411 = vmatpush1.bf16.xpose.msra.mxu0 %v8733_v3  ;;  %4493 = vmatpush1.bf16.xpose.msra.mxu1 %v8736_v4  ;;  %v8787_v3 = vld [vmem:[#allocation11 + $0xe8] ss:$16 sps:$4 sm:$0xff]  }
 0x5e5   :  { %4412 = vmatprep.subr.bf16.mxu0 %v8741_v5  ;;  %4494 = vmatprep.subr.bf16.mxu1 %v8744_v8  ;;  %v8790_v4 = vld [vmem:[#allocation11 + $0x2e8] ss:$16 sps:$4 sm:$0xff]   ;;  %v8795_v5 = vld [vmem:[#allocation11 + $0x10c] ss:$16 sps:$4 sm:$0xff]  }
 0x5e6   :  { %v8798_v8 = vld [vmem:[#allocation11 + $0x30c] ss:$16 sps:$4 sm:$0xff]  }
 0x5ec   :  { %4413 = vmatpush1.bf16.xpose.msra.mxu0 %v8739_v32  ;;  %4495 = vmatpush1.bf16.xpose.msra.mxu1 %v8742_v11  ;;  %v8793_v32 = vld [vmem:[#allocation11 + $0x108] ss:$16 sps:$4 sm:$0xff]  }
 0x5ed   :  { %4423 = vmatprep.subr.bf16.mxu0 %v8747_v12  ;;  %4505 = vmatprep.subr.bf16.mxu1 %v8750_v13  ;;  %v8796_v11 = vld [vmem:[#allocation11 + $0x308] ss:$16 sps:$4 sm:$0xff]   ;;  %v8801_v12 = vld [vmem:[#allocation11 + $0x12c] ss:$16 sps:$4 sm:$0xff]  }
 0x5ee   :  { %v8804_v13 = vld [vmem:[#allocation11 + $0x32c] ss:$16 sps:$4 sm:$0xff]  }
 0x646   :  { %v3491_v17 = vpop.f32.mrb[8].mxu0  ;;  %v9872_v18 = vpop.f32.mrb[16].mxu1 }
 0x647   :  { %v7893_v19 = vadd.f32 %v3491_v17, %v2759_v14  ;;  %v3493_v20 = vpop.f32.mrb[9].mxu0  ;;  %v3575_v21 = vpop.f32.mrb[17].mxu1  ;;  %v8799_v14 = vld [vmem:[#allocation11 + $0x128] ss:$16 sps:$4 sm:$0xff]   ;;  %v8810_v17 = vld [vmem:[#allocation11 + $0x34c] ss:$16 sps:$4 sm:$0xff]  }
 0x648   :  { %v7894_v22 = vadd.f32 %v3493_v20, %v2763_v15  ;;  %v7896_v23 = vadd.f32 %v3575_v21, %v2771_v16  ;;  %v3495_v24 = vpop.f32.mrb[10].mxu0  ;;  %v3577_v26 = vpop.f32.mrb[18].mxu1  ;;  %v8802_v15 = vld [vmem:[#allocation11 + $0x328] ss:$16 sps:$4 sm:$0xff]   ;;  %v8807_v16 = vld [vmem:[#allocation11 + $0x14c] ss:$16 sps:$4 sm:$0xff]  }
 0x649   :  { %v3580_v27 = vmax.f32 %v7893_v19, 0.0  ;;  %v3496_v29 = vpop.f32.mrb[11].mxu0  ;;  %v3578_v30 = vpop.f32.mrb[19].mxu1  ;;  %v8805_v19 = vld [vmem:[#allocation11 + $0x148] ss:$16 sps:$4 sm:$0xff]  }
 0x64a   :  { %v3581_v31 = vmax.f32 %v7894_v22, 0.0  ;;  %v3583_v33 = vmax.f32 %v7896_v23, 0.0  ;;  %v8808_v20 = vld [vmem:[#allocation11 + $0x348] ss:$16 sps:$4 sm:$0xff]   ;;  %v8813_v21 = vld [vmem:[#allocation11 + $0x16c] ss:$16 sps:$4 sm:$0xff]  }
 0x64b   :  { %v3712_v34 = vmul.f32 0.044194173, %v3580_v27  ;;  %v8816_v22 = vld [vmem:[#allocation11 + $0x36c] ss:$16 sps:$4 sm:$0xff]   ;;  %v8811_v23 = vld [vmem:[#allocation11 + $0x168] ss:$16 sps:$4 sm:$0xff]  }
 0x64c   :  { %v3713_v59 = vmul.f32 0.044194173, %v3581_v31  ;;  %v3715_v35 = vmul.f32 0.044194173, %v3583_v33  ;;  %v8814_v24 = vld [vmem:[#allocation11 + $0x368] ss:$16 sps:$4 sm:$0xff]  }
 0x64d   :  { %v3716_v6 = vpack.c.bf16 %v3712_v34, %v3712_v34  ;;  %v8819_v26 = vld [vmem:[#allocation11 + $0x18c] ss:$16 sps:$4 sm:$0xff]   ;;  %v8817_v29 = vld [vmem:[#allocation11 + $0x188] ss:$16 sps:$4 sm:$0xff]  }
 0x64e   :  { %v3717_v36 = vpack.c.bf16 %v3713_v59, %v3713_v59  ;;  %v3719_v42 = vpack.c.bf16 %v3715_v35, %v3715_v35  ;;  %v8822_v27 = vld [vmem:[#allocation11 + $0x38c] ss:$16 sps:$4 sm:$0xff]   ;;  %v8820_v30 = vld [vmem:[#allocation11 + $0x388] ss:$16 sps:$4 sm:$0xff]  }
 0x64f   :  { %v8825_v31 = vld [vmem:[#allocation11 + $0x1ac] ss:$16 sps:$4 sm:$0xff]   ;;  %v8823_v34 = vld [vmem:[#allocation11 + $0x1a8] ss:$16 sps:$4 sm:$0xff]  }
 0x650   :  { %4414 = vmatprep.mubr.bf16.mxu0 %v3717_v36  ;;  %4496 = vmatprep.mubr.bf16.mxu1 %v3717_v36  ;;  %v8828_v33 = vld [vmem:[#allocation11 + $0x3ac] ss:$16 sps:$4 sm:$0xff]   ;;  %v8826_v59 = vld [vmem:[#allocation11 + $0x3a8] ss:$16 sps:$4 sm:$0xff]  }
 0x651   :  { %4415 = vmatmul.mubr.bf16.vlgmr.msra.gmra.mrb[12].mxu0 %v3716_v6  ;;  %4497 = vmatmul.mubr.bf16.vlgmr.msra.gmra.mrb[20].mxu1 %v3716_v6  ;;  %v8831_v35 = vld [vmem:[#allocation11 + $0x1cc] ss:$16 sps:$4 sm:$0xff]   ;;  %v2767_v6 = vrot.slane %v9864_v41, %v9820_v25  ;;  %v8844_v41 = vld [vmem:[#allocation13 + $0x200] ss:$16 sps:$4 sm:$0xff]  }
 0x652   :  { %4424 = vmatpush1.bf16.xpose.msra.mxu0 %v8745_v37  ;;  %4506 = vmatpush1.bf16.xpose.msra.mxu1 %v8748_v38  ;;  %v8834_v36 = vld [vmem:[#allocation11 + $0x3cc] ss:$16 sps:$4 sm:$0xff]   ;;  %v8829_v37 = vld [vmem:[#allocation11 + $0x1c8] ss:$16 sps:$4 sm:$0xff]  }
 0x653   :  { %4455 = vmatprep.mubr.bf16.mxu0 %v3719_v42  ;;  %4537 = vmatprep.mubr.bf16.mxu1 %v3719_v42  ;;  %v8832_v38 = vld [vmem:[#allocation11 + $0x3c8] ss:$16 sps:$4 sm:$0xff]   ;;  %v7895_v42 = vadd.f32 %v9872_v18, %v2767_v6  ;;  %v8847_v18 = vld [vmem:[#allocation13 + $0x20] ss:$16 sps:$4 sm:$0xff]  }
 0x654   :  { %4425 = vmatprep.subr.bf16.mxu0 %v8753_v39  ;;  %4507 = vmatprep.subr.bf16.mxu1 %v8756_v40  ;;  %v8837_v39 = vld [vmem:[#allocation11 + $0x1ec] ss:$16 sps:$4 sm:$0xff]   ;;  %v8916_v6 = vld [vmem:[#allocation13 + $0x380] ss:$16 sps:$4 sm:$0xff]  }
 0x655   :  { %v8840_v40 = vld [vmem:[#allocation11 + $0x3ec] ss:$16 sps:$4 sm:$0xff]  }
 0x65a   :  { %4426 = vmatpush1.bf16.xpose.msra.mxu0 %v8751_v43  ;;  %4508 = vmatpush1.bf16.xpose.msra.mxu1 %v8754_v44  ;;  %v8835_v43 = vld [vmem:[#allocation11 + $0x1e8] ss:$16 sps:$4 sm:$0xff]  }
 0x65b   :  { %4427 = vmatprep.subr.bf16.mxu0 %v8759_v9  ;;  %4509 = vmatprep.subr.bf16.mxu1 %v8762_v45  ;;  %v8838_v44 = vld [vmem:[#allocation11 + $0x3e8] ss:$16 sps:$4 sm:$0xff]   ;;  %v3582_v9 = vmax.f32 %v7895_v42, 0.0  ;;  %v8843_v45 = vld [vmem:[#allocation13 + $0x4] ss:$16 sps:$4 sm:$0xff]  }
 0x65c   :  { %v8919_v42 = vld [vmem:[#allocation13 + $0x1a0] ss:$16 sps:$4 sm:$0xff]  }
 0x662   :  { %4428 = vmatpush1.bf16.xpose.msra.mxu0 %v8757_v46  ;;  %4510 = vmatpush1.bf16.xpose.msra.mxu1 %v8760_v47  ;;  %v8846_v46 = vld [vmem:[#allocation13 + $0x204] ss:$16 sps:$4 sm:$0xff]   ;;  %v3714_v47 = vmul.f32 0.044194173, %v3582_v9 }
 0x663   :  { %4429 = vmatprep.subr.bf16.mxu0 %v8765_v48  ;;  %4511 = vmatprep.subr.bf16.mxu1 %v8768_v49  ;;  %v8841_v48 = vld [vmem:[#allocation13] ss:$16 sps:$4 sm:$0xff]   ;;  %v8930_v9 = vld [vmem:[#allocation13 + $0x3c4] ss:$16 sps:$4 sm:$0xff]  }
 0x664   :  { %v3718_v49 = vpack.c.bf16 %v3714_v47, %v3714_v47  ;;  %v8933_v47 = vld [vmem:[#allocation13 + $0x1e4] ss:$16 sps:$4 sm:$0xff]  }
 0x66a   :  { %4430 = vmatpush1.bf16.xpose.msra.mxu0 %v8763_v50  ;;  %4512 = vmatpush1.bf16.xpose.msra.mxu1 %v8766_v51  ;;  %v8849_v50 = vld [vmem:[#allocation13 + $0x24] ss:$16 sps:$4 sm:$0xff]  }
 0x66b   :  { %4431 = vmatprep.subr.bf16.mxu0 %v8771_v52  ;;  %4513 = vmatprep.subr.bf16.mxu1 %v8774_v53  ;;  %v8852_v51 = vld [vmem:[#allocation13 + $0x224] ss:$16 sps:$4 sm:$0xff]   ;;  %v8850_v52 = vld [vmem:[#allocation13 + $0x220] ss:$16 sps:$4 sm:$0xff]  }
 0x66c   :  { %v8855_v53 = vld [vmem:[#allocation13 + $0x44] ss:$16 sps:$4 sm:$0xff]  }
 0x672   :  { %4432 = vmatpush1.bf16.xpose.msra.mxu0 %v8769_v54  ;;  %4514 = vmatpush1.bf16.xpose.msra.mxu1 %v8772_v55  ;;  %v8858_v54 = vld [vmem:[#allocation13 + $0x244] ss:$16 sps:$4 sm:$0xff]   ;;  %v8853_v55 = vld [vmem:[#allocation13 + $0x40] ss:$16 sps:$4 sm:$0xff]  }
 0x673   :  { %4433 = vmatprep.subr.bf16.mxu0 %v8777_v56  ;;  %4515 = vmatprep.subr.bf16.mxu1 %v8780_v57  ;;  %v8856_v56 = vld [vmem:[#allocation13 + $0x240] ss:$16 sps:$4 sm:$0xff]   ;;  %v8861_v57 = vld [vmem:[#allocation13 + $0x64] ss:$16 sps:$4 sm:$0xff]  }
 0x67a   :  { %4434 = vmatpush1.bf16.xpose.msra.mxu0 %v8775_v60  ;;  %4516 = vmatpush1.bf16.xpose.msra.mxu1 %v8778_v58  ;;  %v8864_v60 = vld [vmem:[#allocation13 + $0x264] ss:$16 sps:$4 sm:$0xff]   ;;  %v8859_v58 = vld [vmem:[#allocation13 + $0x60] ss:$16 sps:$4 sm:$0xff]  }
 0x67b   :  { %4435 = vmatprep.subr.bf16.mxu0 %v8783_v61  ;;  %4517 = vmatprep.subr.bf16.mxu1 %v8786_v62  ;;  %v8862_v61 = vld [vmem:[#allocation13 + $0x260] ss:$16 sps:$4 sm:$0xff]   ;;  %v8867_v62 = vld [vmem:[#allocation13 + $0x84] ss:$16 sps:$4 sm:$0xff]  }
 0x682   :  { %4436 = vmatpush1.bf16.xpose.msra.mxu0 %v8781_v63  ;;  %4518 = vmatpush1.bf16.xpose.msra.mxu1 %v8784_v0  ;;  %v8870_v63 = vld [vmem:[#allocation13 + $0x284] ss:$16 sps:$4 sm:$0xff]   ;;  %v8865_v0 = vld [vmem:[#allocation13 + $0x80] ss:$16 sps:$4 sm:$0xff]  }
 0x683   :  { %4437 = vmatprep.subr.bf16.mxu0 %v8789_v1  ;;  %4519 = vmatprep.subr.bf16.mxu1 %v8792_v2  ;;  %v8868_v1 = vld [vmem:[#allocation13 + $0x280] ss:$16 sps:$4 sm:$0xff]   ;;  %v8873_v2 = vld [vmem:[#allocation13 + $0xa4] ss:$16 sps:$4 sm:$0xff]  }
 0x68a   :  { %4438 = vmatpush1.bf16.xpose.msra.mxu0 %v8787_v3  ;;  %4520 = vmatpush1.bf16.xpose.msra.mxu1 %v8790_v4  ;;  %v8876_v3 = vld [vmem:[#allocation13 + $0x2a4] ss:$16 sps:$4 sm:$0xff]   ;;  %v8871_v4 = vld [vmem:[#allocation13 + $0xa0] ss:$16 sps:$4 sm:$0xff]  }
 0x68b   :  { %4439 = vmatprep.subr.bf16.mxu0 %v8795_v5  ;;  %4521 = vmatprep.subr.bf16.mxu1 %v8798_v8  ;;  %v8874_v5 = vld [vmem:[#allocation13 + $0x2a0] ss:$16 sps:$4 sm:$0xff]   ;;  %v8879_v8 = vld [vmem:[#allocation13 + $0xc4] ss:$16 sps:$4 sm:$0xff]  }
 0x692   :  { %4440 = vmatpush1.bf16.xpose.msra.mxu0 %v8793_v32  ;;  %4522 = vmatpush1.bf16.xpose.msra.mxu1 %v8796_v11  ;;  %v8882_v32 = vld [vmem:[#allocation13 + $0x2c4] ss:$16 sps:$4 sm:$0xff]   ;;  %v8877_v11 = vld [vmem:[#allocation13 + $0xc0] ss:$16 sps:$4 sm:$0xff]  }
 0x693   :  { %4441 = vmatprep.subr.bf16.mxu0 %v8801_v12  ;;  %4523 = vmatprep.subr.bf16.mxu1 %v8804_v13  ;;  %v8880_v12 = vld [vmem:[#allocation13 + $0x2c0] ss:$16 sps:$4 sm:$0xff]   ;;  %v8885_v13 = vld [vmem:[#allocation13 + $0xe4] ss:$16 sps:$4 sm:$0xff]  }
 0x69a   :  { %4442 = vmatpush1.bf16.xpose.msra.mxu0 %v8799_v14  ;;  %4524 = vmatpush1.bf16.xpose.msra.mxu1 %v8802_v15  ;;  %v8888_v14 = vld [vmem:[#allocation13 + $0x2e4] ss:$16 sps:$4 sm:$0xff]   ;;  %v8883_v15 = vld [vmem:[#allocation13 + $0xe0] ss:$16 sps:$4 sm:$0xff]  }
 0x69b   :  { %4443 = vmatprep.subr.bf16.mxu0 %v8807_v16  ;;  %4525 = vmatprep.subr.bf16.mxu1 %v8810_v17  ;;  %v8886_v16 = vld [vmem:[#allocation13 + $0x2e0] ss:$16 sps:$4 sm:$0xff]   ;;  %v8891_v17 = vld [vmem:[#allocation13 + $0x104] ss:$16 sps:$4 sm:$0xff]  }
 0x6a2   :  { %4444 = vmatpush1.bf16.xpose.msra.mxu0 %v8805_v19  ;;  %4526 = vmatpush1.bf16.xpose.msra.mxu1 %v8808_v20  ;;  %v8894_v19 = vld [vmem:[#allocation13 + $0x304] ss:$16 sps:$4 sm:$0xff]   ;;  %v8889_v20 = vld [vmem:[#allocation13 + $0x100] ss:$16 sps:$4 sm:$0xff]  }
 0x6a3   :  { %4445 = vmatprep.subr.bf16.mxu0 %v8813_v21  ;;  %4527 = vmatprep.subr.bf16.mxu1 %v8816_v22  ;;  %v8892_v21 = vld [vmem:[#allocation13 + $0x300] ss:$16 sps:$4 sm:$0xff]   ;;  %v8897_v22 = vld [vmem:[#allocation13 + $0x124] ss:$16 sps:$4 sm:$0xff]  }
 0x6aa   :  { %4446 = vmatpush1.bf16.xpose.msra.mxu0 %v8811_v23  ;;  %4528 = vmatpush1.bf16.xpose.msra.mxu1 %v8814_v24  ;;  %v8900_v23 = vld [vmem:[#allocation13 + $0x324] ss:$16 sps:$4 sm:$0xff]   ;;  %v8895_v24 = vld [vmem:[#allocation13 + $0x120] ss:$16 sps:$4 sm:$0xff]  }
 0x6ab   :  { %4447 = vmatprep.subr.bf16.mxu0 %v8819_v26  ;;  %4529 = vmatprep.subr.bf16.mxu1 %v8822_v27  ;;  %v8898_v26 = vld [vmem:[#allocation13 + $0x320] ss:$16 sps:$4 sm:$0xff]   ;;  %v8903_v27 = vld [vmem:[#allocation13 + $0x144] ss:$16 sps:$4 sm:$0xff]  }
 0x6b2   :  { %4448 = vmatpush1.bf16.xpose.msra.mxu0 %v8817_v29  ;;  %4530 = vmatpush1.bf16.xpose.msra.mxu1 %v8820_v30  ;;  %v8906_v29 = vld [vmem:[#allocation13 + $0x344] ss:$16 sps:$4 sm:$0xff]   ;;  %v8901_v30 = vld [vmem:[#allocation13 + $0x140] ss:$16 sps:$4 sm:$0xff]  }
 0x6b3   :  { %4449 = vmatprep.subr.bf16.mxu0 %v8825_v31  ;;  %4531 = vmatprep.subr.bf16.mxu1 %v8828_v33  ;;  %v8904_v31 = vld [vmem:[#allocation13 + $0x340] ss:$16 sps:$4 sm:$0xff]   ;;  %v8909_v33 = vld [vmem:[#allocation13 + $0x164] ss:$16 sps:$4 sm:$0xff]  }
 0x6ba   :  { %4450 = vmatpush1.bf16.xpose.msra.mxu0 %v8823_v34  ;;  %4532 = vmatpush1.bf16.xpose.msra.mxu1 %v8826_v59  ;;  %v8912_v34 = vld [vmem:[#allocation13 + $0x364] ss:$16 sps:$4 sm:$0xff]   ;;  %v8907_v59 = vld [vmem:[#allocation13 + $0x160] ss:$16 sps:$4 sm:$0xff]  }
 0x6bb   :  { %4451 = vmatprep.subr.bf16.mxu0 %v8831_v35  ;;  %4533 = vmatprep.subr.bf16.mxu1 %v8834_v36  ;;  %v8910_v35 = vld [vmem:[#allocation13 + $0x360] ss:$16 sps:$4 sm:$0xff]   ;;  %v8915_v36 = vld [vmem:[#allocation13 + $0x184] ss:$16 sps:$4 sm:$0xff]  }
 0x6c2   :  { %4452 = vmatpush1.bf16.xpose.msra.mxu0 %v8829_v37  ;;  %4534 = vmatpush1.bf16.xpose.msra.mxu1 %v8832_v38  ;;  %v8918_v37 = vld [vmem:[#allocation13 + $0x384] ss:$16 sps:$4 sm:$0xff]   ;;  %v8913_v38 = vld [vmem:[#allocation13 + $0x180] ss:$16 sps:$4 sm:$0xff]  }
 0x6c3   :  { %4453 = vmatprep.subr.bf16.mxu0 %v8837_v39  ;;  %4535 = vmatprep.subr.bf16.mxu1 %v8840_v40  ;;  %v8921_v39 = vld [vmem:[#allocation13 + $0x1a4] ss:$16 sps:$4 sm:$0xff]  }
 0x6c4   :  { %v8924_v40 = vld [vmem:[#allocation13 + $0x3a4] ss:$16 sps:$4 sm:$0xff]  }
 0x6ca   :  { %4454 = vmatpush1.bf16.xpose.msra.mxu0 %v8835_v43  ;;  %4536 = vmatpush1.bf16.xpose.msra.mxu1 %v8838_v44  ;;  %v8922_v43 = vld [vmem:[#allocation13 + $0x3a0] ss:$16 sps:$4 sm:$0xff]   ;;  %v8927_v44 = vld [vmem:[#allocation13 + $0x1c4] ss:$16 sps:$4 sm:$0xff]  }
 0x6cb   :  { %5348 = vmatprep.subr.bf16.mxu0 %v8843_v45  ;;  %5430 = vmatprep.subr.bf16.mxu1 %v8846_v46  ;;  %v8925_v45 = vld [vmem:[#allocation13 + $0x1c0] ss:$16 sps:$4 sm:$0xff]  }
 0x6cc   :  { %v8928_v46 = vld [vmem:[#allocation13 + $0x3c0] ss:$16 sps:$4 sm:$0xff]  }
 0x6d1   :  { %4456 = vmatmul.mubr.bf16.vlgmr.msra.gmra.mrb[12].mxu0 %v3718_v49  ;;  %4538 = vmatmul.mubr.bf16.vlgmr.msra.gmra.mrb[20].mxu1 %v3718_v49  ;;  %v8934_v49 = vld [vmem:[#allocation13 + $0x3e0] ss:$16 sps:$4 sm:$0xff]  }
 0x6d2   :  { %5349 = vmatpush1.bf16.xpose.msra.mxu0 %v8841_v48  ;;  %5431 = vmatpush1.bf16.xpose.msra.mxu1 %v8844_v41  ;;  %v8936_v48 = vld [vmem:[#allocation13 + $0x3e4] ss:$16 sps:$4 sm:$0xff]   ;;  %v8931_v41 = vld [vmem:[#allocation13 + $0x1e0] ss:$16 sps:$4 sm:$0xff]  }
 0x6d3   :  { %5350 = vmatprep.subr.bf16.mxu0 %v8849_v50  ;;  %5432 = vmatprep.subr.bf16.mxu1 %v8852_v51  ;;  %v8939_v50 = vld [vmem:[#allocation13 + $0xc] ss:$16 sps:$4 sm:$0xff]  }
 0x6d4   :  { %v8942_v51 = vld [vmem:[#allocation13 + $0x20c] ss:$16 sps:$4 sm:$0xff]  }
 0x6da   :  { %5351 = vmatpush1.bf16.xpose.msra.mxu0 %v8847_v18  ;;  %5433 = vmatpush1.bf16.xpose.msra.mxu1 %v8850_v52  ;;  %v9880_v18 = vld [vmem:[%s9955_s13] sm:$0xf] }
 0x6db   :  { %5352 = vmatprep.subr.bf16.mxu0 %v8855_v53  ;;  %5434 = vmatprep.subr.bf16.mxu1 %v8858_v54  ;;  %v3725_v52 = vrot.slane %v9880_v18, %v9805_v7  ;;  %v3729_v53 = vrot.slane %v9880_v18, %v9813_v10  ;;  %v3737_v54 = vrot.slane %v9880_v18, %v9823_v28 }
 0x6e2   :  { %5353 = vmatpush1.bf16.xpose.msra.mxu0 %v8853_v55  ;;  %5435 = vmatpush1.bf16.xpose.msra.mxu1 %v8856_v56 }
 0x6e3   :  { %5354 = vmatprep.subr.bf16.mxu0 %v8861_v57  ;;  %5436 = vmatprep.subr.bf16.mxu1 %v8864_v60 }
 0x6ea   :  { %5355 = vmatpush1.bf16.xpose.msra.mxu0 %v8859_v58  ;;  %5437 = vmatpush1.bf16.xpose.msra.mxu1 %v8862_v61 }
 0x6eb   :  { %5356 = vmatprep.subr.bf16.mxu0 %v8867_v62  ;;  %5438 = vmatprep.subr.bf16.mxu1 %v8870_v63 }
 0x6f2   :  { %5357 = vmatpush1.bf16.xpose.msra.mxu0 %v8865_v0  ;;  %5439 = vmatpush1.bf16.xpose.msra.mxu1 %v8868_v1 }
 0x6f3   :  { %5358 = vmatprep.subr.bf16.mxu0 %v8873_v2  ;;  %5440 = vmatprep.subr.bf16.mxu1 %v8876_v3 }
 0x6fa   :  { %5359 = vmatpush1.bf16.xpose.msra.mxu0 %v8871_v4  ;;  %5441 = vmatpush1.bf16.xpose.msra.mxu1 %v8874_v5 }
 0x6fb   :  { %5360 = vmatprep.subr.bf16.mxu0 %v8879_v8  ;;  %5442 = vmatprep.subr.bf16.mxu1 %v8882_v32 }
 0x702   :  { %5361 = vmatpush1.bf16.xpose.msra.mxu0 %v8877_v11  ;;  %5443 = vmatpush1.bf16.xpose.msra.mxu1 %v8880_v12 }
 0x703   :  { %5362 = vmatprep.subr.bf16.mxu0 %v8885_v13  ;;  %5444 = vmatprep.subr.bf16.mxu1 %v8888_v14  ;;  %v8937_v13 = vld [vmem:[#allocation13 + $0x8] ss:$16 sps:$4 sm:$0xff]  }
 0x704   :  { %v8940_v14 = vld [vmem:[#allocation13 + $0x208] ss:$16 sps:$4 sm:$0xff]  }
 0x70a   :  { %5363 = vmatpush1.bf16.xpose.msra.mxu0 %v8883_v15  ;;  %5445 = vmatpush1.bf16.xpose.msra.mxu1 %v8886_v16  ;;  %v8945_v16 = vld [vmem:[#allocation13 + $0x2c] ss:$16 sps:$4 sm:$0xff]  }
 0x70b   :  { %5364 = vmatprep.subr.bf16.mxu0 %v8891_v17  ;;  %5446 = vmatprep.subr.bf16.mxu1 %v8894_v19  ;;  %v8948_v17 = vld [vmem:[#allocation13 + $0x22c] ss:$16 sps:$4 sm:$0xff]  }
 0x712   :  { %5365 = vmatpush1.bf16.xpose.msra.mxu0 %v8889_v20  ;;  %5447 = vmatpush1.bf16.xpose.msra.mxu1 %v8892_v21  ;;  %v8943_v20 = vld [vmem:[#allocation13 + $0x28] ss:$16 sps:$4 sm:$0xff]  }
 0x713   :  { %5366 = vmatprep.subr.bf16.mxu0 %v8897_v22  ;;  %5448 = vmatprep.subr.bf16.mxu1 %v8900_v23  ;;  %v8946_v21 = vld [vmem:[#allocation13 + $0x228] ss:$16 sps:$4 sm:$0xff]   ;;  %v8951_v22 = vld [vmem:[#allocation13 + $0x4c] ss:$16 sps:$4 sm:$0xff]  }
 0x714   :  { %v8954_v23 = vld [vmem:[#allocation13 + $0x24c] ss:$16 sps:$4 sm:$0xff]  }
 0x71a   :  { %5367 = vmatpush1.bf16.xpose.msra.mxu0 %v8895_v24  ;;  %5449 = vmatpush1.bf16.xpose.msra.mxu1 %v8898_v26  ;;  %v8949_v24 = vld [vmem:[#allocation13 + $0x48] ss:$16 sps:$4 sm:$0xff]  }
 0x71b   :  { %5368 = vmatprep.subr.bf16.mxu0 %v8903_v27  ;;  %5450 = vmatprep.subr.bf16.mxu1 %v8906_v29  ;;  %v8952_v26 = vld [vmem:[#allocation13 + $0x248] ss:$16 sps:$4 sm:$0xff]   ;;  %v8957_v27 = vld [vmem:[#allocation13 + $0x6c] ss:$16 sps:$4 sm:$0xff]  }
 0x71c   :  { %v8960_v29 = vld [vmem:[#allocation13 + $0x26c] ss:$16 sps:$4 sm:$0xff]  }
 0x722   :  { %5369 = vmatpush1.bf16.xpose.msra.mxu0 %v8901_v30  ;;  %5451 = vmatpush1.bf16.xpose.msra.mxu1 %v8904_v31  ;;  %v8955_v30 = vld [vmem:[#allocation13 + $0x68] ss:$16 sps:$4 sm:$0xff]  }
 0x723   :  { %5370 = vmatprep.subr.bf16.mxu0 %v8909_v33  ;;  %5452 = vmatprep.subr.bf16.mxu1 %v8912_v34  ;;  %v8958_v31 = vld [vmem:[#allocation13 + $0x268] ss:$16 sps:$4 sm:$0xff]   ;;  %v8963_v33 = vld [vmem:[#allocation13 + $0x8c] ss:$16 sps:$4 sm:$0xff]  }
 0x724   :  { %v8966_v34 = vld [vmem:[#allocation13 + $0x28c] ss:$16 sps:$4 sm:$0xff]  }
 0x72a   :  { %5371 = vmatpush1.bf16.xpose.msra.mxu0 %v8907_v59  ;;  %5453 = vmatpush1.bf16.xpose.msra.mxu1 %v8910_v35  ;;  %v8961_v59 = vld [vmem:[#allocation13 + $0x88] ss:$16 sps:$4 sm:$0xff]  }
 0x72b   :  { %5372 = vmatprep.subr.bf16.mxu0 %v8915_v36  ;;  %5454 = vmatprep.subr.bf16.mxu1 %v8918_v37  ;;  %v8964_v35 = vld [vmem:[#allocation13 + $0x288] ss:$16 sps:$4 sm:$0xff]   ;;  %v8969_v36 = vld [vmem:[#allocation13 + $0xac] ss:$16 sps:$4 sm:$0xff]  }
 0x72c   :  { %v8972_v37 = vld [vmem:[#allocation13 + $0x2ac] ss:$16 sps:$4 sm:$0xff]  }
 0x732   :  { %5373 = vmatpush1.bf16.xpose.msra.mxu0 %v8913_v38  ;;  %5455 = vmatpush1.bf16.xpose.msra.mxu1 %v8916_v6  ;;  %v8967_v38 = vld [vmem:[#allocation13 + $0xa8] ss:$16 sps:$4 sm:$0xff]  }
 0x733   :  { %5374 = vmatprep.subr.bf16.mxu0 %v8921_v39  ;;  %5456 = vmatprep.subr.bf16.mxu1 %v8924_v40  ;;  %v8970_v6 = vld [vmem:[#allocation13 + $0x2a8] ss:$16 sps:$4 sm:$0xff]   ;;  %v8975_v39 = vld [vmem:[#allocation13 + $0xcc] ss:$16 sps:$4 sm:$0xff]  }
 0x734   :  { %v8978_v40 = vld [vmem:[#allocation13 + $0x2cc] ss:$16 sps:$4 sm:$0xff]  }
 0x73a   :  { %5375 = vmatpush1.bf16.xpose.msra.mxu0 %v8919_v42  ;;  %5457 = vmatpush1.bf16.xpose.msra.mxu1 %v8922_v43  ;;  %v8973_v42 = vld [vmem:[#allocation13 + $0xc8] ss:$16 sps:$4 sm:$0xff]  }
 0x73b   :  { %5376 = vmatprep.subr.bf16.mxu0 %v8927_v44  ;;  %5458 = vmatprep.subr.bf16.mxu1 %v8930_v9  ;;  %v8976_v43 = vld [vmem:[#allocation13 + $0x2c8] ss:$16 sps:$4 sm:$0xff]   ;;  %v8981_v44 = vld [vmem:[#allocation13 + $0xec] ss:$16 sps:$4 sm:$0xff]  }
 0x73c   :  { %v8984_v9 = vld [vmem:[#allocation13 + $0x2ec] ss:$16 sps:$4 sm:$0xff]  }
 0x742   :  { %5377 = vmatpush1.bf16.xpose.msra.mxu0 %v8925_v45  ;;  %5459 = vmatpush1.bf16.xpose.msra.mxu1 %v8928_v46  ;;  %v8979_v45 = vld [vmem:[#allocation13 + $0xe8] ss:$16 sps:$4 sm:$0xff]  }
 0x743   :  { %5378 = vmatprep.subr.bf16.mxu0 %v8933_v47  ;;  %5460 = vmatprep.subr.bf16.mxu1 %v8936_v48  ;;  %v8982_v46 = vld [vmem:[#allocation13 + $0x2e8] ss:$16 sps:$4 sm:$0xff]   ;;  %v8987_v47 = vld [vmem:[#allocation13 + $0x10c] ss:$16 sps:$4 sm:$0xff]  }
 0x744   :  { %v8990_v48 = vld [vmem:[#allocation13 + $0x30c] ss:$16 sps:$4 sm:$0xff]  }
 0x74a   :  { %5379 = vmatpush1.bf16.xpose.msra.mxu0 %v8931_v41  ;;  %5461 = vmatpush1.bf16.xpose.msra.mxu1 %v8934_v49  ;;  %v8985_v41 = vld [vmem:[#allocation13 + $0x108] ss:$16 sps:$4 sm:$0xff]  }
 0x74b   :  { %5389 = vmatprep.subr.bf16.mxu0 %v8939_v50  ;;  %5471 = vmatprep.subr.bf16.mxu1 %v8942_v51  ;;  %v8988_v49 = vld [vmem:[#allocation13 + $0x308] ss:$16 sps:$4 sm:$0xff]   ;;  %v8993_v50 = vld [vmem:[#allocation13 + $0x12c] ss:$16 sps:$4 sm:$0xff]  }
 0x74c   :  { %v8996_v51 = vld [vmem:[#allocation13 + $0x32c] ss:$16 sps:$4 sm:$0xff]  }
 0x7a4   :  { %v4457_v55 = vpop.f32.mrb[12].mxu0  ;;  %v9888_v56 = vpop.f32.mrb[20].mxu1 }
 0x7a5   :  { %v7897_v57 = vadd.f32 %v4457_v55, %v3725_v52  ;;  %v4459_v60 = vpop.f32.mrb[13].mxu0  ;;  %v4541_v58 = vpop.f32.mrb[21].mxu1  ;;  %v8991_v52 = vld [vmem:[#allocation13 + $0x128] ss:$16 sps:$4 sm:$0xff]   ;;  %v9002_v55 = vld [vmem:[#allocation13 + $0x34c] ss:$16 sps:$4 sm:$0xff]  }
 0x7a6   :  { %v7898_v61 = vadd.f32 %v4459_v60, %v3729_v53  ;;  %v7900_v62 = vadd.f32 %v4541_v58, %v3737_v54  ;;  %v4461_v63 = vpop.f32.mrb[14].mxu0  ;;  %v4543_v0 = vpop.f32.mrb[22].mxu1  ;;  %v8994_v53 = vld [vmem:[#allocation13 + $0x328] ss:$16 sps:$4 sm:$0xff]   ;;  %v8999_v54 = vld [vmem:[#allocation13 + $0x14c] ss:$16 sps:$4 sm:$0xff]  }
 0x7a7   :  { %v4546_v1 = vmax.f32 %v7897_v57, 0.0  ;;  %v4462_v2 = vpop.f32.mrb[15].mxu0  ;;  %v4544_v3 = vpop.f32.mrb[23].mxu1  ;;  %v8997_v57 = vld [vmem:[#allocation13 + $0x148] ss:$16 sps:$4 sm:$0xff]  }
 0x7a8   :  { %v4547_v4 = vmax.f32 %v7898_v61, 0.0  ;;  %v4549_v5 = vmax.f32 %v7900_v62, 0.0  ;;  %v9000_v60 = vld [vmem:[#allocation13 + $0x348] ss:$16 sps:$4 sm:$0xff]   ;;  %v9005_v58 = vld [vmem:[#allocation13 + $0x16c] ss:$16 sps:$4 sm:$0xff]  }
 0x7a9   :  { %v4678_v8 = vmul.f32 0.044194173, %v4546_v1  ;;  %v9008_v61 = vld [vmem:[#allocation13 + $0x36c] ss:$16 sps:$4 sm:$0xff]   ;;  %v9003_v62 = vld [vmem:[#allocation13 + $0x168] ss:$16 sps:$4 sm:$0xff]  }
 0x7aa   :  { %v4679_v32 = vmul.f32 0.044194173, %v4547_v4  ;;  %v4681_v11 = vmul.f32 0.044194173, %v4549_v5  ;;  %v9006_v63 = vld [vmem:[#allocation13 + $0x368] ss:$16 sps:$4 sm:$0xff]  }
 0x7ab   :  { %v4682_v15 = vpack.c.bf16 %v4678_v8, %v4678_v8  ;;  %v9011_v0 = vld [vmem:[#allocation13 + $0x18c] ss:$16 sps:$4 sm:$0xff]   ;;  %v9009_v2 = vld [vmem:[#allocation13 + $0x188] ss:$16 sps:$4 sm:$0xff]  }
 0x7ac   :  { %v4683_v12 = vpack.c.bf16 %v4679_v32, %v4679_v32  ;;  %v4685_v19 = vpack.c.bf16 %v4681_v11, %v4681_v11  ;;  %v9014_v1 = vld [vmem:[#allocation13 + $0x38c] ss:$16 sps:$4 sm:$0xff]   ;;  %v9012_v3 = vld [vmem:[#allocation13 + $0x388] ss:$16 sps:$4 sm:$0xff]  }
 0x7ad   :  { %v9017_v4 = vld [vmem:[#allocation13 + $0x1ac] ss:$16 sps:$4 sm:$0xff]   ;;  %v9015_v8 = vld [vmem:[#allocation13 + $0x1a8] ss:$16 sps:$4 sm:$0xff]  }
 0x7ae   :  { %5380 = vmatprep.mubr.bf16.mxu0 %v4683_v12  ;;  %5462 = vmatprep.mubr.bf16.mxu1 %v4683_v12  ;;  %v9020_v5 = vld [vmem:[#allocation13 + $0x3ac] ss:$16 sps:$4 sm:$0xff]   ;;  %v9018_v32 = vld [vmem:[#allocation13 + $0x3a8] ss:$16 sps:$4 sm:$0xff]  }
 0x7af   :  { %5381 = vmatmul.mubr.bf16.vlgmr.msra.gmra.mrb[16].mxu0 %v4682_v15  ;;  %5463 = vmatmul.mubr.bf16.vlgmr.msra.gmra.mrb[24].mxu1 %v4682_v15  ;;  %v9023_v11 = vld [vmem:[#allocation13 + $0x1cc] ss:$16 sps:$4 sm:$0xff]   ;;  %v3733_v15 = vrot.slane %v9880_v18, %v9820_v25  ;;  %v9036_v18 = vld [vmem:[#allocation14 + $0x200] ss:$16 sps:$4 sm:$0xff]  }
 0x7b0   :  { %5390 = vmatpush1.bf16.xpose.msra.mxu0 %v8937_v13  ;;  %5472 = vmatpush1.bf16.xpose.msra.mxu1 %v8940_v14  ;;  %v9026_v12 = vld [vmem:[#allocation13 + $0x3cc] ss:$16 sps:$4 sm:$0xff]   ;;  %v9021_v13 = vld [vmem:[#allocation13 + $0x1c8] ss:$16 sps:$4 sm:$0xff]  }
 0x7b1   :  { %5421 = vmatprep.mubr.bf16.mxu0 %v4685_v19  ;;  %5503 = vmatprep.mubr.bf16.mxu1 %v4685_v19  ;;  %v9024_v14 = vld [vmem:[#allocation13 + $0x3c8] ss:$16 sps:$4 sm:$0xff]   ;;  %v7899_v19 = vadd.f32 %v9888_v56, %v3733_v15  ;;  %v9039_v56 = vld [vmem:[#allocation14 + $0x20] ss:$16 sps:$4 sm:$0xff]  }
 0x7b2   :  { %5391 = vmatprep.subr.bf16.mxu0 %v8945_v16  ;;  %5473 = vmatprep.subr.bf16.mxu1 %v8948_v17  ;;  %v9029_v16 = vld [vmem:[#allocation13 + $0x1ec] ss:$16 sps:$4 sm:$0xff]   ;;  %v9108_v15 = vld [vmem:[#allocation14 + $0x380] ss:$16 sps:$4 sm:$0xff]  }
 0x7b3   :  { %v9032_v17 = vld [vmem:[#allocation13 + $0x3ec] ss:$16 sps:$4 sm:$0xff]  }
 0x7b8   :  { %5392 = vmatpush1.bf16.xpose.msra.mxu0 %v8943_v20  ;;  %5474 = vmatpush1.bf16.xpose.msra.mxu1 %v8946_v21  ;;  %v9027_v20 = vld [vmem:[#allocation13 + $0x1e8] ss:$16 sps:$4 sm:$0xff]  }
 0x7b9   :  { %5393 = vmatprep.subr.bf16.mxu0 %v8951_v22  ;;  %5475 = vmatprep.subr.bf16.mxu1 %v8954_v23  ;;  %v9030_v21 = vld [vmem:[#allocation13 + $0x3e8] ss:$16 sps:$4 sm:$0xff]   ;;  %v4548_v22 = vmax.f32 %v7899_v19, 0.0  ;;  %v9035_v23 = vld [vmem:[#allocation14 + $0x4] ss:$16 sps:$4 sm:$0xff]  }
 0x7ba   :  { %v9111_v19 = vld [vmem:[#allocation14 + $0x1a0] ss:$16 sps:$4 sm:$0xff]  }
 0x7c0   :  { %5394 = vmatpush1.bf16.xpose.msra.mxu0 %v8949_v24  ;;  %5476 = vmatpush1.bf16.xpose.msra.mxu1 %v8952_v26  ;;  %v9038_v24 = vld [vmem:[#allocation14 + $0x204] ss:$16 sps:$4 sm:$0xff]   ;;  %v4680_v26 = vmul.f32 0.044194173, %v4548_v22 }
 0x7c1   :  { %5395 = vmatprep.subr.bf16.mxu0 %v8957_v27  ;;  %5477 = vmatprep.subr.bf16.mxu1 %v8960_v29  ;;  %v9033_v27 = vld [vmem:[#allocation14] ss:$16 sps:$4 sm:$0xff]   ;;  %v9122_v22 = vld [vmem:[#allocation14 + $0x3c4] ss:$16 sps:$4 sm:$0xff]  }
 0x7c2   :  { %v4684_v29 = vpack.c.bf16 %v4680_v26, %v4680_v26  ;;  %v9125_v26 = vld [vmem:[#allocation14 + $0x1e4] ss:$16 sps:$4 sm:$0xff]  }
 0x7c8   :  { %5396 = vmatpush1.bf16.xpose.msra.mxu0 %v8955_v30  ;;  %5478 = vmatpush1.bf16.xpose.msra.mxu1 %v8958_v31  ;;  %v9041_v30 = vld [vmem:[#allocation14 + $0x24] ss:$16 sps:$4 sm:$0xff]  }
 0x7c9   :  { %5397 = vmatprep.subr.bf16.mxu0 %v8963_v33  ;;  %5479 = vmatprep.subr.bf16.mxu1 %v8966_v34  ;;  %v9044_v31 = vld [vmem:[#allocation14 + $0x224] ss:$16 sps:$4 sm:$0xff]   ;;  %v9042_v33 = vld [vmem:[#allocation14 + $0x220] ss:$16 sps:$4 sm:$0xff]  }
 0x7ca   :  { %v9047_v34 = vld [vmem:[#allocation14 + $0x44] ss:$16 sps:$4 sm:$0xff]  }
 0x7d0   :  { %5398 = vmatpush1.bf16.xpose.msra.mxu0 %v8961_v59  ;;  %5480 = vmatpush1.bf16.xpose.msra.mxu1 %v8964_v35  ;;  %v9050_v59 = vld [vmem:[#allocation14 + $0x244] ss:$16 sps:$4 sm:$0xff]   ;;  %v9045_v35 = vld [vmem:[#allocation14 + $0x40] ss:$16 sps:$4 sm:$0xff]  }
 0x7d1   :  { %5399 = vmatprep.subr.bf16.mxu0 %v8969_v36  ;;  %5481 = vmatprep.subr.bf16.mxu1 %v8972_v37  ;;  %v9048_v36 = vld [vmem:[#allocation14 + $0x240] ss:$16 sps:$4 sm:$0xff]   ;;  %v9053_v37 = vld [vmem:[#allocation14 + $0x64] ss:$16 sps:$4 sm:$0xff]  }
 0x7d8   :  { %5400 = vmatpush1.bf16.xpose.msra.mxu0 %v8967_v38  ;;  %5482 = vmatpush1.bf16.xpose.msra.mxu1 %v8970_v6  ;;  %v9056_v38 = vld [vmem:[#allocation14 + $0x264] ss:$16 sps:$4 sm:$0xff]   ;;  %v9051_v6 = vld [vmem:[#allocation14 + $0x60] ss:$16 sps:$4 sm:$0xff]  }
 0x7d9   :  { %5401 = vmatprep.subr.bf16.mxu0 %v8975_v39  ;;  %5483 = vmatprep.subr.bf16.mxu1 %v8978_v40  ;;  %v9054_v39 = vld [vmem:[#allocation14 + $0x260] ss:$16 sps:$4 sm:$0xff]   ;;  %v9059_v40 = vld [vmem:[#allocation14 + $0x84] ss:$16 sps:$4 sm:$0xff]  }
 0x7e0   :  { %5402 = vmatpush1.bf16.xpose.msra.mxu0 %v8973_v42  ;;  %5484 = vmatpush1.bf16.xpose.msra.mxu1 %v8976_v43  ;;  %v9062_v42 = vld [vmem:[#allocation14 + $0x284] ss:$16 sps:$4 sm:$0xff]   ;;  %v9057_v43 = vld [vmem:[#allocation14 + $0x80] ss:$16 sps:$4 sm:$0xff]  }
 0x7e1   :  { %5403 = vmatprep.subr.bf16.mxu0 %v8981_v44  ;;  %5485 = vmatprep.subr.bf16.mxu1 %v8984_v9  ;;  %v9060_v44 = vld [vmem:[#allocation14 + $0x280] ss:$16 sps:$4 sm:$0xff]   ;;  %v9065_v9 = vld [vmem:[#allocation14 + $0xa4] ss:$16 sps:$4 sm:$0xff]  }
 0x7e8   :  { %5404 = vmatpush1.bf16.xpose.msra.mxu0 %v8979_v45  ;;  %5486 = vmatpush1.bf16.xpose.msra.mxu1 %v8982_v46  ;;  %v9068_v45 = vld [vmem:[#allocation14 + $0x2a4] ss:$16 sps:$4 sm:$0xff]   ;;  %v9063_v46 = vld [vmem:[#allocation14 + $0xa0] ss:$16 sps:$4 sm:$0xff]  }
 0x7e9   :  { %5405 = vmatprep.subr.bf16.mxu0 %v8987_v47  ;;  %5487 = vmatprep.subr.bf16.mxu1 %v8990_v48  ;;  %v9066_v47 = vld [vmem:[#allocation14 + $0x2a0] ss:$16 sps:$4 sm:$0xff]   ;;  %v9071_v48 = vld [vmem:[#allocation14 + $0xc4] ss:$16 sps:$4 sm:$0xff]  }
 0x7f0   :  { %5406 = vmatpush1.bf16.xpose.msra.mxu0 %v8985_v41  ;;  %5488 = vmatpush1.bf16.xpose.msra.mxu1 %v8988_v49  ;;  %v9074_v41 = vld [vmem:[#allocation14 + $0x2c4] ss:$16 sps:$4 sm:$0xff]   ;;  %v9069_v49 = vld [vmem:[#allocation14 + $0xc0] ss:$16 sps:$4 sm:$0xff]  }
 0x7f1   :  { %5407 = vmatprep.subr.bf16.mxu0 %v8993_v50  ;;  %5489 = vmatprep.subr.bf16.mxu1 %v8996_v51  ;;  %v9072_v50 = vld [vmem:[#allocation14 + $0x2c0] ss:$16 sps:$4 sm:$0xff]   ;;  %v9077_v51 = vld [vmem:[#allocation14 + $0xe4] ss:$16 sps:$4 sm:$0xff]  }
 0x7f8   :  { %5408 = vmatpush1.bf16.xpose.msra.mxu0 %v8991_v52  ;;  %5490 = vmatpush1.bf16.xpose.msra.mxu1 %v8994_v53  ;;  %v9080_v52 = vld [vmem:[#allocation14 + $0x2e4] ss:$16 sps:$4 sm:$0xff]   ;;  %v9075_v53 = vld [vmem:[#allocation14 + $0xe0] ss:$16 sps:$4 sm:$0xff]  }
 0x7f9   :  { %5409 = vmatprep.subr.bf16.mxu0 %v8999_v54  ;;  %5491 = vmatprep.subr.bf16.mxu1 %v9002_v55  ;;  %v9078_v54 = vld [vmem:[#allocation14 + $0x2e0] ss:$16 sps:$4 sm:$0xff]   ;;  %v9083_v55 = vld [vmem:[#allocation14 + $0x104] ss:$16 sps:$4 sm:$0xff]  }
 0x800   :  { %5410 = vmatpush1.bf16.xpose.msra.mxu0 %v8997_v57  ;;  %5492 = vmatpush1.bf16.xpose.msra.mxu1 %v9000_v60  ;;  %v9086_v57 = vld [vmem:[#allocation14 + $0x304] ss:$16 sps:$4 sm:$0xff]   ;;  %v9081_v60 = vld [vmem:[#allocation14 + $0x100] ss:$16 sps:$4 sm:$0xff]  }
 0x801   :  { %5411 = vmatprep.subr.bf16.mxu0 %v9005_v58  ;;  %5493 = vmatprep.subr.bf16.mxu1 %v9008_v61  ;;  %v9084_v58 = vld [vmem:[#allocation14 + $0x300] ss:$16 sps:$4 sm:$0xff]   ;;  %v9089_v61 = vld [vmem:[#allocation14 + $0x124] ss:$16 sps:$4 sm:$0xff]  }
 0x808   :  { %5412 = vmatpush1.bf16.xpose.msra.mxu0 %v9003_v62  ;;  %5494 = vmatpush1.bf16.xpose.msra.mxu1 %v9006_v63  ;;  %v9092_v62 = vld [vmem:[#allocation14 + $0x324] ss:$16 sps:$4 sm:$0xff]   ;;  %v9087_v63 = vld [vmem:[#allocation14 + $0x120] ss:$16 sps:$4 sm:$0xff]  }
 0x809   :  { %5413 = vmatprep.subr.bf16.mxu0 %v9011_v0  ;;  %5495 = vmatprep.subr.bf16.mxu1 %v9014_v1  ;;  %v9090_v0 = vld [vmem:[#allocation14 + $0x320] ss:$16 sps:$4 sm:$0xff]   ;;  %v9095_v1 = vld [vmem:[#allocation14 + $0x144] ss:$16 sps:$4 sm:$0xff]  }
 0x810   :  { %5414 = vmatpush1.bf16.xpose.msra.mxu0 %v9009_v2  ;;  %5496 = vmatpush1.bf16.xpose.msra.mxu1 %v9012_v3  ;;  %v9098_v2 = vld [vmem:[#allocation14 + $0x344] ss:$16 sps:$4 sm:$0xff]   ;;  %v9093_v3 = vld [vmem:[#allocation14 + $0x140] ss:$16 sps:$4 sm:$0xff]  }
 0x811   :  { %5415 = vmatprep.subr.bf16.mxu0 %v9017_v4  ;;  %5497 = vmatprep.subr.bf16.mxu1 %v9020_v5  ;;  %v9096_v4 = vld [vmem:[#allocation14 + $0x340] ss:$16 sps:$4 sm:$0xff]   ;;  %v9101_v5 = vld [vmem:[#allocation14 + $0x164] ss:$16 sps:$4 sm:$0xff]  }
 0x818   :  { %5416 = vmatpush1.bf16.xpose.msra.mxu0 %v9015_v8  ;;  %5498 = vmatpush1.bf16.xpose.msra.mxu1 %v9018_v32  ;;  %v9104_v8 = vld [vmem:[#allocation14 + $0x364] ss:$16 sps:$4 sm:$0xff]   ;;  %v9099_v32 = vld [vmem:[#allocation14 + $0x160] ss:$16 sps:$4 sm:$0xff]  }
 0x819   :  { %5417 = vmatprep.subr.bf16.mxu0 %v9023_v11  ;;  %5499 = vmatprep.subr.bf16.mxu1 %v9026_v12  ;;  %v9102_v11 = vld [vmem:[#allocation14 + $0x360] ss:$16 sps:$4 sm:$0xff]   ;;  %v9107_v12 = vld [vmem:[#allocation14 + $0x184] ss:$16 sps:$4 sm:$0xff]  }
 0x820   :  { %5418 = vmatpush1.bf16.xpose.msra.mxu0 %v9021_v13  ;;  %5500 = vmatpush1.bf16.xpose.msra.mxu1 %v9024_v14  ;;  %v9110_v13 = vld [vmem:[#allocation14 + $0x384] ss:$16 sps:$4 sm:$0xff]   ;;  %v9105_v14 = vld [vmem:[#allocation14 + $0x180] ss:$16 sps:$4 sm:$0xff]  }
 0x821   :  { %5419 = vmatprep.subr.bf16.mxu0 %v9029_v16  ;;  %5501 = vmatprep.subr.bf16.mxu1 %v9032_v17  ;;  %v9113_v16 = vld [vmem:[#allocation14 + $0x1a4] ss:$16 sps:$4 sm:$0xff]  }
 0x822   :  { %v9116_v17 = vld [vmem:[#allocation14 + $0x3a4] ss:$16 sps:$4 sm:$0xff]  }
 0x828   :  { %5420 = vmatpush1.bf16.xpose.msra.mxu0 %v9027_v20  ;;  %5502 = vmatpush1.bf16.xpose.msra.mxu1 %v9030_v21  ;;  %v9114_v20 = vld [vmem:[#allocation14 + $0x3a0] ss:$16 sps:$4 sm:$0xff]   ;;  %v9119_v21 = vld [vmem:[#allocation14 + $0x1c4] ss:$16 sps:$4 sm:$0xff]  }
 0x829   :  { %6314 = vmatprep.subr.bf16.mxu0 %v9035_v23  ;;  %6396 = vmatprep.subr.bf16.mxu1 %v9038_v24  ;;  %v9117_v23 = vld [vmem:[#allocation14 + $0x1c0] ss:$16 sps:$4 sm:$0xff]  }
 0x82a   :  { %v9120_v24 = vld [vmem:[#allocation14 + $0x3c0] ss:$16 sps:$4 sm:$0xff]  }
 0x82f   :  { %5422 = vmatmul.mubr.bf16.vlgmr.msra.gmra.mrb[16].mxu0 %v4684_v29  ;;  %5504 = vmatmul.mubr.bf16.vlgmr.msra.gmra.mrb[24].mxu1 %v4684_v29  ;;  %v9126_v29 = vld [vmem:[#allocation14 + $0x3e0] ss:$16 sps:$4 sm:$0xff]  }
 0x830   :  { %6315 = vmatpush1.bf16.xpose.msra.mxu0 %v9033_v27  ;;  %6397 = vmatpush1.bf16.xpose.msra.mxu1 %v9036_v18  ;;  %v9128_v27 = vld [vmem:[#allocation14 + $0x3e4] ss:$16 sps:$4 sm:$0xff]   ;;  %v9123_v18 = vld [vmem:[#allocation14 + $0x1e0] ss:$16 sps:$4 sm:$0xff]  }
 0x831   :  { %6316 = vmatprep.subr.bf16.mxu0 %v9041_v30  ;;  %6398 = vmatprep.subr.bf16.mxu1 %v9044_v31  ;;  %v9131_v30 = vld [vmem:[#allocation14 + $0xc] ss:$16 sps:$4 sm:$0xff]  }
 0x832   :  { %v9134_v31 = vld [vmem:[#allocation14 + $0x20c] ss:$16 sps:$4 sm:$0xff]  }
 0x838   :  { %6317 = vmatpush1.bf16.xpose.msra.mxu0 %v9039_v56  ;;  %6399 = vmatpush1.bf16.xpose.msra.mxu1 %v9042_v33  ;;  %v9896_v56 = vld [vmem:[%s9956_s14] sm:$0xf] }
 0x839   :  { %6318 = vmatprep.subr.bf16.mxu0 %v9047_v34  ;;  %6400 = vmatprep.subr.bf16.mxu1 %v9050_v59  ;;  %v4691_v33 = vrot.slane %v9896_v56, %v9805_v7  ;;  %v4695_v34 = vrot.slane %v9896_v56, %v9813_v10  ;;  %v4703_v59 = vrot.slane %v9896_v56, %v9823_v28 }
 0x840   :  { %6319 = vmatpush1.bf16.xpose.msra.mxu0 %v9045_v35  ;;  %6401 = vmatpush1.bf16.xpose.msra.mxu1 %v9048_v36 }
 0x841   :  { %6320 = vmatprep.subr.bf16.mxu0 %v9053_v37  ;;  %6402 = vmatprep.subr.bf16.mxu1 %v9056_v38 }
 0x848   :  { %6321 = vmatpush1.bf16.xpose.msra.mxu0 %v9051_v6  ;;  %6403 = vmatpush1.bf16.xpose.msra.mxu1 %v9054_v39 }
 0x849   :  { %6322 = vmatprep.subr.bf16.mxu0 %v9059_v40  ;;  %6404 = vmatprep.subr.bf16.mxu1 %v9062_v42 }
 0x850   :  { %6323 = vmatpush1.bf16.xpose.msra.mxu0 %v9057_v43  ;;  %6405 = vmatpush1.bf16.xpose.msra.mxu1 %v9060_v44 }
 0x851   :  { %6324 = vmatprep.subr.bf16.mxu0 %v9065_v9  ;;  %6406 = vmatprep.subr.bf16.mxu1 %v9068_v45 }
 0x858   :  { %6325 = vmatpush1.bf16.xpose.msra.mxu0 %v9063_v46  ;;  %6407 = vmatpush1.bf16.xpose.msra.mxu1 %v9066_v47 }
 0x859   :  { %6326 = vmatprep.subr.bf16.mxu0 %v9071_v48  ;;  %6408 = vmatprep.subr.bf16.mxu1 %v9074_v41 }
 0x860   :  { %6327 = vmatpush1.bf16.xpose.msra.mxu0 %v9069_v49  ;;  %6409 = vmatpush1.bf16.xpose.msra.mxu1 %v9072_v50 }
 0x861   :  { %6328 = vmatprep.subr.bf16.mxu0 %v9077_v51  ;;  %6410 = vmatprep.subr.bf16.mxu1 %v9080_v52  ;;  %v9129_v51 = vld [vmem:[#allocation14 + $0x8] ss:$16 sps:$4 sm:$0xff]  }
 0x862   :  { %v9132_v52 = vld [vmem:[#allocation14 + $0x208] ss:$16 sps:$4 sm:$0xff]  }
 0x868   :  { %6329 = vmatpush1.bf16.xpose.msra.mxu0 %v9075_v53  ;;  %6411 = vmatpush1.bf16.xpose.msra.mxu1 %v9078_v54  ;;  %v9137_v54 = vld [vmem:[#allocation14 + $0x2c] ss:$16 sps:$4 sm:$0xff]  }
 0x869   :  { %6330 = vmatprep.subr.bf16.mxu0 %v9083_v55  ;;  %6412 = vmatprep.subr.bf16.mxu1 %v9086_v57  ;;  %v9140_v55 = vld [vmem:[#allocation14 + $0x22c] ss:$16 sps:$4 sm:$0xff]  }
 0x870   :  { %6331 = vmatpush1.bf16.xpose.msra.mxu0 %v9081_v60  ;;  %6413 = vmatpush1.bf16.xpose.msra.mxu1 %v9084_v58  ;;  %v9135_v60 = vld [vmem:[#allocation14 + $0x28] ss:$16 sps:$4 sm:$0xff]  }
 0x871   :  { %6332 = vmatprep.subr.bf16.mxu0 %v9089_v61  ;;  %6414 = vmatprep.subr.bf16.mxu1 %v9092_v62  ;;  %v9138_v58 = vld [vmem:[#allocation14 + $0x228] ss:$16 sps:$4 sm:$0xff]   ;;  %v9143_v61 = vld [vmem:[#allocation14 + $0x4c] ss:$16 sps:$4 sm:$0xff]  }
 0x872   :  { %v9146_v62 = vld [vmem:[#allocation14 + $0x24c] ss:$16 sps:$4 sm:$0xff]  }
 0x878   :  { %6333 = vmatpush1.bf16.xpose.msra.mxu0 %v9087_v63  ;;  %6415 = vmatpush1.bf16.xpose.msra.mxu1 %v9090_v0  ;;  %v9141_v63 = vld [vmem:[#allocation14 + $0x48] ss:$16 sps:$4 sm:$0xff]  }
 0x879   :  { %6334 = vmatprep.subr.bf16.mxu0 %v9095_v1  ;;  %6416 = vmatprep.subr.bf16.mxu1 %v9098_v2  ;;  %v9144_v0 = vld [vmem:[#allocation14 + $0x248] ss:$16 sps:$4 sm:$0xff]   ;;  %v9149_v1 = vld [vmem:[#allocation14 + $0x6c] ss:$16 sps:$4 sm:$0xff]  }
 0x87a   :  { %v9152_v2 = vld [vmem:[#allocation14 + $0x26c] ss:$16 sps:$4 sm:$0xff]  }
 0x880   :  { %6335 = vmatpush1.bf16.xpose.msra.mxu0 %v9093_v3  ;;  %6417 = vmatpush1.bf16.xpose.msra.mxu1 %v9096_v4  ;;  %v9147_v3 = vld [vmem:[#allocation14 + $0x68] ss:$16 sps:$4 sm:$0xff]  }
 0x881   :  { %6336 = vmatprep.subr.bf16.mxu0 %v9101_v5  ;;  %6418 = vmatprep.subr.bf16.mxu1 %v9104_v8  ;;  %v9150_v4 = vld [vmem:[#allocation14 + $0x268] ss:$16 sps:$4 sm:$0xff]   ;;  %v9155_v5 = vld [vmem:[#allocation14 + $0x8c] ss:$16 sps:$4 sm:$0xff]  }
 0x882   :  { %v9158_v8 = vld [vmem:[#allocation14 + $0x28c] ss:$16 sps:$4 sm:$0xff]  }
 0x888   :  { %6337 = vmatpush1.bf16.xpose.msra.mxu0 %v9099_v32  ;;  %6419 = vmatpush1.bf16.xpose.msra.mxu1 %v9102_v11  ;;  %v9153_v32 = vld [vmem:[#allocation14 + $0x88] ss:$16 sps:$4 sm:$0xff]  }
 0x889   :  { %6338 = vmatprep.subr.bf16.mxu0 %v9107_v12  ;;  %6420 = vmatprep.subr.bf16.mxu1 %v9110_v13  ;;  %v9156_v11 = vld [vmem:[#allocation14 + $0x288] ss:$16 sps:$4 sm:$0xff]   ;;  %v9161_v12 = vld [vmem:[#allocation14 + $0xac] ss:$16 sps:$4 sm:$0xff]  }
 0x88a   :  { %v9164_v13 = vld [vmem:[#allocation14 + $0x2ac] ss:$16 sps:$4 sm:$0xff]  }
 0x890   :  { %6339 = vmatpush1.bf16.xpose.msra.mxu0 %v9105_v14  ;;  %6421 = vmatpush1.bf16.xpose.msra.mxu1 %v9108_v15  ;;  %v9159_v14 = vld [vmem:[#allocation14 + $0xa8] ss:$16 sps:$4 sm:$0xff]  }
 0x891   :  { %6340 = vmatprep.subr.bf16.mxu0 %v9113_v16  ;;  %6422 = vmatprep.subr.bf16.mxu1 %v9116_v17  ;;  %v9162_v15 = vld [vmem:[#allocation14 + $0x2a8] ss:$16 sps:$4 sm:$0xff]   ;;  %v9167_v16 = vld [vmem:[#allocation14 + $0xcc] ss:$16 sps:$4 sm:$0xff]  }
 0x892   :  { %v9170_v17 = vld [vmem:[#allocation14 + $0x2cc] ss:$16 sps:$4 sm:$0xff]  }
 0x898   :  { %6341 = vmatpush1.bf16.xpose.msra.mxu0 %v9111_v19  ;;  %6423 = vmatpush1.bf16.xpose.msra.mxu1 %v9114_v20  ;;  %v9165_v19 = vld [vmem:[#allocation14 + $0xc8] ss:$16 sps:$4 sm:$0xff]  }
 0x899   :  { %6342 = vmatprep.subr.bf16.mxu0 %v9119_v21  ;;  %6424 = vmatprep.subr.bf16.mxu1 %v9122_v22  ;;  %v9168_v20 = vld [vmem:[#allocation14 + $0x2c8] ss:$16 sps:$4 sm:$0xff]   ;;  %v9173_v21 = vld [vmem:[#allocation14 + $0xec] ss:$16 sps:$4 sm:$0xff]  }
 0x89a   :  { %v9176_v22 = vld [vmem:[#allocation14 + $0x2ec] ss:$16 sps:$4 sm:$0xff]  }
 0x8a0   :  { %6343 = vmatpush1.bf16.xpose.msra.mxu0 %v9117_v23  ;;  %6425 = vmatpush1.bf16.xpose.msra.mxu1 %v9120_v24  ;;  %v9171_v23 = vld [vmem:[#allocation14 + $0xe8] ss:$16 sps:$4 sm:$0xff]  }
 0x8a1   :  { %6344 = vmatprep.subr.bf16.mxu0 %v9125_v26  ;;  %6426 = vmatprep.subr.bf16.mxu1 %v9128_v27  ;;  %v9174_v24 = vld [vmem:[#allocation14 + $0x2e8] ss:$16 sps:$4 sm:$0xff]   ;;  %v9179_v26 = vld [vmem:[#allocation14 + $0x10c] ss:$16 sps:$4 sm:$0xff]  }
 0x8a2   :  { %v9182_v27 = vld [vmem:[#allocation14 + $0x30c] ss:$16 sps:$4 sm:$0xff]  }
 0x8a8   :  { %6345 = vmatpush1.bf16.xpose.msra.mxu0 %v9123_v18  ;;  %6427 = vmatpush1.bf16.xpose.msra.mxu1 %v9126_v29  ;;  %v9177_v18 = vld [vmem:[#allocation14 + $0x108] ss:$16 sps:$4 sm:$0xff]  }
 0x8a9   :  { %6355 = vmatprep.subr.bf16.mxu0 %v9131_v30  ;;  %6437 = vmatprep.subr.bf16.mxu1 %v9134_v31  ;;  %v9180_v29 = vld [vmem:[#allocation14 + $0x308] ss:$16 sps:$4 sm:$0xff]   ;;  %v9185_v30 = vld [vmem:[#allocation14 + $0x12c] ss:$16 sps:$4 sm:$0xff]  }
 0x8aa   :  { %v9188_v31 = vld [vmem:[#allocation14 + $0x32c] ss:$16 sps:$4 sm:$0xff]  }
 0x902   :  { %v5423_v35 = vpop.f32.mrb[16].mxu0  ;;  %v9904_v36 = vpop.f32.mrb[24].mxu1 }
 0x903   :  { %v7901_v37 = vadd.f32 %v5423_v35, %v4691_v33  ;;  %v5425_v38 = vpop.f32.mrb[17].mxu0  ;;  %v5507_v6 = vpop.f32.mrb[25].mxu1  ;;  %v9183_v33 = vld [vmem:[#allocation14 + $0x128] ss:$16 sps:$4 sm:$0xff]   ;;  %v9194_v35 = vld [vmem:[#allocation14 + $0x34c] ss:$16 sps:$4 sm:$0xff]  }
 0x904   :  { %v7902_v39 = vadd.f32 %v5425_v38, %v4695_v34  ;;  %v7904_v40 = vadd.f32 %v5507_v6, %v4703_v59  ;;  %v5427_v42 = vpop.f32.mrb[18].mxu0  ;;  %v5509_v43 = vpop.f32.mrb[26].mxu1  ;;  %v9186_v34 = vld [vmem:[#allocation14 + $0x328] ss:$16 sps:$4 sm:$0xff]   ;;  %v9191_v59 = vld [vmem:[#allocation14 + $0x14c] ss:$16 sps:$4 sm:$0xff]  }
 0x905   :  { %v5512_v44 = vmax.f32 %v7901_v37, 0.0  ;;  %v5428_v9 = vpop.f32.mrb[19].mxu0  ;;  %v5510_v45 = vpop.f32.mrb[27].mxu1  ;;  %v9189_v37 = vld [vmem:[#allocation14 + $0x148] ss:$16 sps:$4 sm:$0xff]  }
 0x906   :  { %v5513_v46 = vmax.f32 %v7902_v39, 0.0  ;;  %v5515_v47 = vmax.f32 %v7904_v40, 0.0  ;;  %v9192_v38 = vld [vmem:[#allocation14 + $0x348] ss:$16 sps:$4 sm:$0xff]   ;;  %v9197_v6 = vld [vmem:[#allocation14 + $0x16c] ss:$16 sps:$4 sm:$0xff]  }
 0x907   :  { %v5644_v48 = vmul.f32 0.044194173, %v5512_v44  ;;  %v9200_v39 = vld [vmem:[#allocation14 + $0x36c] ss:$16 sps:$4 sm:$0xff]   ;;  %v9195_v40 = vld [vmem:[#allocation14 + $0x168] ss:$16 sps:$4 sm:$0xff]  }
 0x908   :  { %v5645_v41 = vmul.f32 0.044194173, %v5513_v46  ;;  %v5647_v49 = vmul.f32 0.044194173, %v5515_v47  ;;  %v9198_v42 = vld [vmem:[#allocation14 + $0x368] ss:$16 sps:$4 sm:$0xff]  }
 0x909   :  { %v5648_v53 = vpack.c.bf16 %v5644_v48, %v5644_v48  ;;  %v9203_v43 = vld [vmem:[#allocation14 + $0x18c] ss:$16 sps:$4 sm:$0xff]   ;;  %v9201_v9 = vld [vmem:[#allocation14 + $0x188] ss:$16 sps:$4 sm:$0xff]  }
 0x90a   :  { %v5649_v50 = vpack.c.bf16 %v5645_v41, %v5645_v41  ;;  %v5651_v57 = vpack.c.bf16 %v5647_v49, %v5647_v49  ;;  %v9206_v44 = vld [vmem:[#allocation14 + $0x38c] ss:$16 sps:$4 sm:$0xff]   ;;  %v9204_v45 = vld [vmem:[#allocation14 + $0x388] ss:$16 sps:$4 sm:$0xff]  }
 0x90b   :  { %v9209_v46 = vld [vmem:[#allocation14 + $0x1ac] ss:$16 sps:$4 sm:$0xff]   ;;  %v9207_v48 = vld [vmem:[#allocation14 + $0x1a8] ss:$16 sps:$4 sm:$0xff]  }
 0x90c   :  { %6346 = vmatprep.mubr.bf16.mxu0 %v5649_v50  ;;  %6428 = vmatprep.mubr.bf16.mxu1 %v5649_v50  ;;  %v9212_v47 = vld [vmem:[#allocation14 + $0x3ac] ss:$16 sps:$4 sm:$0xff]   ;;  %v9210_v41 = vld [vmem:[#allocation14 + $0x3a8] ss:$16 sps:$4 sm:$0xff]  }
 0x90d   :  { %6347 = vmatmul.mubr.bf16.vlgmr.msra.gmra.mrb[20].mxu0 %v5648_v53  ;;  %6429 = vmatmul.mubr.bf16.vlgmr.msra.gmra.mrb[28].mxu1 %v5648_v53  ;;  %v9215_v49 = vld [vmem:[#allocation14 + $0x1cc] ss:$16 sps:$4 sm:$0xff]   ;;  %v4699_v53 = vrot.slane %v9896_v56, %v9820_v25  ;;  %v9228_v56 = vld [vmem:[#allocation16 + $0x20] ss:$16 sps:$4 sm:$0xff]  }
 0x90e   :  { %6356 = vmatpush1.bf16.xpose.msra.mxu0 %v9129_v51  ;;  %6438 = vmatpush1.bf16.xpose.msra.mxu1 %v9132_v52  ;;  %v9218_v50 = vld [vmem:[#allocation14 + $0x3cc] ss:$16 sps:$4 sm:$0xff]   ;;  %v9213_v51 = vld [vmem:[#allocation14 + $0x1c8] ss:$16 sps:$4 sm:$0xff]  }
 0x90f   :  { %6387 = vmatprep.mubr.bf16.mxu0 %v5651_v57  ;;  %6469 = vmatprep.mubr.bf16.mxu1 %v5651_v57  ;;  %v9216_v52 = vld [vmem:[#allocation14 + $0x3c8] ss:$16 sps:$4 sm:$0xff]   ;;  %v7903_v57 = vadd.f32 %v9904_v36, %v4699_v53  ;;  %v9231_v36 = vld [vmem:[#allocation16 + $0x40] ss:$16 sps:$4 sm:$0xff]  }
 0x910   :  { %6357 = vmatprep.subr.bf16.mxu0 %v9137_v54  ;;  %6439 = vmatprep.subr.bf16.mxu1 %v9140_v55  ;;  %v9221_v54 = vld [vmem:[#allocation14 + $0x1ec] ss:$16 sps:$4 sm:$0xff]  }
 0x911   :  { %v9224_v55 = vld [vmem:[#allocation14 + $0x3ec] ss:$16 sps:$4 sm:$0xff]  }
 0x916   :  { %6358 = vmatpush1.bf16.xpose.msra.mxu0 %v9135_v60  ;;  %6440 = vmatpush1.bf16.xpose.msra.mxu1 %v9138_v58  ;;  %v9219_v60 = vld [vmem:[#allocation14 + $0x1e8] ss:$16 sps:$4 sm:$0xff]  }
 0x917   :  { %6359 = vmatprep.subr.bf16.mxu0 %v9143_v61  ;;  %6441 = vmatprep.subr.bf16.mxu1 %v9146_v62  ;;  %v9222_v58 = vld [vmem:[#allocation14 + $0x3e8] ss:$16 sps:$4 sm:$0xff]   ;;  %v5514_v61 = vmax.f32 %v7903_v57, 0.0  ;;  %v9227_v62 = vld [vmem:[#allocation16 + $0x4] ss:$16 sps:$4 sm:$0xff]  }
 0x91e   :  { %6360 = vmatpush1.bf16.xpose.msra.mxu0 %v9141_v63  ;;  %6442 = vmatpush1.bf16.xpose.msra.mxu1 %v9144_v0  ;;  %v5646_v63 = vmul.f32 0.044194173, %v5514_v61  ;;  %v9225_v0 = vld [vmem:[#allocation16] ss:$16 sps:$4 sm:$0xff]  }
 0x91f   :  { %6361 = vmatprep.subr.bf16.mxu0 %v9149_v1  ;;  %6443 = vmatprep.subr.bf16.mxu1 %v9152_v2  ;;  %v9230_v2 = vld [vmem:[#allocation16 + $0x24] ss:$16 sps:$4 sm:$0xff]  }
 0x920   :  { %v5650_v1 = vpack.c.bf16 %v5646_v63, %v5646_v63  ;;  %v9281_v63 = vld [vmem:[#allocation16 + $0x4c] ss:$16 sps:$4 sm:$0xff]  }
 0x926   :  { %6362 = vmatpush1.bf16.xpose.msra.mxu0 %v9147_v3  ;;  %6444 = vmatpush1.bf16.xpose.msra.mxu1 %v9150_v4  ;;  %v9233_v3 = vld [vmem:[#allocation16 + $0x44] ss:$16 sps:$4 sm:$0xff]  }
 0x927   :  { %6363 = vmatprep.subr.bf16.mxu0 %v9155_v5  ;;  %6445 = vmatprep.subr.bf16.mxu1 %v9158_v8  ;;  %v9236_v4 = vld [vmem:[#allocation16 + $0x64] ss:$16 sps:$4 sm:$0xff]   ;;  %v9234_v5 = vld [vmem:[#allocation16 + $0x60] ss:$16 sps:$4 sm:$0xff]  }
 0x928   :  { %v9239_v8 = vld [vmem:[#allocation16 + $0x84] ss:$16 sps:$4 sm:$0xff]  }
 0x92e   :  { %6364 = vmatpush1.bf16.xpose.msra.mxu0 %v9153_v32  ;;  %6446 = vmatpush1.bf16.xpose.msra.mxu1 %v9156_v11  ;;  %v9237_v32 = vld [vmem:[#allocation16 + $0x80] ss:$16 sps:$4 sm:$0xff]   ;;  %v9242_v11 = vld [vmem:[#allocation16 + $0xa4] ss:$16 sps:$4 sm:$0xff]  }
 0x92f   :  { %6365 = vmatprep.subr.bf16.mxu0 %v9161_v12  ;;  %6447 = vmatprep.subr.bf16.mxu1 %v9164_v13  ;;  %v9240_v12 = vld [vmem:[#allocation16 + $0xa0] ss:$16 sps:$4 sm:$0xff]   ;;  %v9245_v13 = vld [vmem:[#allocation16 + $0xc4] ss:$16 sps:$4 sm:$0xff]  }
 0x936   :  { %6366 = vmatpush1.bf16.xpose.msra.mxu0 %v9159_v14  ;;  %6448 = vmatpush1.bf16.xpose.msra.mxu1 %v9162_v15  ;;  %v9243_v14 = vld [vmem:[#allocation16 + $0xc0] ss:$16 sps:$4 sm:$0xff]   ;;  %v9248_v15 = vld [vmem:[#allocation16 + $0xe4] ss:$16 sps:$4 sm:$0xff]  }
 0x937   :  { %6367 = vmatprep.subr.bf16.mxu0 %v9167_v16  ;;  %6449 = vmatprep.subr.bf16.mxu1 %v9170_v17  ;;  %v9246_v16 = vld [vmem:[#allocation16 + $0xe0] ss:$16 sps:$4 sm:$0xff]   ;;  %v9251_v17 = vld [vmem:[#allocation16 + $0x104] ss:$16 sps:$4 sm:$0xff]  }
 0x93e   :  { %6368 = vmatpush1.bf16.xpose.msra.mxu0 %v9165_v19  ;;  %6450 = vmatpush1.bf16.xpose.msra.mxu1 %v9168_v20  ;;  %v9249_v19 = vld [vmem:[#allocation16 + $0x100] ss:$16 sps:$4 sm:$0xff]   ;;  %v9254_v20 = vld [vmem:[#allocation16 + $0x124] ss:$16 sps:$4 sm:$0xff]  }
 0x93f   :  { %6369 = vmatprep.subr.bf16.mxu0 %v9173_v21  ;;  %6451 = vmatprep.subr.bf16.mxu1 %v9176_v22  ;;  %v9252_v21 = vld [vmem:[#allocation16 + $0x120] ss:$16 sps:$4 sm:$0xff]   ;;  %v9257_v22 = vld [vmem:[#allocation16 + $0x144] ss:$16 sps:$4 sm:$0xff]  }
 0x946   :  { %6370 = vmatpush1.bf16.xpose.msra.mxu0 %v9171_v23  ;;  %6452 = vmatpush1.bf16.xpose.msra.mxu1 %v9174_v24  ;;  %v9255_v23 = vld [vmem:[#allocation16 + $0x140] ss:$16 sps:$4 sm:$0xff]   ;;  %v9260_v24 = vld [vmem:[#allocation16 + $0x164] ss:$16 sps:$4 sm:$0xff]  }
 0x947   :  { %6371 = vmatprep.subr.bf16.mxu0 %v9179_v26  ;;  %6453 = vmatprep.subr.bf16.mxu1 %v9182_v27  ;;  %v9258_v26 = vld [vmem:[#allocation16 + $0x160] ss:$16 sps:$4 sm:$0xff]   ;;  %v9263_v27 = vld [vmem:[#allocation16 + $0x184] ss:$16 sps:$4 sm:$0xff]  }
 0x94e   :  { %6372 = vmatpush1.bf16.xpose.msra.mxu0 %v9177_v18  ;;  %6454 = vmatpush1.bf16.xpose.msra.mxu1 %v9180_v29  ;;  %v9261_v18 = vld [vmem:[#allocation16 + $0x180] ss:$16 sps:$4 sm:$0xff]   ;;  %v9266_v29 = vld [vmem:[#allocation16 + $0x1a4] ss:$16 sps:$4 sm:$0xff]  }
 0x94f   :  { %6373 = vmatprep.subr.bf16.mxu0 %v9185_v30  ;;  %6455 = vmatprep.subr.bf16.mxu1 %v9188_v31  ;;  %v9264_v30 = vld [vmem:[#allocation16 + $0x1a0] ss:$16 sps:$4 sm:$0xff]   ;;  %v9269_v31 = vld [vmem:[#allocation16 + $0x1c4] ss:$16 sps:$4 sm:$0xff]  }
 0x956   :  { %6374 = vmatpush1.bf16.xpose.msra.mxu0 %v9183_v33  ;;  %6456 = vmatpush1.bf16.xpose.msra.mxu1 %v9186_v34  ;;  %v9267_v33 = vld [vmem:[#allocation16 + $0x1c0] ss:$16 sps:$4 sm:$0xff]   ;;  %v9272_v34 = vld [vmem:[#allocation16 + $0x1e4] ss:$16 sps:$4 sm:$0xff]  }
 0x957   :  { %6375 = vmatprep.subr.bf16.mxu0 %v9191_v59  ;;  %6457 = vmatprep.subr.bf16.mxu1 %v9194_v35  ;;  %v9270_v59 = vld [vmem:[#allocation16 + $0x1e0] ss:$16 sps:$4 sm:$0xff]   ;;  %v9275_v35 = vld [vmem:[#allocation16 + $0xc] ss:$16 sps:$4 sm:$0xff]  }
 0x95e   :  { %6376 = vmatpush1.bf16.xpose.msra.mxu0 %v9189_v37  ;;  %6458 = vmatpush1.bf16.xpose.msra.mxu1 %v9192_v38  ;;  %v9912_v37 = vld [vmem:[%s9957_s15] sm:$0xf] }
 0x95f   :  { %6377 = vmatprep.subr.bf16.mxu0 %v9197_v6  ;;  %6459 = vmatprep.subr.bf16.mxu1 %v9200_v39  ;;  %v5657_v38 = vrot.slane %v9912_v37, %v9805_v7  ;;  %v5661_v6 = vrot.slane %v9912_v37, %v9813_v10  ;;  %v5669_v39 = vrot.slane %v9912_v37, %v9823_v28  ;;  %v9273_v28 = vld [vmem:[#allocation16 + $0x8] ss:$16 sps:$4 sm:$0xff]  }
 0x966   :  { %6378 = vmatpush1.bf16.xpose.msra.mxu0 %v9195_v40  ;;  %6460 = vmatpush1.bf16.xpose.msra.mxu1 %v9198_v42 }
 0x967   :  { %6379 = vmatprep.subr.bf16.mxu0 %v9203_v43  ;;  %6461 = vmatprep.subr.bf16.mxu1 %v9206_v44 }
 0x96e   :  { %6380 = vmatpush1.bf16.xpose.msra.mxu0 %v9201_v9  ;;  %6462 = vmatpush1.bf16.xpose.msra.mxu1 %v9204_v45 }
 0x96f   :  { %6381 = vmatprep.subr.bf16.mxu0 %v9209_v46  ;;  %6463 = vmatprep.subr.bf16.mxu1 %v9212_v47 }
 0x976   :  { %6382 = vmatpush1.bf16.xpose.msra.mxu0 %v9207_v48  ;;  %6464 = vmatpush1.bf16.xpose.msra.mxu1 %v9210_v41 }
 0x977   :  { %6383 = vmatprep.subr.bf16.mxu0 %v9215_v49  ;;  %6465 = vmatprep.subr.bf16.mxu1 %v9218_v50 }
 0x97e   :  { %6384 = vmatpush1.bf16.xpose.msra.mxu0 %v9213_v51  ;;  %6466 = vmatpush1.bf16.xpose.msra.mxu1 %v9216_v52 }
 0x97f   :  { %6385 = vmatprep.subr.bf16.mxu0 %v9221_v54  ;;  %6467 = vmatprep.subr.bf16.mxu1 %v9224_v55 }
 0x986   :  { %6386 = vmatpush1.bf16.xpose.msra.mxu0 %v9219_v60  ;;  %6468 = vmatpush1.bf16.xpose.msra.mxu1 %v9222_v58  ;;  %v9278_v58 = vld [vmem:[#allocation16 + $0x2c] ss:$16 sps:$4 sm:$0xff]  }
 0x987   :  { %6886 = vmatprep.subr.bf16.mxu0 %v9227_v62  ;;  %v9276_v62 = vld [vmem:[#allocation16 + $0x28] ss:$16 sps:$4 sm:$0xff]  }
 0x98d   :  { %6388 = vmatmul.mubr.bf16.vlgmr.msra.gmra.mrb[20].mxu0 %v5650_v1  ;;  %6470 = vmatmul.mubr.bf16.vlgmr.msra.gmra.mrb[28].mxu1 %v5650_v1  ;;  %v9284_v1 = vld [vmem:[#allocation16 + $0x6c] ss:$16 sps:$4 sm:$0xff]  }
 0x98e   :  { %6887 = vmatpush1.bf16.xpose.msra.mxu0 %v9225_v0  ;;  %v9279_v0 = vld [vmem:[#allocation16 + $0x48] ss:$16 sps:$4 sm:$0xff]  }
 0x98f   :  { %6888 = vmatprep.subr.bf16.mxu0 %v9230_v2  ;;  %v9282_v2 = vld [vmem:[#allocation16 + $0x68] ss:$16 sps:$4 sm:$0xff]  }
 0x996   :  { %6889 = vmatpush1.bf16.xpose.msra.mxu0 %v9228_v56  ;;  %v9287_v56 = vld [vmem:[#allocation16 + $0x8c] ss:$16 sps:$4 sm:$0xff]  }
 0x997   :  { %6890 = vmatprep.subr.bf16.mxu0 %v9233_v3  ;;  %v9285_v3 = vld [vmem:[#allocation16 + $0x88] ss:$16 sps:$4 sm:$0xff]  }
 0x99e   :  { %6891 = vmatpush1.bf16.xpose.msra.mxu0 %v9231_v36  ;;  %v9290_v36 = vld [vmem:[#allocation16 + $0xac] ss:$16 sps:$4 sm:$0xff]  }
 0x99f   :  { %6892 = vmatprep.subr.bf16.mxu0 %v9236_v4  ;;  %v9288_v4 = vld [vmem:[#allocation16 + $0xa8] ss:$16 sps:$4 sm:$0xff]  }
 0x9a6   :  { %6893 = vmatpush1.bf16.xpose.msra.mxu0 %v9234_v5  ;;  %v9293_v5 = vld [vmem:[#allocation16 + $0xcc] ss:$16 sps:$4 sm:$0xff]  }
 0x9a7   :  { %6894 = vmatprep.subr.bf16.mxu0 %v9239_v8  ;;  %v9291_v8 = vld [vmem:[#allocation16 + $0xc8] ss:$16 sps:$4 sm:$0xff]  }
 0x9ae   :  { %6895 = vmatpush1.bf16.xpose.msra.mxu0 %v9237_v32  ;;  %v9296_v32 = vld [vmem:[#allocation16 + $0xec] ss:$16 sps:$4 sm:$0xff]  }
 0x9af   :  { %6896 = vmatprep.subr.bf16.mxu0 %v9242_v11  ;;  %v9294_v11 = vld [vmem:[#allocation16 + $0xe8] ss:$16 sps:$4 sm:$0xff]  }
 0x9b6   :  { %6897 = vmatpush1.bf16.xpose.msra.mxu0 %v9240_v12  ;;  %v9299_v12 = vld [vmem:[#allocation16 + $0x10c] ss:$16 sps:$4 sm:$0xff]  }
 0x9b7   :  { %6898 = vmatprep.subr.bf16.mxu0 %v9245_v13  ;;  %v9297_v13 = vld [vmem:[#allocation16 + $0x108] ss:$16 sps:$4 sm:$0xff]  }
 0x9be   :  { %6899 = vmatpush1.bf16.xpose.msra.mxu0 %v9243_v14  ;;  %v9302_v14 = vld [vmem:[#allocation16 + $0x12c] ss:$16 sps:$4 sm:$0xff]  }
 0x9bf   :  { %6900 = vmatprep.subr.bf16.mxu0 %v9248_v15  ;;  %v9300_v15 = vld [vmem:[#allocation16 + $0x128] ss:$16 sps:$4 sm:$0xff]  }
 0x9c6   :  { %6901 = vmatpush1.bf16.xpose.msra.mxu0 %v9246_v16  ;;  %v9305_v16 = vld [vmem:[#allocation16 + $0x14c] ss:$16 sps:$4 sm:$0xff]  }
 0x9c7   :  { %6902 = vmatprep.subr.bf16.mxu0 %v9251_v17  ;;  %v9303_v17 = vld [vmem:[#allocation16 + $0x148] ss:$16 sps:$4 sm:$0xff]  }
 0x9ce   :  { %6903 = vmatpush1.bf16.xpose.msra.mxu0 %v9249_v19  ;;  %v9308_v19 = vld [vmem:[#allocation16 + $0x16c] ss:$16 sps:$4 sm:$0xff]  }
 0x9cf   :  { %6904 = vmatprep.subr.bf16.mxu0 %v9254_v20  ;;  %v9306_v20 = vld [vmem:[#allocation16 + $0x168] ss:$16 sps:$4 sm:$0xff]  }
 0x9d6   :  { %6905 = vmatpush1.bf16.xpose.msra.mxu0 %v9252_v21  ;;  %v9311_v21 = vld [vmem:[#allocation16 + $0x18c] ss:$16 sps:$4 sm:$0xff]  }
 0x9d7   :  { %6906 = vmatprep.subr.bf16.mxu0 %v9257_v22  ;;  %v9309_v22 = vld [vmem:[#allocation16 + $0x188] ss:$16 sps:$4 sm:$0xff]  }
 0x9de   :  { %6907 = vmatpush1.bf16.xpose.msra.mxu0 %v9255_v23  ;;  %v9314_v23 = vld [vmem:[#allocation16 + $0x1ac] ss:$16 sps:$4 sm:$0xff]  }
 0x9df   :  { %6908 = vmatprep.subr.bf16.mxu0 %v9260_v24  ;;  %v9312_v24 = vld [vmem:[#allocation16 + $0x1a8] ss:$16 sps:$4 sm:$0xff]  }
 0x9e6   :  { %6909 = vmatpush1.bf16.xpose.msra.mxu0 %v9258_v26  ;;  %v9317_v26 = vld [vmem:[#allocation16 + $0x1cc] ss:$16 sps:$4 sm:$0xff]  }
 0x9e7   :  { %6910 = vmatprep.subr.bf16.mxu0 %v9263_v27  ;;  %v9315_v27 = vld [vmem:[#allocation16 + $0x1c8] ss:$16 sps:$4 sm:$0xff]  }
 0x9ee   :  { %6911 = vmatpush1.bf16.xpose.msra.mxu0 %v9261_v18  ;;  %v5665_v18 = vrot.slane %v9912_v37, %v9820_v25 }
 0x9ef   :  { %6912 = vmatprep.subr.bf16.mxu0 %v9266_v29  ;;  %v9320_v29 = vld [vmem:[#allocation16 + $0x1ec] ss:$16 sps:$4 sm:$0xff]  }
 0x9f6   :  { %6913 = vmatpush1.bf16.xpose.msra.mxu0 %v9264_v30 }
 0x9f7   :  { %6914 = vmatprep.subr.bf16.mxu0 %v9269_v31  ;;  %v9318_v31 = vld [vmem:[#allocation16 + $0x1e8] ss:$16 sps:$4 sm:$0xff]  }
 0x9fe   :  { %6915 = vmatpush1.bf16.xpose.msra.mxu0 %v9267_v33 }
 0x9ff   :  { %6916 = vmatprep.subr.bf16.mxu0 %v9272_v34 }
 0xa06   :  { %6917 = vmatpush1.bf16.xpose.msra.mxu0 %v9270_v59 }
 0xa07   :  { %6927 = vmatprep.subr.bf16.mxu0 %v9275_v35  ;;  %v6554_v35 = vld [vmem:[%s9969_s23] sm:$0x3] }
 0xa60   :  { %v6389_v40 = vpop.f32.mrb[20].mxu0  ;;  %v9920_v42 = vpop.f32.mrb[28].mxu1 }
 0xa61   :  { %v7905_v43 = vadd.f32 %v6389_v40, %v5657_v38  ;;  %v6391_v44 = vpop.f32.mrb[21].mxu0  ;;  %v6473_v9 = vpop.f32.mrb[29].mxu1  ;;  %v7907_v30 = vadd.f32 %v9920_v42, %v5665_v18  ;;  %v6559_v38 = vrot.slane %v6554_v35, %v9805_v7 }
 0xa62   :  { %v7906_v45 = vadd.f32 %v6391_v44, %v5661_v6  ;;  %v7908_v46 = vadd.f32 %v6473_v9, %v5669_v39  ;;  %v6393_v47 = vpop.f32.mrb[22].mxu0  ;;  %v6475_v48 = vpop.f32.mrb[30].mxu1  ;;  %v6563_v6 = vrot.slane %v6554_v35, %v9813_v10 }
 0xa63   :  { %v6478_v41 = vmax.f32 %v7905_v43, 0.0  ;;  %v6394_v49 = vpop.f32.mrb[23].mxu0  ;;  %v6476_v50 = vpop.f32.mrb[31].mxu1  ;;  %v6480_v33 = vmax.f32 %v7907_v30, 0.0 }
 0xa64   :  { %v6479_v51 = vmax.f32 %v7906_v45, 0.0  ;;  %v6481_v52 = vmax.f32 %v7908_v46, 0.0 }
 0xa65   :  { %v6546_v53 = vmul.f32 0.044194173, %v6478_v41  ;;  %v6548_v34 = vmul.f32 0.044194173, %v6480_v33 }
 0xa66   :  { %v6547_v54 = vmul.f32 0.044194173, %v6479_v51  ;;  %v6549_v55 = vmul.f32 0.044194173, %v6481_v52 }
 0xa67   :  { %v6550_v60 = vpack.c.bf16 %v6546_v53, %v6546_v53  ;;  %v6552_v59 = vpack.c.bf16 %v6548_v34, %v6548_v34 }
 0xa68   :  { %v6551_v57 = vpack.c.bf16 %v6547_v54, %v6547_v54  ;;  %v6553_v61 = vpack.c.bf16 %v6549_v55, %v6549_v55 }
 0xa6a   :  { %6918 = vmatprep.mubr.bf16.mxu0 %v6551_v57 }
 0xa6b   :  { %6919 = vmatmul.mubr.bf16.vlgmr.msra.gmra.mrb[24].mxu0 %v6550_v60 }
 0xa6c   :  { %6928 = vmatpush1.bf16.xpose.msra.mxu0 %v9273_v28  ;;  %6959 = vmatprep.mubr.bf16.mxu0 %v6553_v61 }
 0xa6d   :  { %6929 = vmatprep.subr.bf16.mxu0 %v9278_v58 }
 0xa74   :  { %6930 = vmatpush1.bf16.xpose.msra.mxu0 %v9276_v62 }
 0xa75   :  { %6931 = vmatprep.subr.bf16.mxu0 %v9281_v63 }
 0xa7c   :  { %6932 = vmatpush1.bf16.xpose.msra.mxu0 %v9279_v0 }
 0xa7d   :  { %6933 = vmatprep.subr.bf16.mxu0 %v9284_v1 }
 0xa84   :  { %6934 = vmatpush1.bf16.xpose.msra.mxu0 %v9282_v2 }
 0xa85   :  { %6935 = vmatprep.subr.bf16.mxu0 %v9287_v56 }
 0xa8c   :  { %6936 = vmatpush1.bf16.xpose.msra.mxu0 %v9285_v3 }
 0xa8d   :  { %6937 = vmatprep.subr.bf16.mxu0 %v9290_v36 }
 0xa94   :  { %6938 = vmatpush1.bf16.xpose.msra.mxu0 %v9288_v4 }
 0xa95   :  { %6939 = vmatprep.subr.bf16.mxu0 %v9293_v5 }
 0xa9c   :  { %6940 = vmatpush1.bf16.xpose.msra.mxu0 %v9291_v8 }
 0xa9d   :  { %6941 = vmatprep.subr.bf16.mxu0 %v9296_v32 }
 0xaa4   :  { %6942 = vmatpush1.bf16.xpose.msra.mxu0 %v9294_v11 }
 0xaa5   :  { %6943 = vmatprep.subr.bf16.mxu0 %v9299_v12 }
 0xaac   :  { %6944 = vmatpush1.bf16.xpose.msra.mxu0 %v9297_v13 }
 0xaad   :  { %6945 = vmatprep.subr.bf16.mxu0 %v9302_v14 }
 0xab4   :  { %6946 = vmatpush1.bf16.xpose.msra.mxu0 %v9300_v15 }
 0xab5   :  { %6947 = vmatprep.subr.bf16.mxu0 %v9305_v16 }
 0xabc   :  { %6948 = vmatpush1.bf16.xpose.msra.mxu0 %v9303_v17 }
 0xabd   :  { %6949 = vmatprep.subr.bf16.mxu0 %v9308_v19 }
 0xac4   :  { %6950 = vmatpush1.bf16.xpose.msra.mxu0 %v9306_v20 }
 0xac5   :  { %6951 = vmatprep.subr.bf16.mxu0 %v9311_v21 }
 0xacc   :  { %6952 = vmatpush1.bf16.xpose.msra.mxu0 %v9309_v22 }
 0xacd   :  { %6953 = vmatprep.subr.bf16.mxu0 %v9314_v23 }
 0xad4   :  { %6954 = vmatpush1.bf16.xpose.msra.mxu0 %v9312_v24 }
 0xad5   :  { %6955 = vmatprep.subr.bf16.mxu0 %v9317_v26 }
 0xadc   :  { %6956 = vmatpush1.bf16.xpose.msra.mxu0 %v9315_v27 }
 0xadd   :  { %6957 = vmatprep.subr.bf16.mxu0 %v9320_v29 }
 0xae4   :  { %6958 = vmatpush1.bf16.xpose.msra.mxu0 %v9318_v31 }
 0xaeb   :  { %6960 = vmatmul.mubr.bf16.vlgmr.msra.gmra.mrb[24].mxu0 %v6552_v59 }
 0xbbe   :  { %v6961_v25 = vpop.f32.mrb[24].mxu0 }
 0xbbf   :  { %v7909_v37 = vadd.f32 %v6961_v25, %v6559_v38  ;;  %v6963_v39 = vpop.f32.mrb[25].mxu0 }
 0xbc0   :  { %v7910_v40 = vadd.f32 %v6963_v39, %v6563_v6  ;;  %v6965_v42 = vpop.f32.mrb[26].mxu0 }
 0xbc1   :  { %6968 = vst [vmem:[#allocation17] sm:$0xff] %v7909_v37  ;;  %v6966_v43 = vpop.f32.mrb[27].mxu0 }
 0xbc2   :  { %6969 = vst [vmem:[#allocation17 + $0x8] sm:$0xff] %v7910_v40 }
 0xbc3   :  { %9532 = shalt.err (!%p9529_p6)
}
 0xbc4   :  { %s9970_s0 = sld [smem:[#allocation27_spill]] }
 0xbca   :  { %s9533_s29 = scalar_lea.hbm %s9970_s0, 256 }
 0xbcb   :  { %p9534_p7 = scmp.ne.s32.totalorder %s9970_s0, %s9533_s29  ;;  %p9537_p8 = scmp.lt.u32.totalorder %s9533_s29, %s9970_s0 }
 0xbcd   :  { %p9539_p9 = pnand %p9537_p8, %p9534_p7 }
 0xbcf   :  { %9542 = shalt.err (!%p9539_p9)
}
 0xbd0   :  { %6979 = dma.vmem_to_hbm [thread:$0]  %s6977_s4, 256, %s9970_s0, [#allocation4]  }
 0xbd1   :  { %9553 = dma.done.wait [#allocation4], 256  }
 0xbd2   :  { %9554 = vsyncadd [#allocation4], 4294967040 }
 0xbd3   :  { %6983 = vsyncpa [#allocation3], 1 }
 0xbd4   :  { %6984 = vsyncpa [#allocation6], 1 }
 0xbd5   :  { %6985 = vsyncpa [#allocation9], 1 }
 0xbd6   :  { %6986 = vsyncpa [#allocation12], 1 }
 0xbd7   :  { %6987 = vsyncpa [#allocation15], 1 }
 0xbd8   :  { %6988 = vsyncpa [#allocation4], 1 }

</bundles_post_ra>
